<compile_context>
chip_gen: v7x
topology: tpu7x:2x2x1
jax: 0.10.0
libtpu: 0.0.40
codegen_flags: <defaults>
</compile_context>

<pallas_src>
import functools

import jax
import jax.numpy as jnp
from jax.experimental import pallas as pl
from jax.experimental.pallas import tpu as pltpu  # noqa: F401  (kept for TPU-specific tuning hooks)


class Env:
    FLOW_SIZE = 8
    RNN_HIDDEN = 32
    GAT_HIDDEN = 16
    GAT_OUTPUT = 32
    EXT_FEATURE_SIZE = 16
    EXT_FEATURE_EMBED_HIDDEN = 32
    FEATURE_EMBED_OUTPUT = 32
    TRAIN_FEATURE_SIZE = 16
    TRAIN_FEATURE_EMBED_HIDDEN = 32
    FUSION_HIDDEN = 64
    ACTION_NUM = 4
    DROPOUT_RATE = 0.1   # eval mode -> dropout is identity


# --------------------------------------------------------------------------
# Single fused kernel: whole Policy.forward in one grid-less pallas_call.
# --------------------------------------------------------------------------
def _policy_fused_kernel(
    # inputs
    xflow_ref,        # (SEQ*N_ST, FLOW)  flow sequences, time-major flattened
    xfeat_ref,        # (N_ST, EXT)
    xtra_ref,         # (1+NF+NR, TRAIN)  rows: [train, front..., rear...]
    # external-feature embed MLP (bias-free)
    ext_w1_ref, ext_w2_ref,
    # train-feature embed MLP (bias-free)
    tra_w1_ref, tra_w2_ref,
    # flow GRU, per-gate (PyTorch order r, z, n)
    fgru_wi_ref,      # (3, FLOW, H)
    fgru_wh_ref,      # (3, H, H)
    fgru_bi_ref,      # (3, 1, H)
    fgru_bh_ref,      # (3, 1, H)
    # conclusive GRU, per-gate; input weights split into feat / flow blocks
    cgru_wi_feat_ref,  # (3, F, H)
    cgru_wi_flow_ref,  # (3, H, H)
    cgru_wh_ref,       # (3, H, H)
    cgru_bi_ref,       # (3, 1, H)
    cgru_bh_ref,       # (3, 1, H)
    # attention score vectors (v_front / v_rear split into ctx / train halves)
    v_front_ctx_ref, v_front_tra_ref,   # (F, 1)
    v_rear_ctx_ref, v_rear_tra_ref,     # (F, 1)
    # fusion head: l1 split into 4 row-blocks [station_h, train, front, rear]
    fus_w1_ref,       # (4, 32, FUSION)
    fus_w2_ref,       # (FUSION, ACTION_NUM)
    # output
    out_ref,          # (1, ACTION_NUM)
    *, n_st, seq, n_front, n_rear,
):
    f32 = jnp.float32
    H = Env.RNN_HIDDEN

    # ---- per-station external-feature embedding: (N_ST, EXT) -> (N_ST, F) ----
    feat_h = jnp.maximum(
        jnp.dot(xfeat_ref[...], ext_w1_ref[...], preferred_element_type=f32), 0.0)
    feat_emb = jnp.dot(feat_h, ext_w2_ref[...], preferred_element_type=f32)

    # ---- flow GRU, vectorized over all N_ST stations --------------------------
    # Hoisted input projection: one matmul per gate over every timestep at once.
    x2d = xflow_ref[...]                                              # (SEQ*N_ST, FLOW)
    gi = [jnp.dot(x2d, fgru_wi_ref[g], preferred_element_type=f32) + fgru_bi_ref[g]
          for g in range(3)]                                          # 3 x (SEQ*N_ST, H)
    fwh = [fgru_wh_ref[g] for g in range(3)]
    fbh = [fgru_bh_ref[g] for g in range(3)]

    h_flow = jnp.zeros((n_st, H), f32)
    for t in range(seq):                                              # static unrolled loop
        lo = t * n_st
        gh_r = jnp.dot(h_flow, fwh[0], preferred_element_type=f32) + fbh[0]
        gh_z = jnp.dot(h_flow, fwh[1], preferred_element_type=f32) + fbh[1]
        gh_n = jnp.dot(h_flow, fwh[2], preferred_element_type=f32) + fbh[2]
        r = jax.nn.sigmoid(gi[0][lo:lo + n_st] + gh_r)
        z = jax.nn.sigmoid(gi[1][lo:lo + n_st] + gh_z)
        n = jnp.tanh(gi[2][lo:lo + n_st] + r * gh_n)
        h_flow = (1.0 - z) * n + z * h_flow                           # (N_ST, H)

    # TODO(synk): GAT branch (x_flow_adj == -1) not implemented; unreachable/broken in reference.

    # ---- conclusive GRU over the station sequence (batch = 1) -----------------
    # station vector = [feat_emb ; flow_h]; the concat is folded into two
    # input-weight blocks, and the input projection is hoisted out of the loop.
    ci = [jnp.dot(feat_emb, cgru_wi_feat_ref[g], preferred_element_type=f32)
          + jnp.dot(h_flow, cgru_wi_flow_ref[g], preferred_element_type=f32)
          + cgru_bi_ref[g]
          for g in range(3)]                                          # 3 x (N_ST, H)
    cwh = [cgru_wh_ref[g] for g in range(3)]
    cbh = [cgru_bh_ref[g] for g in range(3)]

    h_st = jnp.zeros((1, H), f32)
    for t in range(n_st):                                             # static unrolled loop
        gh_r = jnp.dot(h_st, cwh[0], preferred_element_type=f32) + cbh[0]
        gh_z = jnp.dot(h_st, cwh[1], preferred_element_type=f32) + cbh[1]
        gh_n = jnp.dot(h_st, cwh[2], preferred_element_type=f32) + cbh[2]
        r = jax.nn.sigmoid(ci[0][t:t + 1] + gh_r)
        z = jax.nn.sigmoid(ci[1][t:t + 1] + gh_z)
        n = jnp.tanh(ci[2][t:t + 1] + r * gh_n)
        h_st = (1.0 - z) * n + z * h_st                               # (1, H)

    # ---- train-feature embeddings, batched for [train, front..., rear...] -----
    tra_h = jnp.maximum(
        jnp.dot(xtra_ref[...], tra_w1_ref[...], preferred_element_type=f32), 0.0)
    tra_emb = jnp.dot(tra_h, tra_w2_ref[...], preferred_element_type=f32)  # (1+NF+NR, F)
    train_emb = tra_emb[0:1]                                          # (1, F)
    front_emb = tra_emb[1:1 + n_front]                                # (NF, F)
    rear_emb = tra_emb[1 + n_front:1 + n_front + n_rear]              # (NR, F)

    # ---- attention pooling over front / rear context trains -------------------
    def attn_pool(ctx, v_ctx, v_tra):
        s = (jnp.dot(ctx, v_ctx, preferred_element_type=f32)
             + jnp.dot(train_emb, v_tra, preferred_element_type=f32))  # (N, 1)
        m = jnp.max(s, axis=0, keepdims=True)
        e = jnp.exp(s - m)
        w = e / jnp.sum(e, axis=0, keepdims=True)                      # softmax over N
        return jnp.sum(w * ctx, axis=0, keepdims=True) / jnp.float32(ctx.shape[0])

    front_out = attn_pool(front_emb, v_front_ctx_ref[...], v_front_tra_ref[...])
    rear_out = attn_pool(rear_emb, v_rear_ctx_ref[...], v_rear_tra_ref[...])

    # ---- fusion head (concat of [station_h, train, front, rear] folded into
    #      four row-block matmuls) ----------------------------------------------
    h1 = (jnp.dot(h_st, fus_w1_ref[0], preferred_element_type=f32)
          + jnp.dot(train_emb, fus_w1_ref[1], preferred_element_type=f32)
          + jnp.dot(front_out, fus_w1_ref[2], preferred_element_type=f32)
          + jnp.dot(rear_out, fus_w1_ref[3], preferred_element_type=f32))
    # TODO(synk): training-mode dropout (p=Env.DROPOUT_RATE) not implemented; eval => identity.
    h1 = jnp.maximum(h1, 0.0)
    out_ref[...] = jnp.dot(h1, fus_w2_ref[...], preferred_element_type=f32)


# --------------------------------------------------------------------------
# Deterministic parameter init (PyTorch-style uniform(-1/sqrt(fan_in), ...)),
# stored pre-transposed as (in_features, out_features).
# --------------------------------------------------------------------------
def _lin_t(key, in_f, out_f):
    b = 1.0 / jnp.sqrt(jnp.float32(in_f))
    return jax.random.uniform(key, (in_f, out_f), jnp.float32, -b, b)


def _gru_params(key, in_f, hid):
    k = jax.random.split(key, 4)
    b = 1.0 / jnp.sqrt(jnp.float32(hid))
    return dict(
        w_ih_t=jax.random.uniform(k[0], (in_f, 3 * hid), jnp.float32, -b, b),
        w_hh_t=jax.random.uniform(k[1], (hid, 3 * hid), jnp.float32, -b, b),
        b_ih=jax.random.uniform(k[2], (1, 3 * hid), jnp.float32, -b, b),
        b_hh=jax.random.uniform(k[3], (1, 3 * hid), jnp.float32, -b, b),
    )


def init_params(key):
    ks = jax.random.split(key, 12)
    F = Env.FEATURE_EMBED_OUTPUT
    return dict(
        rnn_flow=_gru_params(ks[0], Env.FLOW_SIZE, Env.RNN_HIDDEN),
        # NOTE: reference declares rnn_conclusive with FLOW_SIZE input but feeds
        # (FEATURE_EMBED_OUTPUT + RNN_HIDDEN)-dim station vectors; use actual dim.
        rnn_conclusive=_gru_params(ks[1], F + Env.RNN_HIDDEN, Env.RNN_HIDDEN),
        ext_l1_t=_lin_t(ks[2], Env.EXT_FEATURE_SIZE, Env.EXT_FEATURE_EMBED_HIDDEN),
        ext_l2_t=_lin_t(ks[3], Env.EXT_FEATURE_EMBED_HIDDEN, F),
        tra_l1_t=_lin_t(ks[4], Env.TRAIN_FEATURE_SIZE, Env.TRAIN_FEATURE_EMBED_HIDDEN),
        tra_l2_t=_lin_t(ks[5], Env.TRAIN_FEATURE_EMBED_HIDDEN, F),
        v_front_ctx=_lin_t(ks[6], F, 1),
        v_front_tra=_lin_t(ks[7], F, 1),
        v_rear_ctx=_lin_t(ks[8], F, 1),
        v_rear_tra=_lin_t(ks[9], F, 1),
        fusion_l1_t=_lin_t(ks[10], F * 3 + Env.RNN_HIDDEN, Env.FUSION_HIDDEN),
        fusion_l2_t=_lin_t(ks[11], Env.FUSION_HIDDEN, Env.ACTION_NUM),
    )


def pack_params(p):
    """Reorganize PyTorch-layout params into the fused-kernel layout (once)."""
    H = Env.RNN_HIDDEN
    F = Env.FEATURE_EMBED_OUTPUT

    def split_gru(g):
        wi = jnp.stack([g["w_ih_t"][:, k * H:(k + 1) * H] for k in range(3)])  # (3, in, H)
        wh = jnp.stack([g["w_hh_t"][:, k * H:(k + 1) * H] for k in range(3)])  # (3, H, H)
        bi = jnp.stack([g["b_ih"][:, k * H:(k + 1) * H] for k in range(3)])    # (3, 1, H)
        bh = jnp.stack([g["b_hh"][:, k * H:(k + 1) * H] for k in range(3)])    # (3, 1, H)
        return wi, wh, bi, bh

    fgru_wi, fgru_wh, fgru_bi, fgru_bh = split_gru(p["rnn_flow"])
    cgru_wi, cgru_wh, cgru_bi, cgru_bh = split_gru(p["rnn_conclusive"])

    fus_w1 = p["fusion_l1_t"]  # rows ordered [station_h(H), train(F), front(F), rear(F)]
    fus_w1_blocks = jnp.stack([
        fus_w1[0:H],
        fus_w1[H:H + F],
        fus_w1[H + F:H + 2 * F],
        fus_w1[H + 2 * F:H + 3 * F],
    ])                                                                 # (4, 32, FUSION)

    return dict(
        ext_w1=p["ext_l1_t"], ext_w2=p["ext_l2_t"],
        tra_w1=p["tra_l1_t"], tra_w2=p["tra_l2_t"],
        fgru_wi=fgru_wi, fgru_wh=fgru_wh, fgru_bi=fgru_bi, fgru_bh=fgru_bh,
        cgru_wi_feat=cgru_wi[:, :F, :], cgru_wi_flow=cgru_wi[:, F:, :],
        cgru_wh=cgru_wh, cgru_bi=cgru_bi, cgru_bh=cgru_bh,
        v_front_ctx=p["v_front_ctx"], v_front_tra=p["v_front_tra"],
        v_rear_ctx=p["v_rear_ctx"], v_rear_tra=p["v_rear_tra"],
        fus_w1=fus_w1_blocks, fus_w2=p["fusion_l2_t"],
    )


# --------------------------------------------------------------------------
# Forward pass: a single fused pallas_call (everything stays in VMEM/vregs).
# --------------------------------------------------------------------------
def policy_forward(packed, x_flows, x_features, x_train,
                   x_trains_context_front, x_trains_context_rear):
    n_st, seq, flow = x_flows.shape
    n_front = x_trains_context_front.shape[0]
    n_rear = x_trains_context_rear.shape[0]

    # Time-major flatten so the hoisted GRU input projection is one matmul and
    # each timestep's station rows are contiguous.
    x_flows_2d = jnp.transpose(x_flows, (1, 0, 2)).reshape(seq * n_st, flow)
    # Batch the three train-feature MLP inputs into one matrix.
    x_trains_all = jnp.concatenate(
        [x_train, x_trains_context_front, x_trains_context_rear], axis=0)

    kernel = functools.partial(_policy_fused_kernel, n_st=n_st, seq=seq,
                               n_front=n_front, n_rear=n_rear)
    return pl.pallas_call(
        kernel,
        out_shape=jax.ShapeDtypeStruct((1, Env.ACTION_NUM), jnp.float32),
    )(
        x_flows_2d, x_features, x_trains_all,
        packed["ext_w1"], packed["ext_w2"],
        packed["tra_w1"], packed["tra_w2"],
        packed["fgru_wi"], packed["fgru_wh"], packed["fgru_bi"], packed["fgru_bh"],
        packed["cgru_wi_feat"], packed["cgru_wi_flow"],
        packed["cgru_wh"], packed["cgru_bi"], packed["cgru_bh"],
        packed["v_front_ctx"], packed["v_front_tra"],
        packed["v_rear_ctx"], packed["v_rear_tra"],
        packed["fus_w1"], packed["fus_w2"],
    )


if __name__ == "__main__":
    key = jax.random.PRNGKey(0)
    kp, k1, k2, k3, k4, k5 = jax.random.split(key, 6)

    N_STATIONS, SEQ, N_FRONT, N_REAR = 4, 8, 3, 3

    params = init_params(kp)
    packed = pack_params(params)

    x_flows = jax.random.normal(k1, (N_STATIONS, SEQ, Env.FLOW_SIZE), jnp.float32)
    x_features = jax.random.normal(k2, (N_STATIONS, Env.EXT_FEATURE_SIZE), jnp.float32)
    x_train = jax.random.normal(k3, (1, Env.TRAIN_FEATURE_SIZE), jnp.float32)
    x_front = jax.random.normal(k4, (N_FRONT, Env.TRAIN_FEATURE_SIZE), jnp.float32)
    x_rear = jax.random.normal(k5, (N_REAR, Env.TRAIN_FEATURE_SIZE), jnp.float32)

    out = policy_forward(packed, x_flows, x_features, x_train, x_front, x_rear)
    out = jax.block_until_ready(out)
    assert out.shape == (1, Env.ACTION_NUM) and out.dtype == jnp.float32
    print("KERNEL_OK")
</pallas_src>

<mosaic_0001>
module attributes {stable_mosaic.version = 11 : i64} {
  func.func @_policy_fused_kernel(%arg0: memref<32x8xf32, #tpu.memory_space<vmem>>, %arg1: memref<4x16xf32, #tpu.memory_space<vmem>>, %arg2: memref<7x16xf32, #tpu.memory_space<vmem>>, %arg3: memref<16x32xf32, #tpu.memory_space<vmem>>, %arg4: memref<32x32xf32, #tpu.memory_space<vmem>>, %arg5: memref<16x32xf32, #tpu.memory_space<vmem>>, %arg6: memref<32x32xf32, #tpu.memory_space<vmem>>, %arg7: memref<3x8x32xf32, #tpu.memory_space<vmem>>, %arg8: memref<3x32x32xf32, #tpu.memory_space<vmem>>, %arg9: memref<3x1x32xf32, #tpu.memory_space<vmem>>, %arg10: memref<3x1x32xf32, #tpu.memory_space<vmem>>, %arg11: memref<3x32x32xf32, #tpu.memory_space<vmem>>, %arg12: memref<3x32x32xf32, #tpu.memory_space<vmem>>, %arg13: memref<3x32x32xf32, #tpu.memory_space<vmem>>, %arg14: memref<3x1x32xf32, #tpu.memory_space<vmem>>, %arg15: memref<3x1x32xf32, #tpu.memory_space<vmem>>, %arg16: memref<32x1xf32, #tpu.memory_space<vmem>>, %arg17: memref<32x1xf32, #tpu.memory_space<vmem>>, %arg18: memref<32x1xf32, #tpu.memory_space<vmem>>, %arg19: memref<32x1xf32, #tpu.memory_space<vmem>>, %arg20: memref<4x32x64xf32, #tpu.memory_space<vmem>>, %arg21: memref<64x4xf32, #tpu.memory_space<vmem>>, %arg22: memref<1x4xf32, #tpu.memory_space<vmem>>) attributes {dimension_semantics = [], scalar_prefetch = 0 : i64, scratch_operands = 0 : i64, tpu.core_type = #tpu.core_type<tc>} {
    %c0 = arith.constant 0 : index
    %c0_0 = arith.constant 0 : index
    %0 = vector.load %arg1[%c0, %c0_0] : memref<4x16xf32, #tpu.memory_space<vmem>>, vector<4x16xf32>
    %c0_1 = arith.constant 0 : index
    %c0_2 = arith.constant 0 : index
    %1 = vector.load %arg3[%c0_1, %c0_2] : memref<16x32xf32, #tpu.memory_space<vmem>>, vector<16x32xf32>
    %cst = arith.constant dense<0.000000e+00> : vector<4x32xf32>
    %2 = tpu.matmul %0, %1, %cst {dimension_numbers = #tpu.dot_dimension_numbers<[1], [0], [0], [1], [0, 0, 1, 1], [], []>} : vector<4x16xf32>, vector<16x32xf32>, vector<4x32xf32> -> vector<4x32xf32>
    %cst_3 = arith.constant 0.000000e+00 : f32
    %3 = vector.broadcast %cst_3 : f32 to vector<4x32xf32>
    %4 = arith.maximumf %2, %3 : vector<4x32xf32>
    %c0_4 = arith.constant 0 : index
    %c0_5 = arith.constant 0 : index
    %5 = vector.load %arg4[%c0_4, %c0_5] : memref<32x32xf32, #tpu.memory_space<vmem>>, vector<32x32xf32>
    %cst_6 = arith.constant dense<0.000000e+00> : vector<4x32xf32>
    %6 = tpu.matmul %4, %5, %cst_6 {dimension_numbers = #tpu.dot_dimension_numbers<[1], [0], [0], [1], [0, 0, 1, 1], [], []>} : vector<4x32xf32>, vector<32x32xf32>, vector<4x32xf32> -> vector<4x32xf32>
    %c0_7 = arith.constant 0 : index
    %c0_8 = arith.constant 0 : index
    %7 = vector.load %arg0[%c0_7, %c0_8] : memref<32x8xf32, #tpu.memory_space<vmem>>, vector<32x8xf32>
    %c0_9 = arith.constant 0 : index
    %c0_10 = arith.constant 0 : index
    %c0_11 = arith.constant 0 : index
    %8 = vector.load %arg7[%c0_9, %c0_10, %c0_11] : memref<3x8x32xf32, #tpu.memory_space<vmem>>, vector<1x8x32xf32>
    %9 = vector.shape_cast %8 : vector<1x8x32xf32> to vector<8x32xf32>
    %cst_12 = arith.constant dense<0.000000e+00> : vector<32x32xf32>
    %10 = tpu.matmul %7, %9, %cst_12 {dimension_numbers = #tpu.dot_dimension_numbers<[1], [0], [0], [1], [0, 0, 1, 1], [], []>} : vector<32x8xf32>, vector<8x32xf32>, vector<32x32xf32> -> vector<32x32xf32>
    %c0_13 = arith.constant 0 : index
    %c0_14 = arith.constant 0 : index
    %c0_15 = arith.constant 0 : index
    %11 = vector.load %arg9[%c0_13, %c0_14, %c0_15] : memref<3x1x32xf32, #tpu.memory_space<vmem>>, vector<1x1x32xf32>
    %12 = vector.shape_cast %11 : vector<1x1x32xf32> to vector<1x32xf32>
    %13 = vector.broadcast %12 : vector<1x32xf32> to vector<32x32xf32>
    %14 = arith.addf %10, %13 : vector<32x32xf32>
    %c1 = arith.constant 1 : index
    %c0_16 = arith.constant 0 : index
    %c0_17 = arith.constant 0 : index
    %15 = vector.load %arg7[%c1, %c0_16, %c0_17] : memref<3x8x32xf32, #tpu.memory_space<vmem>>, vector<1x8x32xf32>
    %16 = vector.shape_cast %15 : vector<1x8x32xf32> to vector<8x32xf32>
    %cst_18 = arith.constant dense<0.000000e+00> : vector<32x32xf32>
    %17 = tpu.matmul %7, %16, %cst_18 {dimension_numbers = #tpu.dot_dimension_numbers<[1], [0], [0], [1], [0, 0, 1, 1], [], []>} : vector<32x8xf32>, vector<8x32xf32>, vector<32x32xf32> -> vector<32x32xf32>
    %c1_19 = arith.constant 1 : index
    %c0_20 = arith.constant 0 : index
    %c0_21 = arith.constant 0 : index
    %18 = vector.load %arg9[%c1_19, %c0_20, %c0_21] : memref<3x1x32xf32, #tpu.memory_space<vmem>>, vector<1x1x32xf32>
    %19 = vector.shape_cast %18 : vector<1x1x32xf32> to vector<1x32xf32>
    %20 = vector.broadcast %19 : vector<1x32xf32> to vector<32x32xf32>
    %21 = arith.addf %17, %20 : vector<32x32xf32>
    %c2 = arith.constant 2 : index
    %c0_22 = arith.constant 0 : index
    %c0_23 = arith.constant 0 : index
    %22 = vector.load %arg7[%c2, %c0_22, %c0_23] : memref<3x8x32xf32, #tpu.memory_space<vmem>>, vector<1x8x32xf32>
    %23 = vector.shape_cast %22 : vector<1x8x32xf32> to vector<8x32xf32>
    %cst_24 = arith.constant dense<0.000000e+00> : vector<32x32xf32>
    %24 = tpu.matmul %7, %23, %cst_24 {dimension_numbers = #tpu.dot_dimension_numbers<[1], [0], [0], [1], [0, 0, 1, 1], [], []>} : vector<32x8xf32>, vector<8x32xf32>, vector<32x32xf32> -> vector<32x32xf32>
    %c2_25 = arith.constant 2 : index
    %c0_26 = arith.constant 0 : index
    %c0_27 = arith.constant 0 : index
    %25 = vector.load %arg9[%c2_25, %c0_26, %c0_27] : memref<3x1x32xf32, #tpu.memory_space<vmem>>, vector<1x1x32xf32>
    %26 = vector.shape_cast %25 : vector<1x1x32xf32> to vector<1x32xf32>
    %27 = vector.broadcast %26 : vector<1x32xf32> to vector<32x32xf32>
    %28 = arith.addf %24, %27 : vector<32x32xf32>
    %c0_28 = arith.constant 0 : index
    %c0_29 = arith.constant 0 : index
    %c0_30 = arith.constant 0 : index
    %29 = vector.load %arg8[%c0_28, %c0_29, %c0_30] : memref<3x32x32xf32, #tpu.memory_space<vmem>>, vector<1x32x32xf32>
    %30 = vector.shape_cast %29 : vector<1x32x32xf32> to vector<32x32xf32>
    %c1_31 = arith.constant 1 : index
    %c0_32 = arith.constant 0 : index
    %c0_33 = arith.constant 0 : index
    %31 = vector.load %arg8[%c1_31, %c0_32, %c0_33] : memref<3x32x32xf32, #tpu.memory_space<vmem>>, vector<1x32x32xf32>
    %32 = vector.shape_cast %31 : vector<1x32x32xf32> to vector<32x32xf32>
    %c2_34 = arith.constant 2 : index
    %c0_35 = arith.constant 0 : index
    %c0_36 = arith.constant 0 : index
    %33 = vector.load %arg8[%c2_34, %c0_35, %c0_36] : memref<3x32x32xf32, #tpu.memory_space<vmem>>, vector<1x32x32xf32>
    %34 = vector.shape_cast %33 : vector<1x32x32xf32> to vector<32x32xf32>
    %c0_37 = arith.constant 0 : index
    %c0_38 = arith.constant 0 : index
    %c0_39 = arith.constant 0 : index
    %35 = vector.load %arg10[%c0_37, %c0_38, %c0_39] : memref<3x1x32xf32, #tpu.memory_space<vmem>>, vector<1x1x32xf32>
    %36 = vector.shape_cast %35 : vector<1x1x32xf32> to vector<1x32xf32>
    %c1_40 = arith.constant 1 : index
    %c0_41 = arith.constant 0 : index
    %c0_42 = arith.constant 0 : index
    %37 = vector.load %arg10[%c1_40, %c0_41, %c0_42] : memref<3x1x32xf32, #tpu.memory_space<vmem>>, vector<1x1x32xf32>
    %38 = vector.shape_cast %37 : vector<1x1x32xf32> to vector<1x32xf32>
    %c2_43 = arith.constant 2 : index
    %c0_44 = arith.constant 0 : index
    %c0_45 = arith.constant 0 : index
    %39 = vector.load %arg10[%c2_43, %c0_44, %c0_45] : memref<3x1x32xf32, #tpu.memory_space<vmem>>, vector<1x1x32xf32>
    %40 = vector.shape_cast %39 : vector<1x1x32xf32> to vector<1x32xf32>
    %cst_46 = arith.constant 0.000000e+00 : f32
    %41 = vector.broadcast %cst_46 : f32 to vector<4x32xf32>
    %cst_47 = arith.constant dense<0.000000e+00> : vector<4x32xf32>
    %42 = tpu.matmul %41, %30, %cst_47 {dimension_numbers = #tpu.dot_dimension_numbers<[1], [0], [0], [1], [0, 0, 1, 1], [], []>} : vector<4x32xf32>, vector<32x32xf32>, vector<4x32xf32> -> vector<4x32xf32>
    %43 = vector.broadcast %36 : vector<1x32xf32> to vector<4x32xf32>
    %44 = arith.addf %42, %43 : vector<4x32xf32>
    %cst_48 = arith.constant dense<0.000000e+00> : vector<4x32xf32>
    %45 = tpu.matmul %41, %32, %cst_48 {dimension_numbers = #tpu.dot_dimension_numbers<[1], [0], [0], [1], [0, 0, 1, 1], [], []>} : vector<4x32xf32>, vector<32x32xf32>, vector<4x32xf32> -> vector<4x32xf32>
    %46 = vector.broadcast %38 : vector<1x32xf32> to vector<4x32xf32>
    %47 = arith.addf %45, %46 : vector<4x32xf32>
    %cst_49 = arith.constant dense<0.000000e+00> : vector<4x32xf32>
    %48 = tpu.matmul %41, %34, %cst_49 {dimension_numbers = #tpu.dot_dimension_numbers<[1], [0], [0], [1], [0, 0, 1, 1], [], []>} : vector<4x32xf32>, vector<32x32xf32>, vector<4x32xf32> -> vector<4x32xf32>
    %49 = vector.broadcast %40 : vector<1x32xf32> to vector<4x32xf32>
    %50 = arith.addf %48, %49 : vector<4x32xf32>
    %51 = vector.extract_strided_slice %14 {offsets = [0, 0], sizes = [4, 32], strides = [1, 1]} : vector<32x32xf32> to vector<4x32xf32>
    %52 = arith.addf %51, %44 : vector<4x32xf32>
    %53 = arith.negf %52 : vector<4x32xf32>
    %54 = math.exp %53 : vector<4x32xf32>
    %cst_50 = arith.constant 1.000000e+00 : f32
    %55 = vector.broadcast %cst_50 : f32 to vector<4x32xf32>
    %56 = arith.addf %55, %54 : vector<4x32xf32>
    %57 = arith.divf %55, %56 : vector<4x32xf32>
    %58 = vector.extract_strided_slice %21 {offsets = [0, 0], sizes = [4, 32], strides = [1, 1]} : vector<32x32xf32> to vector<4x32xf32>
    %59 = arith.addf %58, %47 : vector<4x32xf32>
    %60 = arith.negf %59 : vector<4x32xf32>
    %61 = math.exp %60 : vector<4x32xf32>
    %cst_51 = arith.constant 1.000000e+00 : f32
    %62 = vector.broadcast %cst_51 : f32 to vector<4x32xf32>
    %63 = arith.addf %62, %61 : vector<4x32xf32>
    %64 = arith.divf %62, %63 : vector<4x32xf32>
    %65 = vector.extract_strided_slice %28 {offsets = [0, 0], sizes = [4, 32], strides = [1, 1]} : vector<32x32xf32> to vector<4x32xf32>
    %66 = arith.mulf %57, %50 : vector<4x32xf32>
    %67 = arith.addf %65, %66 : vector<4x32xf32>
    %68 = math.tanh %67 : vector<4x32xf32>
    %cst_52 = arith.constant 1.000000e+00 : f32
    %69 = vector.broadcast %cst_52 : f32 to vector<4x32xf32>
    %70 = arith.subf %69, %64 : vector<4x32xf32>
    %71 = arith.mulf %70, %68 : vector<4x32xf32>
    %72 = arith.mulf %64, %41 : vector<4x32xf32>
    %73 = arith.addf %71, %72 : vector<4x32xf32>
    %cst_53 = arith.constant dense<0.000000e+00> : vector<4x32xf32>
    %74 = tpu.matmul %73, %30, %cst_53 {dimension_numbers = #tpu.dot_dimension_numbers<[1], [0], [0], [1], [0, 0, 1, 1], [], []>} : vector<4x32xf32>, vector<32x32xf32>, vector<4x32xf32> -> vector<4x32xf32>
    %75 = vector.broadcast %36 : vector<1x32xf32> to vector<4x32xf32>
    %76 = arith.addf %74, %75 : vector<4x32xf32>
    %cst_54 = arith.constant dense<0.000000e+00> : vector<4x32xf32>
    %77 = tpu.matmul %73, %32, %cst_54 {dimension_numbers = #tpu.dot_dimension_numbers<[1], [0], [0], [1], [0, 0, 1, 1], [], []>} : vector<4x32xf32>, vector<32x32xf32>, vector<4x32xf32> -> vector<4x32xf32>
    %78 = vector.broadcast %38 : vector<1x32xf32> to vector<4x32xf32>
    %79 = arith.addf %77, %78 : vector<4x32xf32>
    %cst_55 = arith.constant dense<0.000000e+00> : vector<4x32xf32>
    %80 = tpu.matmul %73, %34, %cst_55 {dimension_numbers = #tpu.dot_dimension_numbers<[1], [0], [0], [1], [0, 0, 1, 1], [], []>} : vector<4x32xf32>, vector<32x32xf32>, vector<4x32xf32> -> vector<4x32xf32>
    %81 = vector.broadcast %40 : vector<1x32xf32> to vector<4x32xf32>
    %82 = arith.addf %80, %81 : vector<4x32xf32>
    %83 = vector.extract_strided_slice %14 {offsets = [4, 0], sizes = [4, 32], strides = [1, 1]} : vector<32x32xf32> to vector<4x32xf32>
    %84 = arith.addf %83, %76 : vector<4x32xf32>
    %85 = arith.negf %84 : vector<4x32xf32>
    %86 = math.exp %85 : vector<4x32xf32>
    %cst_56 = arith.constant 1.000000e+00 : f32
    %87 = vector.broadcast %cst_56 : f32 to vector<4x32xf32>
    %88 = arith.addf %87, %86 : vector<4x32xf32>
    %89 = arith.divf %87, %88 : vector<4x32xf32>
    %90 = vector.extract_strided_slice %21 {offsets = [4, 0], sizes = [4, 32], strides = [1, 1]} : vector<32x32xf32> to vector<4x32xf32>
    %91 = arith.addf %90, %79 : vector<4x32xf32>
    %92 = arith.negf %91 : vector<4x32xf32>
    %93 = math.exp %92 : vector<4x32xf32>
    %cst_57 = arith.constant 1.000000e+00 : f32
    %94 = vector.broadcast %cst_57 : f32 to vector<4x32xf32>
    %95 = arith.addf %94, %93 : vector<4x32xf32>
    %96 = arith.divf %94, %95 : vector<4x32xf32>
    %97 = vector.extract_strided_slice %28 {offsets = [4, 0], sizes = [4, 32], strides = [1, 1]} : vector<32x32xf32> to vector<4x32xf32>
    %98 = arith.mulf %89, %82 : vector<4x32xf32>
    %99 = arith.addf %97, %98 : vector<4x32xf32>
    %100 = math.tanh %99 : vector<4x32xf32>
    %cst_58 = arith.constant 1.000000e+00 : f32
    %101 = vector.broadcast %cst_58 : f32 to vector<4x32xf32>
    %102 = arith.subf %101, %96 : vector<4x32xf32>
    %103 = arith.mulf %102, %100 : vector<4x32xf32>
    %104 = arith.mulf %96, %73 : vector<4x32xf32>
    %105 = arith.addf %103, %104 : vector<4x32xf32>
    %cst_59 = arith.constant dense<0.000000e+00> : vector<4x32xf32>
    %106 = tpu.matmul %105, %30, %cst_59 {dimension_numbers = #tpu.dot_dimension_numbers<[1], [0], [0], [1], [0, 0, 1, 1], [], []>} : vector<4x32xf32>, vector<32x32xf32>, vector<4x32xf32> -> vector<4x32xf32>
    %107 = vector.broadcast %36 : vector<1x32xf32> to vector<4x32xf32>
    %108 = arith.addf %106, %107 : vector<4x32xf32>
    %cst_60 = arith.constant dense<0.000000e+00> : vector<4x32xf32>
    %109 = tpu.matmul %105, %32, %cst_60 {dimension_numbers = #tpu.dot_dimension_numbers<[1], [0], [0], [1], [0, 0, 1, 1], [], []>} : vector<4x32xf32>, vector<32x32xf32>, vector<4x32xf32> -> vector<4x32xf32>
    %110 = vector.broadcast %38 : vector<1x32xf32> to vector<4x32xf32>
    %111 = arith.addf %109, %110 : vector<4x32xf32>
    %cst_61 = arith.constant dense<0.000000e+00> : vector<4x32xf32>
    %112 = tpu.matmul %105, %34, %cst_61 {dimension_numbers = #tpu.dot_dimension_numbers<[1], [0], [0], [1], [0, 0, 1, 1], [], []>} : vector<4x32xf32>, vector<32x32xf32>, vector<4x32xf32> -> vector<4x32xf32>
    %113 = vector.broadcast %40 : vector<1x32xf32> to vector<4x32xf32>
    %114 = arith.addf %112, %113 : vector<4x32xf32>
    %115 = vector.extract_strided_slice %14 {offsets = [8, 0], sizes = [4, 32], strides = [1, 1]} : vector<32x32xf32> to vector<4x32xf32>
    %116 = arith.addf %115, %108 : vector<4x32xf32>
    %117 = arith.negf %116 : vector<4x32xf32>
    %118 = math.exp %117 : vector<4x32xf32>
    %cst_62 = arith.constant 1.000000e+00 : f32
    %119 = vector.broadcast %cst_62 : f32 to vector<4x32xf32>
    %120 = arith.addf %119, %118 : vector<4x32xf32>
    %121 = arith.divf %119, %120 : vector<4x32xf32>
    %122 = vector.extract_strided_slice %21 {offsets = [8, 0], sizes = [4, 32], strides = [1, 1]} : vector<32x32xf32> to vector<4x32xf32>
    %123 = arith.addf %122, %111 : vector<4x32xf32>
    %124 = arith.negf %123 : vector<4x32xf32>
    %125 = math.exp %124 : vector<4x32xf32>
    %cst_63 = arith.constant 1.000000e+00 : f32
    %126 = vector.broadcast %cst_63 : f32 to vector<4x32xf32>
    %127 = arith.addf %126, %125 : vector<4x32xf32>
    %128 = arith.divf %126, %127 : vector<4x32xf32>
    %129 = vector.extract_strided_slice %28 {offsets = [8, 0], sizes = [4, 32], strides = [1, 1]} : vector<32x32xf32> to vector<4x32xf32>
    %130 = arith.mulf %121, %114 : vector<4x32xf32>
    %131 = arith.addf %129, %130 : vector<4x32xf32>
    %132 = math.tanh %131 : vector<4x32xf32>
    %cst_64 = arith.constant 1.000000e+00 : f32
    %133 = vector.broadcast %cst_64 : f32 to vector<4x32xf32>
    %134 = arith.subf %133, %128 : vector<4x32xf32>
    %135 = arith.mulf %134, %132 : vector<4x32xf32>
    %136 = arith.mulf %128, %105 : vector<4x32xf32>
    %137 = arith.addf %135, %136 : vector<4x32xf32>
    %cst_65 = arith.constant dense<0.000000e+00> : vector<4x32xf32>
    %138 = tpu.matmul %137, %30, %cst_65 {dimension_numbers = #tpu.dot_dimension_numbers<[1], [0], [0], [1], [0, 0, 1, 1], [], []>} : vector<4x32xf32>, vector<32x32xf32>, vector<4x32xf32> -> vector<4x32xf32>
    %139 = vector.broadcast %36 : vector<1x32xf32> to vector<4x32xf32>
    %140 = arith.addf %138, %139 : vector<4x32xf32>
    %cst_66 = arith.constant dense<0.000000e+00> : vector<4x32xf32>
    %141 = tpu.matmul %137, %32, %cst_66 {dimension_numbers = #tpu.dot_dimension_numbers<[1], [0], [0], [1], [0, 0, 1, 1], [], []>} : vector<4x32xf32>, vector<32x32xf32>, vector<4x32xf32> -> vector<4x32xf32>
    %142 = vector.broadcast %38 : vector<1x32xf32> to vector<4x32xf32>
    %143 = arith.addf %141, %142 : vector<4x32xf32>
    %cst_67 = arith.constant dense<0.000000e+00> : vector<4x32xf32>
    %144 = tpu.matmul %137, %34, %cst_67 {dimension_numbers = #tpu.dot_dimension_numbers<[1], [0], [0], [1], [0, 0, 1, 1], [], []>} : vector<4x32xf32>, vector<32x32xf32>, vector<4x32xf32> -> vector<4x32xf32>
    %145 = vector.broadcast %40 : vector<1x32xf32> to vector<4x32xf32>
    %146 = arith.addf %144, %145 : vector<4x32xf32>
    %147 = vector.extract_strided_slice %14 {offsets = [12, 0], sizes = [4, 32], strides = [1, 1]} : vector<32x32xf32> to vector<4x32xf32>
    %148 = arith.addf %147, %140 : vector<4x32xf32>
    %149 = arith.negf %148 : vector<4x32xf32>
    %150 = math.exp %149 : vector<4x32xf32>
    %cst_68 = arith.constant 1.000000e+00 : f32
    %151 = vector.broadcast %cst_68 : f32 to vector<4x32xf32>
    %152 = arith.addf %151, %150 : vector<4x32xf32>
    %153 = arith.divf %151, %152 : vector<4x32xf32>
    %154 = vector.extract_strided_slice %21 {offsets = [12, 0], sizes = [4, 32], strides = [1, 1]} : vector<32x32xf32> to vector<4x32xf32>
    %155 = arith.addf %154, %143 : vector<4x32xf32>
    %156 = arith.negf %155 : vector<4x32xf32>
    %157 = math.exp %156 : vector<4x32xf32>
    %cst_69 = arith.constant 1.000000e+00 : f32
    %158 = vector.broadcast %cst_69 : f32 to vector<4x32xf32>
    %159 = arith.addf %158, %157 : vector<4x32xf32>
    %160 = arith.divf %158, %159 : vector<4x32xf32>
    %161 = vector.extract_strided_slice %28 {offsets = [12, 0], sizes = [4, 32], strides = [1, 1]} : vector<32x32xf32> to vector<4x32xf32>
    %162 = arith.mulf %153, %146 : vector<4x32xf32>
    %163 = arith.addf %161, %162 : vector<4x32xf32>
    %164 = math.tanh %163 : vector<4x32xf32>
    %cst_70 = arith.constant 1.000000e+00 : f32
    %165 = vector.broadcast %cst_70 : f32 to vector<4x32xf32>
    %166 = arith.subf %165, %160 : vector<4x32xf32>
    %167 = arith.mulf %166, %164 : vector<4x32xf32>
    %168 = arith.mulf %160, %137 : vector<4x32xf32>
    %169 = arith.addf %167, %168 : vector<4x32xf32>
    %cst_71 = arith.constant dense<0.000000e+00> : vector<4x32xf32>
    %170 = tpu.matmul %169, %30, %cst_71 {dimension_numbers = #tpu.dot_dimension_numbers<[1], [0], [0], [1], [0, 0, 1, 1], [], []>} : vector<4x32xf32>, vector<32x32xf32>, vector<4x32xf32> -> vector<4x32xf32>
    %171 = vector.broadcast %36 : vector<1x32xf32> to vector<4x32xf32>
    %172 = arith.addf %170, %171 : vector<4x32xf32>
    %cst_72 = arith.constant dense<0.000000e+00> : vector<4x32xf32>
    %173 = tpu.matmul %169, %32, %cst_72 {dimension_numbers = #tpu.dot_dimension_numbers<[1], [0], [0], [1], [0, 0, 1, 1], [], []>} : vector<4x32xf32>, vector<32x32xf32>, vector<4x32xf32> -> vector<4x32xf32>
    %174 = vector.broadcast %38 : vector<1x32xf32> to vector<4x32xf32>
    %175 = arith.addf %173, %174 : vector<4x32xf32>
    %cst_73 = arith.constant dense<0.000000e+00> : vector<4x32xf32>
    %176 = tpu.matmul %169, %34, %cst_73 {dimension_numbers = #tpu.dot_dimension_numbers<[1], [0], [0], [1], [0, 0, 1, 1], [], []>} : vector<4x32xf32>, vector<32x32xf32>, vector<4x32xf32> -> vector<4x32xf32>
    %177 = vector.broadcast %40 : vector<1x32xf32> to vector<4x32xf32>
    %178 = arith.addf %176, %177 : vector<4x32xf32>
    %179 = vector.extract_strided_slice %14 {offsets = [16, 0], sizes = [4, 32], strides = [1, 1]} : vector<32x32xf32> to vector<4x32xf32>
    %180 = arith.addf %179, %172 : vector<4x32xf32>
    %181 = arith.negf %180 : vector<4x32xf32>
    %182 = math.exp %181 : vector<4x32xf32>
    %cst_74 = arith.constant 1.000000e+00 : f32
    %183 = vector.broadcast %cst_74 : f32 to vector<4x32xf32>
    %184 = arith.addf %183, %182 : vector<4x32xf32>
    %185 = arith.divf %183, %184 : vector<4x32xf32>
    %186 = vector.extract_strided_slice %21 {offsets = [16, 0], sizes = [4, 32], strides = [1, 1]} : vector<32x32xf32> to vector<4x32xf32>
    %187 = arith.addf %186, %175 : vector<4x32xf32>
    %188 = arith.negf %187 : vector<4x32xf32>
    %189 = math.exp %188 : vector<4x32xf32>
    %cst_75 = arith.constant 1.000000e+00 : f32
    %190 = vector.broadcast %cst_75 : f32 to vector<4x32xf32>
    %191 = arith.addf %190, %189 : vector<4x32xf32>
    %192 = arith.divf %190, %191 : vector<4x32xf32>
    %193 = vector.extract_strided_slice %28 {offsets = [16, 0], sizes = [4, 32], strides = [1, 1]} : vector<32x32xf32> to vector<4x32xf32>
    %194 = arith.mulf %185, %178 : vector<4x32xf32>
    %195 = arith.addf %193, %194 : vector<4x32xf32>
    %196 = math.tanh %195 : vector<4x32xf32>
    %cst_76 = arith.constant 1.000000e+00 : f32
    %197 = vector.broadcast %cst_76 : f32 to vector<4x32xf32>
    %198 = arith.subf %197, %192 : vector<4x32xf32>
    %199 = arith.mulf %198, %196 : vector<4x32xf32>
    %200 = arith.mulf %192, %169 : vector<4x32xf32>
    %201 = arith.addf %199, %200 : vector<4x32xf32>
    %cst_77 = arith.constant dense<0.000000e+00> : vector<4x32xf32>
    %202 = tpu.matmul %201, %30, %cst_77 {dimension_numbers = #tpu.dot_dimension_numbers<[1], [0], [0], [1], [0, 0, 1, 1], [], []>} : vector<4x32xf32>, vector<32x32xf32>, vector<4x32xf32> -> vector<4x32xf32>
    %203 = vector.broadcast %36 : vector<1x32xf32> to vector<4x32xf32>
    %204 = arith.addf %202, %203 : vector<4x32xf32>
    %cst_78 = arith.constant dense<0.000000e+00> : vector<4x32xf32>
    %205 = tpu.matmul %201, %32, %cst_78 {dimension_numbers = #tpu.dot_dimension_numbers<[1], [0], [0], [1], [0, 0, 1, 1], [], []>} : vector<4x32xf32>, vector<32x32xf32>, vector<4x32xf32> -> vector<4x32xf32>
    %206 = vector.broadcast %38 : vector<1x32xf32> to vector<4x32xf32>
    %207 = arith.addf %205, %206 : vector<4x32xf32>
    %cst_79 = arith.constant dense<0.000000e+00> : vector<4x32xf32>
    %208 = tpu.matmul %201, %34, %cst_79 {dimension_numbers = #tpu.dot_dimension_numbers<[1], [0], [0], [1], [0, 0, 1, 1], [], []>} : vector<4x32xf32>, vector<32x32xf32>, vector<4x32xf32> -> vector<4x32xf32>
    %209 = vector.broadcast %40 : vector<1x32xf32> to vector<4x32xf32>
    %210 = arith.addf %208, %209 : vector<4x32xf32>
    %211 = vector.extract_strided_slice %14 {offsets = [20, 0], sizes = [4, 32], strides = [1, 1]} : vector<32x32xf32> to vector<4x32xf32>
    %212 = arith.addf %211, %204 : vector<4x32xf32>
    %213 = arith.negf %212 : vector<4x32xf32>
    %214 = math.exp %213 : vector<4x32xf32>
    %cst_80 = arith.constant 1.000000e+00 : f32
    %215 = vector.broadcast %cst_80 : f32 to vector<4x32xf32>
    %216 = arith.addf %215, %214 : vector<4x32xf32>
    %217 = arith.divf %215, %216 : vector<4x32xf32>
    %218 = vector.extract_strided_slice %21 {offsets = [20, 0], sizes = [4, 32], strides = [1, 1]} : vector<32x32xf32> to vector<4x32xf32>
    %219 = arith.addf %218, %207 : vector<4x32xf32>
    %220 = arith.negf %219 : vector<4x32xf32>
    %221 = math.exp %220 : vector<4x32xf32>
    %cst_81 = arith.constant 1.000000e+00 : f32
    %222 = vector.broadcast %cst_81 : f32 to vector<4x32xf32>
    %223 = arith.addf %222, %221 : vector<4x32xf32>
    %224 = arith.divf %222, %223 : vector<4x32xf32>
    %225 = vector.extract_strided_slice %28 {offsets = [20, 0], sizes = [4, 32], strides = [1, 1]} : vector<32x32xf32> to vector<4x32xf32>
    %226 = arith.mulf %217, %210 : vector<4x32xf32>
    %227 = arith.addf %225, %226 : vector<4x32xf32>
    %228 = math.tanh %227 : vector<4x32xf32>
    %cst_82 = arith.constant 1.000000e+00 : f32
    %229 = vector.broadcast %cst_82 : f32 to vector<4x32xf32>
    %230 = arith.subf %229, %224 : vector<4x32xf32>
    %231 = arith.mulf %230, %228 : vector<4x32xf32>
    %232 = arith.mulf %224, %201 : vector<4x32xf32>
    %233 = arith.addf %231, %232 : vector<4x32xf32>
    %cst_83 = arith.constant dense<0.000000e+00> : vector<4x32xf32>
    %234 = tpu.matmul %233, %30, %cst_83 {dimension_numbers = #tpu.dot_dimension_numbers<[1], [0], [0], [1], [0, 0, 1, 1], [], []>} : vector<4x32xf32>, vector<32x32xf32>, vector<4x32xf32> -> vector<4x32xf32>
    %235 = vector.broadcast %36 : vector<1x32xf32> to vector<4x32xf32>
    %236 = arith.addf %234, %235 : vector<4x32xf32>
    %cst_84 = arith.constant dense<0.000000e+00> : vector<4x32xf32>
    %237 = tpu.matmul %233, %32, %cst_84 {dimension_numbers = #tpu.dot_dimension_numbers<[1], [0], [0], [1], [0, 0, 1, 1], [], []>} : vector<4x32xf32>, vector<32x32xf32>, vector<4x32xf32> -> vector<4x32xf32>
    %238 = vector.broadcast %38 : vector<1x32xf32> to vector<4x32xf32>
    %239 = arith.addf %237, %238 : vector<4x32xf32>
    %cst_85 = arith.constant dense<0.000000e+00> : vector<4x32xf32>
    %240 = tpu.matmul %233, %34, %cst_85 {dimension_numbers = #tpu.dot_dimension_numbers<[1], [0], [0], [1], [0, 0, 1, 1], [], []>} : vector<4x32xf32>, vector<32x32xf32>, vector<4x32xf32> -> vector<4x32xf32>
    %241 = vector.broadcast %40 : vector<1x32xf32> to vector<4x32xf32>
    %242 = arith.addf %240, %241 : vector<4x32xf32>
    %243 = vector.extract_strided_slice %14 {offsets = [24, 0], sizes = [4, 32], strides = [1, 1]} : vector<32x32xf32> to vector<4x32xf32>
    %244 = arith.addf %243, %236 : vector<4x32xf32>
    %245 = arith.negf %244 : vector<4x32xf32>
    %246 = math.exp %245 : vector<4x32xf32>
    %cst_86 = arith.constant 1.000000e+00 : f32
    %247 = vector.broadcast %cst_86 : f32 to vector<4x32xf32>
    %248 = arith.addf %247, %246 : vector<4x32xf32>
    %249 = arith.divf %247, %248 : vector<4x32xf32>
    %250 = vector.extract_strided_slice %21 {offsets = [24, 0], sizes = [4, 32], strides = [1, 1]} : vector<32x32xf32> to vector<4x32xf32>
    %251 = arith.addf %250, %239 : vector<4x32xf32>
    %252 = arith.negf %251 : vector<4x32xf32>
    %253 = math.exp %252 : vector<4x32xf32>
    %cst_87 = arith.constant 1.000000e+00 : f32
    %254 = vector.broadcast %cst_87 : f32 to vector<4x32xf32>
    %255 = arith.addf %254, %253 : vector<4x32xf32>
    %256 = arith.divf %254, %255 : vector<4x32xf32>
    %257 = vector.extract_strided_slice %28 {offsets = [24, 0], sizes = [4, 32], strides = [1, 1]} : vector<32x32xf32> to vector<4x32xf32>
    %258 = arith.mulf %249, %242 : vector<4x32xf32>
    %259 = arith.addf %257, %258 : vector<4x32xf32>
    %260 = math.tanh %259 : vector<4x32xf32>
    %cst_88 = arith.constant 1.000000e+00 : f32
    %261 = vector.broadcast %cst_88 : f32 to vector<4x32xf32>
    %262 = arith.subf %261, %256 : vector<4x32xf32>
    %263 = arith.mulf %262, %260 : vector<4x32xf32>
    %264 = arith.mulf %256, %233 : vector<4x32xf32>
    %265 = arith.addf %263, %264 : vector<4x32xf32>
    %cst_89 = arith.constant dense<0.000000e+00> : vector<4x32xf32>
    %266 = tpu.matmul %265, %30, %cst_89 {dimension_numbers = #tpu.dot_dimension_numbers<[1], [0], [0], [1], [0, 0, 1, 1], [], []>} : vector<4x32xf32>, vector<32x32xf32>, vector<4x32xf32> -> vector<4x32xf32>
    %267 = vector.broadcast %36 : vector<1x32xf32> to vector<4x32xf32>
    %268 = arith.addf %266, %267 : vector<4x32xf32>
    %cst_90 = arith.constant dense<0.000000e+00> : vector<4x32xf32>
    %269 = tpu.matmul %265, %32, %cst_90 {dimension_numbers = #tpu.dot_dimension_numbers<[1], [0], [0], [1], [0, 0, 1, 1], [], []>} : vector<4x32xf32>, vector<32x32xf32>, vector<4x32xf32> -> vector<4x32xf32>
    %270 = vector.broadcast %38 : vector<1x32xf32> to vector<4x32xf32>
    %271 = arith.addf %269, %270 : vector<4x32xf32>
    %cst_91 = arith.constant dense<0.000000e+00> : vector<4x32xf32>
    %272 = tpu.matmul %265, %34, %cst_91 {dimension_numbers = #tpu.dot_dimension_numbers<[1], [0], [0], [1], [0, 0, 1, 1], [], []>} : vector<4x32xf32>, vector<32x32xf32>, vector<4x32xf32> -> vector<4x32xf32>
    %273 = vector.broadcast %40 : vector<1x32xf32> to vector<4x32xf32>
    %274 = arith.addf %272, %273 : vector<4x32xf32>
    %275 = vector.extract_strided_slice %14 {offsets = [28, 0], sizes = [4, 32], strides = [1, 1]} : vector<32x32xf32> to vector<4x32xf32>
    %276 = arith.addf %275, %268 : vector<4x32xf32>
    %277 = arith.negf %276 : vector<4x32xf32>
    %278 = math.exp %277 : vector<4x32xf32>
    %cst_92 = arith.constant 1.000000e+00 : f32
    %279 = vector.broadcast %cst_92 : f32 to vector<4x32xf32>
    %280 = arith.addf %279, %278 : vector<4x32xf32>
    %281 = arith.divf %279, %280 : vector<4x32xf32>
    %282 = vector.extract_strided_slice %21 {offsets = [28, 0], sizes = [4, 32], strides = [1, 1]} : vector<32x32xf32> to vector<4x32xf32>
    %283 = arith.addf %282, %271 : vector<4x32xf32>
    %284 = arith.negf %283 : vector<4x32xf32>
    %285 = math.exp %284 : vector<4x32xf32>
    %cst_93 = arith.constant 1.000000e+00 : f32
    %286 = vector.broadcast %cst_93 : f32 to vector<4x32xf32>
    %287 = arith.addf %286, %285 : vector<4x32xf32>
    %288 = arith.divf %286, %287 : vector<4x32xf32>
    %289 = vector.extract_strided_slice %28 {offsets = [28, 0], sizes = [4, 32], strides = [1, 1]} : vector<32x32xf32> to vector<4x32xf32>
    %290 = arith.mulf %281, %274 : vector<4x32xf32>
    %291 = arith.addf %289, %290 : vector<4x32xf32>
    %292 = math.tanh %291 : vector<4x32xf32>
    %cst_94 = arith.constant 1.000000e+00 : f32
    %293 = vector.broadcast %cst_94 : f32 to vector<4x32xf32>
    %294 = arith.subf %293, %288 : vector<4x32xf32>
    %295 = arith.mulf %294, %292 : vector<4x32xf32>
    %296 = arith.mulf %288, %265 : vector<4x32xf32>
    %297 = arith.addf %295, %296 : vector<4x32xf32>
    %c0_95 = arith.constant 0 : index
    %c0_96 = arith.constant 0 : index
    %c0_97 = arith.constant 0 : index
    %298 = vector.load %arg11[%c0_95, %c0_96, %c0_97] : memref<3x32x32xf32, #tpu.memory_space<vmem>>, vector<1x32x32xf32>
    %299 = vector.shape_cast %298 : vector<1x32x32xf32> to vector<32x32xf32>
    %cst_98 = arith.constant dense<0.000000e+00> : vector<4x32xf32>
    %300 = tpu.matmul %6, %299, %cst_98 {dimension_numbers = #tpu.dot_dimension_numbers<[1], [0], [0], [1], [0, 0, 1, 1], [], []>} : vector<4x32xf32>, vector<32x32xf32>, vector<4x32xf32> -> vector<4x32xf32>
    %c0_99 = arith.constant 0 : index
    %c0_100 = arith.constant 0 : index
    %c0_101 = arith.constant 0 : index
    %301 = vector.load %arg12[%c0_99, %c0_100, %c0_101] : memref<3x32x32xf32, #tpu.memory_space<vmem>>, vector<1x32x32xf32>
    %302 = vector.shape_cast %301 : vector<1x32x32xf32> to vector<32x32xf32>
    %cst_102 = arith.constant dense<0.000000e+00> : vector<4x32xf32>
    %303 = tpu.matmul %297, %302, %cst_102 {dimension_numbers = #tpu.dot_dimension_numbers<[1], [0], [0], [1], [0, 0, 1, 1], [], []>} : vector<4x32xf32>, vector<32x32xf32>, vector<4x32xf32> -> vector<4x32xf32>
    %304 = arith.addf %300, %303 : vector<4x32xf32>
    %c0_103 = arith.constant 0 : index
    %c0_104 = arith.constant 0 : index
    %c0_105 = arith.constant 0 : index
    %305 = vector.load %arg14[%c0_103, %c0_104, %c0_105] : memref<3x1x32xf32, #tpu.memory_space<vmem>>, vector<1x1x32xf32>
    %306 = vector.shape_cast %305 : vector<1x1x32xf32> to vector<1x32xf32>
    %307 = vector.broadcast %306 : vector<1x32xf32> to vector<4x32xf32>
    %308 = arith.addf %304, %307 : vector<4x32xf32>
    %c1_106 = arith.constant 1 : index
    %c0_107 = arith.constant 0 : index
    %c0_108 = arith.constant 0 : index
    %309 = vector.load %arg11[%c1_106, %c0_107, %c0_108] : memref<3x32x32xf32, #tpu.memory_space<vmem>>, vector<1x32x32xf32>
    %310 = vector.shape_cast %309 : vector<1x32x32xf32> to vector<32x32xf32>
    %cst_109 = arith.constant dense<0.000000e+00> : vector<4x32xf32>
    %311 = tpu.matmul %6, %310, %cst_109 {dimension_numbers = #tpu.dot_dimension_numbers<[1], [0], [0], [1], [0, 0, 1, 1], [], []>} : vector<4x32xf32>, vector<32x32xf32>, vector<4x32xf32> -> vector<4x32xf32>
    %c1_110 = arith.constant 1 : index
    %c0_111 = arith.constant 0 : index
    %c0_112 = arith.constant 0 : index
    %312 = vector.load %arg12[%c1_110, %c0_111, %c0_112] : memref<3x32x32xf32, #tpu.memory_space<vmem>>, vector<1x32x32xf32>
    %313 = vector.shape_cast %312 : vector<1x32x32xf32> to vector<32x32xf32>
    %cst_113 = arith.constant dense<0.000000e+00> : vector<4x32xf32>
    %314 = tpu.matmul %297, %313, %cst_113 {dimension_numbers = #tpu.dot_dimension_numbers<[1], [0], [0], [1], [0, 0, 1, 1], [], []>} : vector<4x32xf32>, vector<32x32xf32>, vector<4x32xf32> -> vector<4x32xf32>
    %315 = arith.addf %311, %314 : vector<4x32xf32>
    %c1_114 = arith.constant 1 : index
    %c0_115 = arith.constant 0 : index
    %c0_116 = arith.constant 0 : index
    %316 = vector.load %arg14[%c1_114, %c0_115, %c0_116] : memref<3x1x32xf32, #tpu.memory_space<vmem>>, vector<1x1x32xf32>
    %317 = vector.shape_cast %316 : vector<1x1x32xf32> to vector<1x32xf32>
    %318 = vector.broadcast %317 : vector<1x32xf32> to vector<4x32xf32>
    %319 = arith.addf %315, %318 : vector<4x32xf32>
    %c2_117 = arith.constant 2 : index
    %c0_118 = arith.constant 0 : index
    %c0_119 = arith.constant 0 : index
    %320 = vector.load %arg11[%c2_117, %c0_118, %c0_119] : memref<3x32x32xf32, #tpu.memory_space<vmem>>, vector<1x32x32xf32>
    %321 = vector.shape_cast %320 : vector<1x32x32xf32> to vector<32x32xf32>
    %cst_120 = arith.constant dense<0.000000e+00> : vector<4x32xf32>
    %322 = tpu.matmul %6, %321, %cst_120 {dimension_numbers = #tpu.dot_dimension_numbers<[1], [0], [0], [1], [0, 0, 1, 1], [], []>} : vector<4x32xf32>, vector<32x32xf32>, vector<4x32xf32> -> vector<4x32xf32>
    %c2_121 = arith.constant 2 : index
    %c0_122 = arith.constant 0 : index
    %c0_123 = arith.constant 0 : index
    %323 = vector.load %arg12[%c2_121, %c0_122, %c0_123] : memref<3x32x32xf32, #tpu.memory_space<vmem>>, vector<1x32x32xf32>
    %324 = vector.shape_cast %323 : vector<1x32x32xf32> to vector<32x32xf32>
    %cst_124 = arith.constant dense<0.000000e+00> : vector<4x32xf32>
    %325 = tpu.matmul %297, %324, %cst_124 {dimension_numbers = #tpu.dot_dimension_numbers<[1], [0], [0], [1], [0, 0, 1, 1], [], []>} : vector<4x32xf32>, vector<32x32xf32>, vector<4x32xf32> -> vector<4x32xf32>
    %326 = arith.addf %322, %325 : vector<4x32xf32>
    %c2_125 = arith.constant 2 : index
    %c0_126 = arith.constant 0 : index
    %c0_127 = arith.constant 0 : index
    %327 = vector.load %arg14[%c2_125, %c0_126, %c0_127] : memref<3x1x32xf32, #tpu.memory_space<vmem>>, vector<1x1x32xf32>
    %328 = vector.shape_cast %327 : vector<1x1x32xf32> to vector<1x32xf32>
    %329 = vector.broadcast %328 : vector<1x32xf32> to vector<4x32xf32>
    %330 = arith.addf %326, %329 : vector<4x32xf32>
    %c0_128 = arith.constant 0 : index
    %c0_129 = arith.constant 0 : index
    %c0_130 = arith.constant 0 : index
    %331 = vector.load %arg13[%c0_128, %c0_129, %c0_130] : memref<3x32x32xf32, #tpu.memory_space<vmem>>, vector<1x32x32xf32>
    %332 = vector.shape_cast %331 : vector<1x32x32xf32> to vector<32x32xf32>
    %c1_131 = arith.constant 1 : index
    %c0_132 = arith.constant 0 : index
    %c0_133 = arith.constant 0 : index
    %333 = vector.load %arg13[%c1_131, %c0_132, %c0_133] : memref<3x32x32xf32, #tpu.memory_space<vmem>>, vector<1x32x32xf32>
    %334 = vector.shape_cast %333 : vector<1x32x32xf32> to vector<32x32xf32>
    %c2_134 = arith.constant 2 : index
    %c0_135 = arith.constant 0 : index
    %c0_136 = arith.constant 0 : index
    %335 = vector.load %arg13[%c2_134, %c0_135, %c0_136] : memref<3x32x32xf32, #tpu.memory_space<vmem>>, vector<1x32x32xf32>
    %336 = vector.shape_cast %335 : vector<1x32x32xf32> to vector<32x32xf32>
    %c0_137 = arith.constant 0 : index
    %c0_138 = arith.constant 0 : index
    %c0_139 = arith.constant 0 : index
    %337 = vector.load %arg15[%c0_137, %c0_138, %c0_139] : memref<3x1x32xf32, #tpu.memory_space<vmem>>, vector<1x1x32xf32>
    %338 = vector.shape_cast %337 : vector<1x1x32xf32> to vector<1x32xf32>
    %c1_140 = arith.constant 1 : index
    %c0_141 = arith.constant 0 : index
    %c0_142 = arith.constant 0 : index
    %339 = vector.load %arg15[%c1_140, %c0_141, %c0_142] : memref<3x1x32xf32, #tpu.memory_space<vmem>>, vector<1x1x32xf32>
    %340 = vector.shape_cast %339 : vector<1x1x32xf32> to vector<1x32xf32>
    %c2_143 = arith.constant 2 : index
    %c0_144 = arith.constant 0 : index
    %c0_145 = arith.constant 0 : index
    %341 = vector.load %arg15[%c2_143, %c0_144, %c0_145] : memref<3x1x32xf32, #tpu.memory_space<vmem>>, vector<1x1x32xf32>
    %342 = vector.shape_cast %341 : vector<1x1x32xf32> to vector<1x32xf32>
    %cst_146 = arith.constant 0.000000e+00 : f32
    %343 = vector.broadcast %cst_146 : f32 to vector<1x32xf32>
    %cst_147 = arith.constant dense<0.000000e+00> : vector<1x32xf32>
    %344 = tpu.matmul %343, %332, %cst_147 {dimension_numbers = #tpu.dot_dimension_numbers<[1], [0], [0], [1], [0, 0, 1, 1], [], []>} : vector<1x32xf32>, vector<32x32xf32>, vector<1x32xf32> -> vector<1x32xf32>
    %345 = arith.addf %344, %338 : vector<1x32xf32>
    %cst_148 = arith.constant dense<0.000000e+00> : vector<1x32xf32>
    %346 = tpu.matmul %343, %334, %cst_148 {dimension_numbers = #tpu.dot_dimension_numbers<[1], [0], [0], [1], [0, 0, 1, 1], [], []>} : vector<1x32xf32>, vector<32x32xf32>, vector<1x32xf32> -> vector<1x32xf32>
    %347 = arith.addf %346, %340 : vector<1x32xf32>
    %cst_149 = arith.constant dense<0.000000e+00> : vector<1x32xf32>
    %348 = tpu.matmul %343, %336, %cst_149 {dimension_numbers = #tpu.dot_dimension_numbers<[1], [0], [0], [1], [0, 0, 1, 1], [], []>} : vector<1x32xf32>, vector<32x32xf32>, vector<1x32xf32> -> vector<1x32xf32>
    %349 = arith.addf %348, %342 : vector<1x32xf32>
    %350 = vector.extract_strided_slice %308 {offsets = [0, 0], sizes = [1, 32], strides = [1, 1]} : vector<4x32xf32> to vector<1x32xf32>
    %351 = arith.addf %350, %345 : vector<1x32xf32>
    %352 = arith.negf %351 : vector<1x32xf32>
    %353 = math.exp %352 : vector<1x32xf32>
    %cst_150 = arith.constant 1.000000e+00 : f32
    %354 = vector.broadcast %cst_150 : f32 to vector<1x32xf32>
    %355 = arith.addf %354, %353 : vector<1x32xf32>
    %356 = arith.divf %354, %355 : vector<1x32xf32>
    %357 = vector.extract_strided_slice %319 {offsets = [0, 0], sizes = [1, 32], strides = [1, 1]} : vector<4x32xf32> to vector<1x32xf32>
    %358 = arith.addf %357, %347 : vector<1x32xf32>
    %359 = arith.negf %358 : vector<1x32xf32>
    %360 = math.exp %359 : vector<1x32xf32>
    %cst_151 = arith.constant 1.000000e+00 : f32
    %361 = vector.broadcast %cst_151 : f32 to vector<1x32xf32>
    %362 = arith.addf %361, %360 : vector<1x32xf32>
    %363 = arith.divf %361, %362 : vector<1x32xf32>
    %364 = vector.extract_strided_slice %330 {offsets = [0, 0], sizes = [1, 32], strides = [1, 1]} : vector<4x32xf32> to vector<1x32xf32>
    %365 = arith.mulf %356, %349 : vector<1x32xf32>
    %366 = arith.addf %364, %365 : vector<1x32xf32>
    %367 = math.tanh %366 : vector<1x32xf32>
    %cst_152 = arith.constant 1.000000e+00 : f32
    %368 = vector.broadcast %cst_152 : f32 to vector<1x32xf32>
    %369 = arith.subf %368, %363 : vector<1x32xf32>
    %370 = arith.mulf %369, %367 : vector<1x32xf32>
    %371 = arith.mulf %363, %343 : vector<1x32xf32>
    %372 = arith.addf %370, %371 : vector<1x32xf32>
    %cst_153 = arith.constant dense<0.000000e+00> : vector<1x32xf32>
    %373 = tpu.matmul %372, %332, %cst_153 {dimension_numbers = #tpu.dot_dimension_numbers<[1], [0], [0], [1], [0, 0, 1, 1], [], []>} : vector<1x32xf32>, vector<32x32xf32>, vector<1x32xf32> -> vector<1x32xf32>
    %374 = arith.addf %373, %338 : vector<1x32xf32>
    %cst_154 = arith.constant dense<0.000000e+00> : vector<1x32xf32>
    %375 = tpu.matmul %372, %334, %cst_154 {dimension_numbers = #tpu.dot_dimension_numbers<[1], [0], [0], [1], [0, 0, 1, 1], [], []>} : vector<1x32xf32>, vector<32x32xf32>, vector<1x32xf32> -> vector<1x32xf32>
    %376 = arith.addf %375, %340 : vector<1x32xf32>
    %cst_155 = arith.constant dense<0.000000e+00> : vector<1x32xf32>
    %377 = tpu.matmul %372, %336, %cst_155 {dimension_numbers = #tpu.dot_dimension_numbers<[1], [0], [0], [1], [0, 0, 1, 1], [], []>} : vector<1x32xf32>, vector<32x32xf32>, vector<1x32xf32> -> vector<1x32xf32>
    %378 = arith.addf %377, %342 : vector<1x32xf32>
    %379 = vector.extract_strided_slice %308 {offsets = [1, 0], sizes = [1, 32], strides = [1, 1]} : vector<4x32xf32> to vector<1x32xf32>
    %380 = arith.addf %379, %374 : vector<1x32xf32>
    %381 = arith.negf %380 : vector<1x32xf32>
    %382 = math.exp %381 : vector<1x32xf32>
    %cst_156 = arith.constant 1.000000e+00 : f32
    %383 = vector.broadcast %cst_156 : f32 to vector<1x32xf32>
    %384 = arith.addf %383, %382 : vector<1x32xf32>
    %385 = arith.divf %383, %384 : vector<1x32xf32>
    %386 = vector.extract_strided_slice %319 {offsets = [1, 0], sizes = [1, 32], strides = [1, 1]} : vector<4x32xf32> to vector<1x32xf32>
    %387 = arith.addf %386, %376 : vector<1x32xf32>
    %388 = arith.negf %387 : vector<1x32xf32>
    %389 = math.exp %388 : vector<1x32xf32>
    %cst_157 = arith.constant 1.000000e+00 : f32
    %390 = vector.broadcast %cst_157 : f32 to vector<1x32xf32>
    %391 = arith.addf %390, %389 : vector<1x32xf32>
    %392 = arith.divf %390, %391 : vector<1x32xf32>
    %393 = vector.extract_strided_slice %330 {offsets = [1, 0], sizes = [1, 32], strides = [1, 1]} : vector<4x32xf32> to vector<1x32xf32>
    %394 = arith.mulf %385, %378 : vector<1x32xf32>
    %395 = arith.addf %393, %394 : vector<1x32xf32>
    %396 = math.tanh %395 : vector<1x32xf32>
    %cst_158 = arith.constant 1.000000e+00 : f32
    %397 = vector.broadcast %cst_158 : f32 to vector<1x32xf32>
    %398 = arith.subf %397, %392 : vector<1x32xf32>
    %399 = arith.mulf %398, %396 : vector<1x32xf32>
    %400 = arith.mulf %392, %372 : vector<1x32xf32>
    %401 = arith.addf %399, %400 : vector<1x32xf32>
    %cst_159 = arith.constant dense<0.000000e+00> : vector<1x32xf32>
    %402 = tpu.matmul %401, %332, %cst_159 {dimension_numbers = #tpu.dot_dimension_numbers<[1], [0], [0], [1], [0, 0, 1, 1], [], []>} : vector<1x32xf32>, vector<32x32xf32>, vector<1x32xf32> -> vector<1x32xf32>
    %403 = arith.addf %402, %338 : vector<1x32xf32>
    %cst_160 = arith.constant dense<0.000000e+00> : vector<1x32xf32>
    %404 = tpu.matmul %401, %334, %cst_160 {dimension_numbers = #tpu.dot_dimension_numbers<[1], [0], [0], [1], [0, 0, 1, 1], [], []>} : vector<1x32xf32>, vector<32x32xf32>, vector<1x32xf32> -> vector<1x32xf32>
    %405 = arith.addf %404, %340 : vector<1x32xf32>
    %cst_161 = arith.constant dense<0.000000e+00> : vector<1x32xf32>
    %406 = tpu.matmul %401, %336, %cst_161 {dimension_numbers = #tpu.dot_dimension_numbers<[1], [0], [0], [1], [0, 0, 1, 1], [], []>} : vector<1x32xf32>, vector<32x32xf32>, vector<1x32xf32> -> vector<1x32xf32>
    %407 = arith.addf %406, %342 : vector<1x32xf32>
    %408 = vector.extract_strided_slice %308 {offsets = [2, 0], sizes = [1, 32], strides = [1, 1]} : vector<4x32xf32> to vector<1x32xf32>
    %409 = arith.addf %408, %403 : vector<1x32xf32>
    %410 = arith.negf %409 : vector<1x32xf32>
    %411 = math.exp %410 : vector<1x32xf32>
    %cst_162 = arith.constant 1.000000e+00 : f32
    %412 = vector.broadcast %cst_162 : f32 to vector<1x32xf32>
    %413 = arith.addf %412, %411 : vector<1x32xf32>
    %414 = arith.divf %412, %413 : vector<1x32xf32>
    %415 = vector.extract_strided_slice %319 {offsets = [2, 0], sizes = [1, 32], strides = [1, 1]} : vector<4x32xf32> to vector<1x32xf32>
    %416 = arith.addf %415, %405 : vector<1x32xf32>
    %417 = arith.negf %416 : vector<1x32xf32>
    %418 = math.exp %417 : vector<1x32xf32>
    %cst_163 = arith.constant 1.000000e+00 : f32
    %419 = vector.broadcast %cst_163 : f32 to vector<1x32xf32>
    %420 = arith.addf %419, %418 : vector<1x32xf32>
    %421 = arith.divf %419, %420 : vector<1x32xf32>
    %422 = vector.extract_strided_slice %330 {offsets = [2, 0], sizes = [1, 32], strides = [1, 1]} : vector<4x32xf32> to vector<1x32xf32>
    %423 = arith.mulf %414, %407 : vector<1x32xf32>
    %424 = arith.addf %422, %423 : vector<1x32xf32>
    %425 = math.tanh %424 : vector<1x32xf32>
    %cst_164 = arith.constant 1.000000e+00 : f32
    %426 = vector.broadcast %cst_164 : f32 to vector<1x32xf32>
    %427 = arith.subf %426, %421 : vector<1x32xf32>
    %428 = arith.mulf %427, %425 : vector<1x32xf32>
    %429 = arith.mulf %421, %401 : vector<1x32xf32>
    %430 = arith.addf %428, %429 : vector<1x32xf32>
    %cst_165 = arith.constant dense<0.000000e+00> : vector<1x32xf32>
    %431 = tpu.matmul %430, %332, %cst_165 {dimension_numbers = #tpu.dot_dimension_numbers<[1], [0], [0], [1], [0, 0, 1, 1], [], []>} : vector<1x32xf32>, vector<32x32xf32>, vector<1x32xf32> -> vector<1x32xf32>
    %432 = arith.addf %431, %338 : vector<1x32xf32>
    %cst_166 = arith.constant dense<0.000000e+00> : vector<1x32xf32>
    %433 = tpu.matmul %430, %334, %cst_166 {dimension_numbers = #tpu.dot_dimension_numbers<[1], [0], [0], [1], [0, 0, 1, 1], [], []>} : vector<1x32xf32>, vector<32x32xf32>, vector<1x32xf32> -> vector<1x32xf32>
    %434 = arith.addf %433, %340 : vector<1x32xf32>
    %cst_167 = arith.constant dense<0.000000e+00> : vector<1x32xf32>
    %435 = tpu.matmul %430, %336, %cst_167 {dimension_numbers = #tpu.dot_dimension_numbers<[1], [0], [0], [1], [0, 0, 1, 1], [], []>} : vector<1x32xf32>, vector<32x32xf32>, vector<1x32xf32> -> vector<1x32xf32>
    %436 = arith.addf %435, %342 : vector<1x32xf32>
    %437 = vector.extract_strided_slice %308 {offsets = [3, 0], sizes = [1, 32], strides = [1, 1]} : vector<4x32xf32> to vector<1x32xf32>
    %438 = arith.addf %437, %432 : vector<1x32xf32>
    %439 = arith.negf %438 : vector<1x32xf32>
    %440 = math.exp %439 : vector<1x32xf32>
    %cst_168 = arith.constant 1.000000e+00 : f32
    %441 = vector.broadcast %cst_168 : f32 to vector<1x32xf32>
    %442 = arith.addf %441, %440 : vector<1x32xf32>
    %443 = arith.divf %441, %442 : vector<1x32xf32>
    %444 = vector.extract_strided_slice %319 {offsets = [3, 0], sizes = [1, 32], strides = [1, 1]} : vector<4x32xf32> to vector<1x32xf32>
    %445 = arith.addf %444, %434 : vector<1x32xf32>
    %446 = arith.negf %445 : vector<1x32xf32>
    %447 = math.exp %446 : vector<1x32xf32>
    %cst_169 = arith.constant 1.000000e+00 : f32
    %448 = vector.broadcast %cst_169 : f32 to vector<1x32xf32>
    %449 = arith.addf %448, %447 : vector<1x32xf32>
    %450 = arith.divf %448, %449 : vector<1x32xf32>
    %451 = vector.extract_strided_slice %330 {offsets = [3, 0], sizes = [1, 32], strides = [1, 1]} : vector<4x32xf32> to vector<1x32xf32>
    %452 = arith.mulf %443, %436 : vector<1x32xf32>
    %453 = arith.addf %451, %452 : vector<1x32xf32>
    %454 = math.tanh %453 : vector<1x32xf32>
    %cst_170 = arith.constant 1.000000e+00 : f32
    %455 = vector.broadcast %cst_170 : f32 to vector<1x32xf32>
    %456 = arith.subf %455, %450 : vector<1x32xf32>
    %457 = arith.mulf %456, %454 : vector<1x32xf32>
    %458 = arith.mulf %450, %430 : vector<1x32xf32>
    %459 = arith.addf %457, %458 : vector<1x32xf32>
    %c0_171 = arith.constant 0 : index
    %c0_172 = arith.constant 0 : index
    %460 = vector.load %arg2[%c0_171, %c0_172] : memref<7x16xf32, #tpu.memory_space<vmem>>, vector<7x16xf32>
    %c0_173 = arith.constant 0 : index
    %c0_174 = arith.constant 0 : index
    %461 = vector.load %arg5[%c0_173, %c0_174] : memref<16x32xf32, #tpu.memory_space<vmem>>, vector<16x32xf32>
    %cst_175 = arith.constant dense<0.000000e+00> : vector<7x32xf32>
    %462 = tpu.matmul %460, %461, %cst_175 {dimension_numbers = #tpu.dot_dimension_numbers<[1], [0], [0], [1], [0, 0, 1, 1], [], []>} : vector<7x16xf32>, vector<16x32xf32>, vector<7x32xf32> -> vector<7x32xf32>
    %cst_176 = arith.constant 0.000000e+00 : f32
    %463 = vector.broadcast %cst_176 : f32 to vector<7x32xf32>
    %464 = arith.maximumf %462, %463 : vector<7x32xf32>
    %c0_177 = arith.constant 0 : index
    %c0_178 = arith.constant 0 : index
    %465 = vector.load %arg6[%c0_177, %c0_178] : memref<32x32xf32, #tpu.memory_space<vmem>>, vector<32x32xf32>
    %cst_179 = arith.constant dense<0.000000e+00> : vector<7x32xf32>
    %466 = tpu.matmul %464, %465, %cst_179 {dimension_numbers = #tpu.dot_dimension_numbers<[1], [0], [0], [1], [0, 0, 1, 1], [], []>} : vector<7x32xf32>, vector<32x32xf32>, vector<7x32xf32> -> vector<7x32xf32>
    %467 = vector.extract_strided_slice %466 {offsets = [0, 0], sizes = [1, 32], strides = [1, 1]} : vector<7x32xf32> to vector<1x32xf32>
    %468 = vector.extract_strided_slice %466 {offsets = [1, 0], sizes = [3, 32], strides = [1, 1]} : vector<7x32xf32> to vector<3x32xf32>
    %469 = vector.extract_strided_slice %466 {offsets = [4, 0], sizes = [3, 32], strides = [1, 1]} : vector<7x32xf32> to vector<3x32xf32>
    %c0_180 = arith.constant 0 : index
    %c0_181 = arith.constant 0 : index
    %470 = vector.load %arg16[%c0_180, %c0_181] : memref<32x1xf32, #tpu.memory_space<vmem>>, vector<32x1xf32>
    %c0_182 = arith.constant 0 : index
    %c0_183 = arith.constant 0 : index
    %471 = vector.load %arg17[%c0_182, %c0_183] : memref<32x1xf32, #tpu.memory_space<vmem>>, vector<32x1xf32>
    %cst_184 = arith.constant dense<0.000000e+00> : vector<3x1xf32>
    %472 = tpu.matmul %468, %470, %cst_184 {dimension_numbers = #tpu.dot_dimension_numbers<[1], [0], [0], [1], [0, 0, 1, 1], [], []>} : vector<3x32xf32>, vector<32x1xf32>, vector<3x1xf32> -> vector<3x1xf32>
    %cst_185 = arith.constant dense<0.000000e+00> : vector<1x1xf32>
    %473 = tpu.matmul %467, %471, %cst_185 {dimension_numbers = #tpu.dot_dimension_numbers<[1], [0], [0], [1], [0, 0, 1, 1], [], []>} : vector<1x32xf32>, vector<32x1xf32>, vector<1x1xf32> -> vector<1x1xf32>
    %474 = vector.broadcast %473 : vector<1x1xf32> to vector<3x1xf32>
    %475 = arith.addf %472, %474 : vector<3x1xf32>
    %cst_186 = arith.constant dense<0xFF800000> : vector<1xf32>
    %476 = vector.multi_reduction <maximumf>, %475, %cst_186 [0] : vector<3x1xf32> to vector<1xf32>
    %477 = vector.shape_cast %476 : vector<1xf32> to vector<1x1xf32>
    %478 = vector.broadcast %477 : vector<1x1xf32> to vector<3x1xf32>
    %479 = arith.subf %475, %478 : vector<3x1xf32>
    %480 = math.exp %479 : vector<3x1xf32>
    %cst_187 = arith.constant dense<0.000000e+00> : vector<1xf32>
    %481 = vector.multi_reduction <add>, %480, %cst_187 [0] : vector<3x1xf32> to vector<1xf32>
    %482 = vector.shape_cast %481 : vector<1xf32> to vector<1x1xf32>
    %483 = vector.broadcast %482 : vector<1x1xf32> to vector<3x1xf32>
    %484 = arith.divf %480, %483 : vector<3x1xf32>
    %485 = vector.broadcast %484 : vector<3x1xf32> to vector<3x32xf32>
    %486 = arith.mulf %485, %468 : vector<3x32xf32>
    %cst_188 = arith.constant dense<0.000000e+00> : vector<32xf32>
    %487 = vector.multi_reduction <add>, %486, %cst_188 [0] : vector<3x32xf32> to vector<32xf32>
    %488 = vector.shape_cast %487 : vector<32xf32> to vector<1x32xf32>
    %cst_189 = arith.constant 3.000000e+00 : f32
    %489 = vector.broadcast %cst_189 : f32 to vector<1x32xf32>
    %490 = arith.divf %488, %489 : vector<1x32xf32>
    %c0_190 = arith.constant 0 : index
    %c0_191 = arith.constant 0 : index
    %491 = vector.load %arg18[%c0_190, %c0_191] : memref<32x1xf32, #tpu.memory_space<vmem>>, vector<32x1xf32>
    %c0_192 = arith.constant 0 : index
    %c0_193 = arith.constant 0 : index
    %492 = vector.load %arg19[%c0_192, %c0_193] : memref<32x1xf32, #tpu.memory_space<vmem>>, vector<32x1xf32>
    %cst_194 = arith.constant dense<0.000000e+00> : vector<3x1xf32>
    %493 = tpu.matmul %469, %491, %cst_194 {dimension_numbers = #tpu.dot_dimension_numbers<[1], [0], [0], [1], [0, 0, 1, 1], [], []>} : vector<3x32xf32>, vector<32x1xf32>, vector<3x1xf32> -> vector<3x1xf32>
    %cst_195 = arith.constant dense<0.000000e+00> : vector<1x1xf32>
    %494 = tpu.matmul %467, %492, %cst_195 {dimension_numbers = #tpu.dot_dimension_numbers<[1], [0], [0], [1], [0, 0, 1, 1], [], []>} : vector<1x32xf32>, vector<32x1xf32>, vector<1x1xf32> -> vector<1x1xf32>
    %495 = vector.broadcast %494 : vector<1x1xf32> to vector<3x1xf32>
    %496 = arith.addf %493, %495 : vector<3x1xf32>
    %cst_196 = arith.constant dense<0xFF800000> : vector<1xf32>
    %497 = vector.multi_reduction <maximumf>, %496, %cst_196 [0] : vector<3x1xf32> to vector<1xf32>
    %498 = vector.shape_cast %497 : vector<1xf32> to vector<1x1xf32>
    %499 = vector.broadcast %498 : vector<1x1xf32> to vector<3x1xf32>
    %500 = arith.subf %496, %499 : vector<3x1xf32>
    %501 = math.exp %500 : vector<3x1xf32>
    %cst_197 = arith.constant dense<0.000000e+00> : vector<1xf32>
    %502 = vector.multi_reduction <add>, %501, %cst_197 [0] : vector<3x1xf32> to vector<1xf32>
    %503 = vector.shape_cast %502 : vector<1xf32> to vector<1x1xf32>
    %504 = vector.broadcast %503 : vector<1x1xf32> to vector<3x1xf32>
    %505 = arith.divf %501, %504 : vector<3x1xf32>
    %506 = vector.broadcast %505 : vector<3x1xf32> to vector<3x32xf32>
    %507 = arith.mulf %506, %469 : vector<3x32xf32>
    %cst_198 = arith.constant dense<0.000000e+00> : vector<32xf32>
    %508 = vector.multi_reduction <add>, %507, %cst_198 [0] : vector<3x32xf32> to vector<32xf32>
    %509 = vector.shape_cast %508 : vector<32xf32> to vector<1x32xf32>
    %cst_199 = arith.constant 3.000000e+00 : f32
    %510 = vector.broadcast %cst_199 : f32 to vector<1x32xf32>
    %511 = arith.divf %509, %510 : vector<1x32xf32>
    %c0_200 = arith.constant 0 : index
    %c0_201 = arith.constant 0 : index
    %c0_202 = arith.constant 0 : index
    %512 = vector.load %arg20[%c0_200, %c0_201, %c0_202] : memref<4x32x64xf32, #tpu.memory_space<vmem>>, vector<1x32x64xf32>
    %513 = vector.shape_cast %512 : vector<1x32x64xf32> to vector<32x64xf32>
    %cst_203 = arith.constant dense<0.000000e+00> : vector<1x64xf32>
    %514 = tpu.matmul %459, %513, %cst_203 {dimension_numbers = #tpu.dot_dimension_numbers<[1], [0], [0], [1], [0, 0, 1, 1], [], []>} : vector<1x32xf32>, vector<32x64xf32>, vector<1x64xf32> -> vector<1x64xf32>
    %c1_204 = arith.constant 1 : index
    %c0_205 = arith.constant 0 : index
    %c0_206 = arith.constant 0 : index
    %515 = vector.load %arg20[%c1_204, %c0_205, %c0_206] : memref<4x32x64xf32, #tpu.memory_space<vmem>>, vector<1x32x64xf32>
    %516 = vector.shape_cast %515 : vector<1x32x64xf32> to vector<32x64xf32>
    %cst_207 = arith.constant dense<0.000000e+00> : vector<1x64xf32>
    %517 = tpu.matmul %467, %516, %cst_207 {dimension_numbers = #tpu.dot_dimension_numbers<[1], [0], [0], [1], [0, 0, 1, 1], [], []>} : vector<1x32xf32>, vector<32x64xf32>, vector<1x64xf32> -> vector<1x64xf32>
    %518 = arith.addf %514, %517 : vector<1x64xf32>
    %c2_208 = arith.constant 2 : index
    %c0_209 = arith.constant 0 : index
    %c0_210 = arith.constant 0 : index
    %519 = vector.load %arg20[%c2_208, %c0_209, %c0_210] : memref<4x32x64xf32, #tpu.memory_space<vmem>>, vector<1x32x64xf32>
    %520 = vector.shape_cast %519 : vector<1x32x64xf32> to vector<32x64xf32>
    %cst_211 = arith.constant dense<0.000000e+00> : vector<1x64xf32>
    %521 = tpu.matmul %490, %520, %cst_211 {dimension_numbers = #tpu.dot_dimension_numbers<[1], [0], [0], [1], [0, 0, 1, 1], [], []>} : vector<1x32xf32>, vector<32x64xf32>, vector<1x64xf32> -> vector<1x64xf32>
    %522 = arith.addf %518, %521 : vector<1x64xf32>
    %c3 = arith.constant 3 : index
    %c0_212 = arith.constant 0 : index
    %c0_213 = arith.constant 0 : index
    %523 = vector.load %arg20[%c3, %c0_212, %c0_213] : memref<4x32x64xf32, #tpu.memory_space<vmem>>, vector<1x32x64xf32>
    %524 = vector.shape_cast %523 : vector<1x32x64xf32> to vector<32x64xf32>
    %cst_214 = arith.constant dense<0.000000e+00> : vector<1x64xf32>
    %525 = tpu.matmul %511, %524, %cst_214 {dimension_numbers = #tpu.dot_dimension_numbers<[1], [0], [0], [1], [0, 0, 1, 1], [], []>} : vector<1x32xf32>, vector<32x64xf32>, vector<1x64xf32> -> vector<1x64xf32>
    %526 = arith.addf %522, %525 : vector<1x64xf32>
    %cst_215 = arith.constant 0.000000e+00 : f32
    %527 = vector.broadcast %cst_215 : f32 to vector<1x64xf32>
    %528 = arith.maximumf %526, %527 : vector<1x64xf32>
    %c0_216 = arith.constant 0 : index
    %c0_217 = arith.constant 0 : index
    %529 = vector.load %arg21[%c0_216, %c0_217] : memref<64x4xf32, #tpu.memory_space<vmem>>, vector<64x4xf32>
    %cst_218 = arith.constant dense<0.000000e+00> : vector<1x4xf32>
    %530 = tpu.matmul %528, %529, %cst_218 {dimension_numbers = #tpu.dot_dimension_numbers<[1], [0], [0], [1], [0, 0, 1, 1], [], []>} : vector<1x64xf32>, vector<64x4xf32>, vector<1x4xf32> -> vector<1x4xf32>
    %c0_219 = arith.constant 0 : index
    %c0_220 = arith.constant 0 : index
    %531 = vector.load %arg22[%c0_219, %c0_220] : memref<1x4xf32, #tpu.memory_space<vmem>>, vector<1x4xf32>
    tpu.vector_store %arg22[%c0_219, %c0_220], %530 {strides = array<i32>} : memref<1x4xf32, #tpu.memory_space<vmem>>, vector<1x4xf32>,
    return
  }
}

</mosaic_0001>

<bundles_post_ra>
// kernel: tpu_custom_call.1
= control target key start
LH: loop header
LB: loop body
LE: loop exit
PB: predicated region body
PF: predicated region fallthrough
CT: control target
= control target key end

     0   :  { %s7802_s0 = inlined_call_operand.vmem [shape: f32[32,8], index: 0, kind: input, shape index: {}]   ;;  %s7803_s1 = inlined_call_operand.hbm [shape: f32[4,16], index: 1, kind: input, shape index: {}]   ;;  %s7804_s2 = inlined_call_operand.hbm [shape: f32[7,16], index: 2, kind: input, shape index: {}]   ;;  %s7805_s3 = inlined_call_operand.hbm [shape: f32[16,32], index: 3, kind: input, shape index: {}]   ;;  %s7806_s4 = inlined_call_operand.hbm [shape: f32[32,32], index: 4, kind: input, shape index: {}]   ;;  %s7807_s5 = inlined_call_operand.hbm [shape: f32[16,32], index: 5, kind: input, shape index: {}]   ;;  %s7808_s6 = inlined_call_operand.vmem [shape: f32[32,32], index: 6, kind: input, shape index: {}]   ;;  %s7809_s7 = inlined_call_operand.hbm [shape: f32[3,8,32], index: 7, kind: input, shape index: {}]   ;;  %s7810_s8 = inlined_call_operand.vmem [shape: f32[3,32,32], index: 8, kind: input, shape index: {}]   ;;  %s7811_s9 = inlined_call_operand.vmem [shape: f32[3,1,32], index: 9, kind: input, shape index: {}]   ;;  %s7812_s10 = inlined_call_operand.vmem [shape: f32[3,1,32], index: 10, kind: input, shape index: {}]   ;;  %s7813_s11 = inlined_call_operand.hbm [shape: f32[3,32,32], index: 11, kind: input, shape index: {}]   ;;  %s7814_s12 = inlined_call_operand.hbm [shape: f32[3,32,32], index: 12, kind: input, shape index: {}]   ;;  %s7815_s13 = inlined_call_operand.hbm [shape: f32[3,32,32], index: 13, kind: input, shape index: {}]   ;;  %s7816_s14 = inlined_call_operand.vmem [shape: f32[3,1,32], index: 14, kind: input, shape index: {}]   ;;  %s7817_s15 = inlined_call_operand.vmem [shape: f32[3,1,32], index: 15, kind: input, shape index: {}]   ;;  %s7818_s16 = inlined_call_operand.vmem [shape: f32[32,1], index: 16, kind: input, shape index: {}]   ;;  %s7819_s17 = inlined_call_operand.vmem [shape: f32[32,1], index: 17, kind: input, shape index: {}]   ;;  %s7820_s18 = inlined_call_operand.vmem [shape: f32[32,1], index: 18, kind: input, shape index: {}]   ;;  %s7821_s19 = inlined_call_operand.vmem [shape: f32[32,1], index: 19, kind: input, shape index: {}]   ;;  %s7822_s20 = inlined_call_operand.vmem [shape: f32[4,32,64], index: 20, kind: input, shape index: {}]   ;;  %s7823_s21 = inlined_call_operand.vmem [shape: f32[64,4], index: 21, kind: input, shape index: {}]   ;;  %s7824_s22 = inlined_call_operand.hbm [shape: f32[1,4], index: 22, kind: output, shape index: {}]  }
   0x1   :  { %7833 = sst [smem:[#allocation24_spill]] %s7802_s0 }
   0x2   :  { %7834 = sst [smem:[#allocation25_spill]] %s7803_s1 }
   0x3   :  { %7835 = sst [smem:[#allocation26_spill]] %s7804_s2 }
   0x4   :  { %7836 = sst [smem:[#allocation27_spill]] %s7805_s3 }
   0x5   :  { %7837 = sst [smem:[#allocation28_spill]] %s7806_s4 }
   0x6   :  { %7838 = sst [smem:[#allocation29_spill]] %s7807_s5 }
   0x7   :  { %7839 = sst [smem:[#allocation30_spill]] %s7808_s6 }
   0x8   :  { %7840 = sst [smem:[#allocation31_spill]] %s7824_s22 }
   0x9   :  { %27 = vsyncpa [#allocation3], 0 }
   0xa   :  { %28 = vsyncpa [#allocation6], 0 }
   0xb   :  { %29 = vsyncpa [#allocation9], 0 }
   0xc   :  { %30 = vsyncpa [#allocation12], 0 }
   0xd   :  { %31 = vsyncpa [#allocation15], 0 }
   0xe   :  { %32 = vsyncpa [#allocation4], 0  ;;  %s6780_s3 = smov [#allocation5]   ;;  %s7841_s4 = sld [smem:[#allocation26_spill]] }
   0xf   :  { %s51_s28 = sshll.u32 %s6780_s3, 4  ;;  %s52_s28 = int_to_ptr.vmem [resolvable:$true] %s51_s28 }
  0x14   :  { %s6548_s0 = scalar_lea.hbm %s7841_s4, 128 }
  0x15   :  { %p6549_p0 = scmp.ne.s32.totalorder %s7841_s4, %s6548_s0  ;;  %p6552_p1 = scmp.lt.u32.totalorder %s6548_s0, %s7841_s4 }
  0x17   :  { %p6554_p2 = pnand %p6552_p1, %p6549_p0 }
  0x19   :  { %6557 = shalt.err (!%p6554_p2)
}
  0x1a   :  { %s6558_s6 = scalar_lea.vmem %s52_s28, 128  ;;  %p6563_p4 = scmp.lt.s32.totalorder %s52_s28, %s52_s28 }
  0x1b   :  { %p6559_p3 = scmp.ne.s32.totalorder %s52_s28, %s6558_s6  ;;  %p6564_p5 = scmp.lt.s32.totalorder %s6558_s6, %s6558_s6 }
  0x1d   :  { %p6565_p6 = por %p6564_p5, %p6563_p4 }
  0x1f   :  { %p6566_p7 = pnand %p6565_p6, %p6559_p3 }
  0x21   :  { %6569 = shalt.err (!%p6566_p7)
}
  0x22   :  { %54 = dma.hbm_to_vmem [thread:$0]  %s7841_s4, 128, %s52_s28, [#allocation6]  }
  0x23   :  { %s6781_s2 = smov [#allocation8]   ;;  %s6782_s3 = smov [#allocation11]  }
  0x24   :  { %s72_s27 = sshll.u32 %s6781_s2, 4  ;;  %s98_s29 = sshll.u32 %s6782_s3, 4  ;;  %s73_s27 = int_to_ptr.vmem [resolvable:$true] %s72_s27  ;;  %s99_s29 = int_to_ptr.vmem [resolvable:$true] %s98_s29 }
  0x25   :  { %s7842_s23 = sld [smem:[#allocation28_spill]] }
  0x2b   :  { %s6570_s1 = scalar_lea.hbm %s7842_s23, 512 }
  0x2c   :  { %p6571_p8 = scmp.ne.s32.totalorder %s7842_s23, %s6570_s1  ;;  %p6574_p9 = scmp.lt.u32.totalorder %s6570_s1, %s7842_s23 }
  0x2e   :  { %p6576_p10 = pnand %p6574_p9, %p6571_p8 }
  0x30   :  { %6579 = shalt.err (!%p6576_p10)
}
  0x31   :  { %s6580_s28 = scalar_lea.vmem %s73_s27, 512  ;;  %p6585_p12 = scmp.lt.s32.totalorder %s73_s27, %s73_s27 }
  0x32   :  { %p6581_p11 = scmp.ne.s32.totalorder %s73_s27, %s6580_s28  ;;  %p6586_p13 = scmp.lt.s32.totalorder %s6580_s28, %s6580_s28 }
  0x34   :  { %p6587_p0 = por %p6586_p13, %p6585_p12 }
  0x36   :  { %p6588_p1 = pnand %p6587_p0, %p6581_p11 }
  0x38   :  { %6591 = shalt.err (!%p6588_p1)
}
  0x39   :  { %s6783_s4 = smov 128   ;;  %s6784_s25 = smov 8  }
  0x3a   :  { %78 = dma.hbm_to_vmem [thread:$0]  %s7842_s23, 512, %s73_s27, [#allocation9], %s6783_s4, %s6783_s4, %s6784_s25  }
  0x3b   :  { %s6592_s30 = scalar_lea.hbm %s7809_s7, 384 }
  0x3c   :  { %p6593_p2 = scmp.ne.s32.totalorder %s7809_s7, %s6592_s30  ;;  %p6596_p3 = scmp.lt.u32.totalorder %s6592_s30, %s7809_s7 }
  0x3e   :  { %p6598_p4 = pnand %p6596_p3, %p6593_p2 }
  0x40   :  { %6601 = shalt.err (!%p6598_p4)
}
  0x41   :  { %s6602_s6 = scalar_lea.vmem %s99_s29, 384  ;;  %p6607_p6 = scmp.lt.s32.totalorder %s99_s29, %s99_s29 }
  0x42   :  { %p6603_p5 = scmp.ne.s32.totalorder %s99_s29, %s6602_s6  ;;  %p6608_p7 = scmp.lt.s32.totalorder %s6602_s6, %s6602_s6 }
  0x44   :  { %p6609_p8 = por %p6608_p7, %p6607_p6 }
  0x46   :  { %p6610_p9 = pnand %p6609_p8, %p6603_p5 }
  0x48   :  { %6613 = shalt.err (!%p6610_p9)
}
  0x49   :  { %104 = dma.hbm_to_vmem [thread:$0]  %s7809_s7, 384, %s99_s29, [#allocation12], %s6783_s4, %s6783_s4, %s6784_s25  }
  0x4a   :  { %s6785_s28 = smov [#allocation14]   ;;  %s6786_s2 = smov [#allocation2]  }
  0x4b   :  { %s128_s26 = sshll.u32 %s6785_s28, 4  ;;  %s41_s22 = sshll.u32 %s6786_s2, 4  ;;  %s129_s26 = int_to_ptr.vmem [resolvable:$true] %s128_s26  ;;  %s42_s22 = int_to_ptr.vmem [resolvable:$true] %s41_s22 }
  0x4c   :  { %s6614_s0 = scalar_lea.hbm %s7814_s12, 1536 }
  0x4d   :  { %p6615_p10 = scmp.ne.s32.totalorder %s7814_s12, %s6614_s0  ;;  %p6618_p11 = scmp.lt.u32.totalorder %s6614_s0, %s7814_s12 }
  0x4f   :  { %p6620_p12 = pnand %p6618_p11, %p6615_p10 }
  0x51   :  { %6623 = shalt.err (!%p6620_p12)
}
  0x52   :  { %s6624_s7 = scalar_lea.vmem %s129_s26, 1536  ;;  %p6629_p0 = scmp.lt.s32.totalorder %s129_s26, %s129_s26 }
  0x53   :  { %p6625_p13 = scmp.ne.s32.totalorder %s129_s26, %s6624_s7  ;;  %p6630_p1 = scmp.lt.s32.totalorder %s6624_s7, %s6624_s7 }
  0x55   :  { %p6631_p2 = por %p6630_p1, %p6629_p0 }
  0x57   :  { %p6632_p3 = pnand %p6631_p2, %p6625_p13 }
  0x59   :  { %6635 = shalt.err (!%p6632_p3)
}
  0x5a   :  { %134 = dma.hbm_to_vmem [thread:$0]  %s7814_s12, 1536, %s129_s26, [#allocation15], %s6783_s4, %s6783_s4, %s6784_s25  }
  0x5b   :  { %s7843_s2 = sld [smem:[#allocation25_spill]] }
  0x61   :  { %s6636_s3 = scalar_lea.hbm %s7843_s2, 64 }
  0x62   :  { %p6637_p4 = scmp.ne.s32.totalorder %s7843_s2, %s6636_s3  ;;  %p6640_p5 = scmp.lt.u32.totalorder %s6636_s3, %s7843_s2 }
  0x64   :  { %p6642_p6 = pnand %p6640_p5, %p6637_p4 }
  0x66   :  { %6645 = shalt.err (!%p6642_p6)
}
  0x67   :  { %s6646_s24 = scalar_lea.vmem %s42_s22, 64  ;;  %p6651_p8 = scmp.lt.s32.totalorder %s42_s22, %s42_s22 }
  0x68   :  { %p6647_p7 = scmp.ne.s32.totalorder %s42_s22, %s6646_s24  ;;  %p6652_p9 = scmp.lt.s32.totalorder %s6646_s24, %s6646_s24 }
  0x6a   :  { %p6653_p10 = por %p6652_p9, %p6651_p8 }
  0x6c   :  { %p6654_p11 = pnand %p6653_p10, %p6647_p7 }
  0x6e   :  { %6657 = shalt.err (!%p6654_p11)
}
  0x6f   :  { %44 = dma.hbm_to_vmem [thread:$0]  %s7843_s2, 64, %s42_s22, [#allocation3]  }
  0x70   :  { %s6787_s6 = smov [#allocation7]   ;;  %s6788_s29 = smov [#allocation10]  }
  0x71   :  { %s60_s7 = sshll.u32 %s6787_s6, 4  ;;  %s84_s27 = sshll.u32 %s6788_s29, 4  ;;  %s61_s7 = int_to_ptr.vmem [resolvable:$true] %s60_s7  ;;  %s85_s27 = int_to_ptr.vmem [resolvable:$true] %s84_s27 }
  0x72   :  { %s7844_s3 = sld [smem:[#allocation27_spill]] }
  0x78   :  { %s6658_s30 = scalar_lea.hbm %s7844_s3, 256 }
  0x79   :  { %p6659_p12 = scmp.ne.s32.totalorder %s7844_s3, %s6658_s30  ;;  %p6662_p13 = scmp.lt.u32.totalorder %s6658_s30, %s7844_s3 }
  0x7b   :  { %p6664_p0 = pnand %p6662_p13, %p6659_p12 }
  0x7d   :  { %6667 = shalt.err (!%p6664_p0)
}
  0x7e   :  { %s6668_s22 = scalar_lea.vmem %s61_s7, 256  ;;  %p6673_p2 = scmp.lt.s32.totalorder %s61_s7, %s61_s7 }
  0x7f   :  { %p6669_p1 = scmp.ne.s32.totalorder %s61_s7, %s6668_s22  ;;  %p6674_p3 = scmp.lt.s32.totalorder %s6668_s22, %s6668_s22 }
  0x81   :  { %p6675_p4 = por %p6674_p3, %p6673_p2 }
  0x83   :  { %p6676_p5 = pnand %p6675_p4, %p6669_p1 }
  0x85   :  { %6679 = shalt.err (!%p6676_p5)
}
  0x86   :  { %66 = dma.hbm_to_vmem [thread:$0]  %s7844_s3, 256, %s61_s7, [#allocation6], %s6783_s4, %s6783_s4, %s6784_s25  }
  0x87   :  { %s7845_s29 = sld [smem:[#allocation29_spill]] }
  0x8d   :  { %s6680_s23 = scalar_lea.hbm %s7845_s29, 256 }
  0x8e   :  { %p6681_p6 = scmp.ne.s32.totalorder %s7845_s29, %s6680_s23  ;;  %p6684_p7 = scmp.lt.u32.totalorder %s6680_s23, %s7845_s29 }
  0x90   :  { %p6686_p8 = pnand %p6684_p7, %p6681_p6 }
  0x92   :  { %6689 = shalt.err (!%p6686_p8)
}
  0x93   :  { %s6690_s5 = scalar_lea.vmem %s85_s27, 256  ;;  %p6695_p10 = scmp.lt.s32.totalorder %s85_s27, %s85_s27 }
  0x94   :  { %p6691_p9 = scmp.ne.s32.totalorder %s85_s27, %s6690_s5  ;;  %p6696_p11 = scmp.lt.s32.totalorder %s6690_s5, %s6690_s5 }
  0x96   :  { %p6697_p12 = por %p6696_p11, %p6695_p10 }
  0x98   :  { %p6698_p13 = pnand %p6697_p12, %p6691_p9 }
  0x9a   :  { %6701 = shalt.err (!%p6698_p13)
}
  0x9b   :  { %90 = dma.hbm_to_vmem [thread:$0]  %s7845_s29, 256, %s85_s27, [#allocation9], %s6783_s4, %s6783_s4, %s6784_s25  }
  0x9c   :  { %s6789_s24 = smov [#allocation13]   ;;  %s6790_s2 = smov [#allocation16]  }
  0x9d   :  { %s116_s22 = sshll.u32 %s6789_s24, 4  ;;  %s140_s12 = sshll.u32 %s6790_s2, 4  ;;  %s117_s22 = int_to_ptr.vmem [resolvable:$true] %s116_s22  ;;  %s141_s12 = int_to_ptr.vmem [resolvable:$true] %s140_s12 }
  0x9e   :  { %s6702_s23 = scalar_lea.hbm %s7813_s11, 1536 }
  0x9f   :  { %p6703_p0 = scmp.ne.s32.totalorder %s7813_s11, %s6702_s23  ;;  %p6706_p1 = scmp.lt.u32.totalorder %s6702_s23, %s7813_s11 }
  0xa1   :  { %p6708_p2 = pnand %p6706_p1, %p6703_p0 }
  0xa3   :  { %6711 = shalt.err (!%p6708_p2)
}
  0xa4   :  { %s6712_s27 = scalar_lea.vmem %s117_s22, 1536  ;;  %p6717_p4 = scmp.lt.s32.totalorder %s117_s22, %s117_s22 }
  0xa5   :  { %p6713_p3 = scmp.ne.s32.totalorder %s117_s22, %s6712_s27  ;;  %p6718_p5 = scmp.lt.s32.totalorder %s6712_s27, %s6712_s27 }
  0xa7   :  { %p6719_p6 = por %p6718_p5, %p6717_p4 }
  0xa9   :  { %p6720_p7 = pnand %p6719_p6, %p6713_p3 }
  0xab   :  { %6723 = shalt.err (!%p6720_p7)
}
  0xac   :  { %122 = dma.hbm_to_vmem [thread:$0]  %s7813_s11, 1536, %s117_s22, [#allocation12], %s6783_s4, %s6783_s4, %s6784_s25  }
  0xad   :  { %s6724_s24 = scalar_lea.hbm %s7815_s13, 1536 }
  0xae   :  { %p6725_p8 = scmp.ne.s32.totalorder %s7815_s13, %s6724_s24  ;;  %p6728_p9 = scmp.lt.u32.totalorder %s6724_s24, %s7815_s13 }
  0xb0   :  { %p6730_p10 = pnand %p6728_p9, %p6725_p8 }
  0xb2   :  { %6733 = shalt.err (!%p6730_p10)
}
  0xb3   :  { %s6734_s28 = scalar_lea.vmem %s141_s12, 1536  ;;  %p6739_p12 = scmp.lt.s32.totalorder %s141_s12, %s141_s12 }
  0xb4   :  { %p6735_p11 = scmp.ne.s32.totalorder %s141_s12, %s6734_s28  ;;  %p6740_p13 = scmp.lt.s32.totalorder %s6734_s28, %s6734_s28 }
  0xb6   :  { %p6741_p0 = por %p6740_p13, %p6739_p12 }
  0xb8   :  { %p6742_p1 = pnand %p6741_p0, %p6735_p11 }
  0xba   :  { %6745 = shalt.err (!%p6742_p1)
}
  0xbb   :  { %146 = dma.hbm_to_vmem [thread:$0]  %s7815_s13, 1536, %s141_s12, [#allocation15], %s6783_s4, %s6783_s4, %s6784_s25  }
  0xbc   :  { %6768 = dma.done.wait [#allocation3], 64  }
  0xbd   :  { %6769 = vsyncadd [#allocation3], 4294967232 }
  0xbe   :  { %6770 = dma.done.wait [#allocation6], 384  }
  0xbf   :  { %6771 = vsyncadd [#allocation6], 4294966912 }
  0xc0   :  { %6772 = dma.done.wait [#allocation9], 768  }
  0xc1   :  { %6773 = vsyncadd [#allocation9], 4294966528 }
  0xc2   :  { %6774 = dma.done.wait [#allocation12], 1920  }
  0xc3   :  { %6775 = vsyncadd [#allocation12], 4294965376 }
  0xc4   :  { %6776 = dma.done.wait [#allocation15], 3072  }
  0xc5   :  { %6777 = vsyncadd [#allocation15], 4294964224  ;;  %v6791_v0 = vmov 0.0|0.0   ;;  %vm6792_vm0 = vmmov 0   ;;  %v6793_v1 = vmov 0.0   ;;  %v191_v2 = vld [vmem:[#allocation7] sm:$0xff] }
  0xc6   :  { %6067 = vmatprep.subr.bf16.mxu0 %v6791_v0  ;;  %5442 = vmatprep.mubr.msk.f32.mxu0 %vm6792_vm0, %v6793_v1  ;;  %v192_v3 = vld [vmem:[#allocation7 + $0x8] sm:$0xff]  ;;  %v350_v5 = vld [vmem:[#allocation11] sm:$0xff]  ;;  %v268_v6 = vld [vmem:[#allocation8] sm:$0xff]  ;;  %vm193_vm1 = vcmask 130048   ;;  %s7846_s25 = sld [smem:[#allocation24_spill]]  ;;  %vm358_vm2 = vcmask 64512  }
  0xc7   :  { %6070 = vmatprep.subr.bf16.mxu1 %v6791_v0  ;;  %5453 = vmatprep.mubr.msk.f32.mxu1 %vm6792_vm0, %v6793_v1  ;;  %v6068_v4 = vpack.c.bf16 %v192_v3, %v191_v2  ;;  %v269_v7 = vld [vmem:[#allocation8 + $0x8] sm:$0xff]  ;;  %v190_v8 = vld [vmem:[#allocation2] sm:$0xf]  ;;  %v270_v15 = vld [vmem:[#allocation8 + $0x10] sm:$0xff]  ;;  %vm272_vm3 = vcmask 261120   ;;  %s7847_s2 = sld [smem:[#allocation30_spill]] }
  0xc8   :  { %v6071_v9 = vpack.c.bf16 %v269_v7, %v268_v6  ;;  %v552_v11 = vld [vmem:[#allocation11 + $0x10] sm:$0xff]  ;;  %v271_v16 = vld [vmem:[#allocation8 + $0x18] sm:$0xff]  ;;  %v5046_v19 = vld [vmem:[%s7810_s8 + $0x28] sm:$0xff]  ;;  %vm4385_vm4 = vcmask 2048   ;;  %vm4412_vm5 = vcmask 256000   ;;  %vm4931_vm6 = vcmask 523264  }
  0xc9   :  { %6069 = vmatpush3.bf16.msra.mxu0 %v6068_v4  ;;  %v6074_v17 = vpack.c.bf16 %v271_v16, %v270_v15  ;;  %v5045_v18 = vld [vmem:[%s7810_s8 + $0x20] sm:$0xff]  ;;  %v5047_v21 = vld [vmem:[%s7810_s8 + $0x30] sm:$0xff]  ;;  %v5048_v22 = vld [vmem:[%s7810_s8 + $0x38] sm:$0xff]  ;;  %s6795_s26 = smov [#allocation17]   ;;  %vm5005_vm7 = vcmask 24576  }
  0xca   :  { %5456 = vmatprep.subr.mxu0 %v350_v5  ;;  %6072 = vmatpush3.bf16.msra.mxu1 %v6071_v9  ;;  %v7077_v20 = vpack.c.bf16 %v5046_v19, %v5045_v18  ;;  %v457_v23 = vld [vmem:[#allocation11 + $0x8] sm:$0xff]  ;;  %v7087_v24 = vpack.c.bf16 %v5048_v22, %v5047_v21  ;;  %v646_v25 = vld [vmem:[%s7810_s8] sm:$0xff]  ;;  %v647_v26 = vld [vmem:[%s7810_s8 + $0x8] sm:$0xff]  ;;  %s5013_s6 = sshll.u32 %s6795_s26, 4  ;;  %s5014_s6 = int_to_ptr.vmem [resolvable:$true] %s5013_s6 }
  0xcb   :  { %6073 = vmatprep.subr.bf16.mxu1 %v6791_v0  ;;  %v7097_v27 = vpack.c.bf16 %v647_v26, %v646_v25  ;;  %v648_v28 = vld [vmem:[%s7810_s8 + $0x10] sm:$0xff]  ;;  %v649_v29 = vld [vmem:[%s7810_s8 + $0x18] sm:$0xff]  ;;  %v5049_v37 = vld [vmem:[%s7810_s8 + $0x40] sm:$0xff]  ;;  %s6746_s23 = scalar_lea.vmem %s5014_s6, 16  ;;  %s6750_s28 = scalar_lea.vmem %s5014_s6, 32 }
  0xcc   :  { %v346_v10 = vld [vmem:[%s7846_s25] sm:$0xff]  ;;  %5443 = vmatmul.mubr.msk.f32.vlgmr.msra.gmra.mrb[0].mxu0 %vm193_vm1, %v190_v8  ;;  %v347_v12 = vld [vmem:[%s7846_s25 + $0x8] sm:$0xff]  ;;  %v348_v13 = vld [vmem:[%s7846_s25 + $0x10] sm:$0xff]  ;;  %v7110_v30 = vpack.c.bf16 %v649_v29, %v648_v28  ;;  %p6747_p2 = scmp.ne.s32.totalorder %s5014_s6, %s6746_s23  ;;  %p6751_p3 = scmp.lt.s32.totalorder %s5014_s6, %s5014_s6 }
  0xcd   :  { %5457 = vmatpush3.msra.mxu0 %v350_v5  ;;  %5458 = vmatprep.mubr.msk.f32.mxu0 %vm358_vm2, %v346_v10  ;;  %v349_v14 = vld [vmem:[%s7846_s25 + $0x18] sm:$0xff]  ;;  %v5050_v38 = vld [vmem:[%s7810_s8 + $0x48] sm:$0xff]  ;;  %v5051_v40 = vld [vmem:[%s7810_s8 + $0x50] sm:$0xff]  ;;  %p6752_p4 = scmp.lt.s32.totalorder %s6750_s28, %s6746_s23 }
  0xce   :  { %5472 = vmatprep.subr.mxu0 %v552_v11  ;;  %6075 = vmatpush3.bf16.msra.mxu1 %v6074_v17  ;;  %v7135_v39 = vpack.c.bf16 %v5050_v38, %v5049_v37  ;;  %v5052_v41 = vld [vmem:[%s7810_s8 + $0x58] sm:$0xff]  ;;  %v5040_v45 = vld [vmem:[%s7811_s9 + $0x2] ss:$0 sm:$0xff]  ;;  %v5034_v56 = vld [vmem:[%s7811_s9 + $0x1] ss:$0 sm:$0xff] }
  0xcf   :  { %5464 = vmatprep.subr.mxu1 %v457_v23  ;;  %v7146_v42 = vpack.c.bf16 %v5052_v41, %v5051_v40  ;;  %v7183_v63 = vld [vmem:[%s7811_s9] ss:$0 sm:$0xff]  ;;  %v7195_v4 = vld [vmem:[%s7812_s10 + $0x1] ss:$0 sm:$0xff]  ;;  %v7203_v21 = vld [vmem:[%s7812_s10 + $0x2] ss:$0 sm:$0xff]  ;;  %p6753_p5 = por %p6752_p4, %p6751_p3 }
  0xd0   :  { %5459 = vmatmul.mubr.msk.f32.vlgmr.msra.gmra.mrb[2].mxu0 %vm358_vm2, %v347_v12  ;;  %v7190_v3 = vld [vmem:[%s7812_s10] ss:$0 sm:$0xff] }
  0xd1   :  { %5461 = vmatprep.mubr.msk.f32.mxu0 %vm358_vm2, %v348_v13  ;;  %5473 = vmatpush3.msra.mxu0 %v552_v11  ;;  %p6754_p6 = pnand %p6753_p5, %p6747_p2 }
  0xd2   :  { %6082 = vmatprep.subr.bf16.mxu0 %v6791_v0 }
  0xd4   :  { %5462 = vmatmul.mubr.msk.f32.gmra.mrb[4].mxu0 %vm358_vm2, %v349_v14 }
  0xd5   :  { %5474 = vmatprep.mubr.msk.f32.mxu0 %vm358_vm2, %v346_v10 }
  0xd8   :  { %5475 = vmatmul.mubr.msk.f32.vlgmr.msra.gmra.mrb[6].mxu0 %vm358_vm2, %v347_v12 }
  0xd9   :  { %5477 = vmatprep.mubr.msk.f32.mxu0 %vm358_vm2, %v348_v13  ;;  %6084 = vmatpush3.bf16.msra.mxu0 %v7077_v20 }
  0xda   :  { %6085 = vmatprep.subr.bf16.mxu0 %v6791_v0 }
  0xdc   :  { %5478 = vmatmul.mubr.msk.f32.gmra.mrb[8].mxu0 %vm358_vm2, %v349_v14 }
  0xdd   :  { %5499 = vmatprep.mubr.msk.f32.mxu0 %vm6792_vm0, %v6793_v1  ;;  %6087 = vmatpush3.bf16.msra.mxu0 %v7087_v24 }
  0xde   :  { %6094 = vmatprep.subr.bf16.mxu0 %v6791_v0 }
  0xe0   :  { %5500 = vmatmul.mubr.f32.vlgmr.msra.gmra.mrb[10].mxu0 %v6793_v1 }
  0xe1   :  { %6096 = vmatpush3.bf16.msra.mxu0 %v7097_v27  ;;  %5521 = vmatprep.mubr.msk.f32.mxu0 %vm6792_vm0, %v6793_v1 }
  0xe2   :  { %6097 = vmatprep.subr.bf16.mxu0 %v6791_v0 }
  0xe5   :  { %6099 = vmatpush3.bf16.msra.mxu0 %v7110_v30 }
  0xe6   :  { %6106 = vmatprep.subr.bf16.mxu0 %v6791_v0 }
 0x19f   :  { %v263_v31 = vpop.f32.mrb[0].mxu0 }
 0x1a0   :  { %v267_v32 = vmax.f32 %v263_v31, 0.0  ;;  %v5444_v33 = vpop.f32.mrb[1].mxu0 }
 0x1a2   :  { %5454 = vmatmul.mubr.msk.f32.vlgmr.msra.gmra.mrb[0].mxu1 %vm272_vm3, %v267_v32 }
 0x1a3   :  { %5465 = vmatpush3.msra.mxu1 %v457_v23  ;;  %5466 = vmatprep.mubr.msk.f32.mxu1 %vm358_vm2, %v346_v10  ;;  %v7116_v34 = vpop.f32.mrb[2].mxu0 }
 0x1a4   :  { %6076 = vmatprep.subr.bf16.mxu1 %v6791_v0  ;;  %v437_v35 = vpop.f32.mrb[3].mxu0 }
 0x1a5   :  { %v438_v6 = vadd.f32 %v7183_v63, %v437_v35 }
 0x1a6   :  { %5467 = vmatmul.mubr.msk.f32.vlgmr.msra.gmra.mrb[2].mxu1 %vm358_vm2, %v347_v12 }
 0x1a7   :  { %6078 = vmatpush3.bf16.msra.mxu1 %v7097_v27  ;;  %5469 = vmatprep.mubr.msk.f32.mxu1 %vm358_vm2, %v348_v13  ;;  %v7122_v36 = vpop.f32.mrb[4].mxu0 }
 0x1a8   :  { %6079 = vmatprep.subr.bf16.mxu1 %v6791_v0  ;;  %v7160_v43 = vpop.f32.mrb[5].mxu0 }
 0x1aa   :  { %5470 = vmatmul.mubr.msk.f32.gmra.mrb[4].mxu1 %vm358_vm2, %v349_v14 }
 0x1ab   :  { %6081 = vmatpush3.bf16.msra.mxu1 %v7110_v30  ;;  %5488 = vmatprep.mubr.msk.f32.mxu1 %vm6792_vm0, %v6793_v1  ;;  %v5476_v44 = vpop.f32.mrb[6].mxu0 }
 0x1ac   :  { %6088 = vmatprep.subr.bf16.mxu1 %v6791_v0  ;;  %v7165_v46 = vadd.f32 %v5476_v44, %v5040_v45  ;;  %v627_v47 = vpop.f32.mrb[7].mxu0 }
 0x1ad   :  { %v628_v26 = vadd.f32 %v5040_v45, %v627_v47 }
 0x1ae   :  { %5489 = vmatmul.mubr.f32.vlgmr.msra.gmra.mrb[6].mxu1 %v6793_v1 }
 0x1af   :  { %6090 = vmatpush3.bf16.msra.mxu1 %v7135_v39  ;;  %5510 = vmatprep.mubr.msk.f32.mxu1 %vm6792_vm0, %v6793_v1  ;;  %v5479_v48 = vpop.f32.mrb[8].mxu0 }
 0x1b0   :  { %6091 = vmatprep.subr.bf16.mxu1 %v6791_v0  ;;  %v7167_v49 = vadd.f32 %v5479_v48, %v5040_v45  ;;  %v637_v50 = vpop.f32.mrb[9].mxu0 }
 0x1b1   :  { %v7169_v51 = vadd.f32 %v5040_v45, %v637_v50 }
 0x1b3   :  { %6093 = vmatpush3.bf16.msra.mxu1 %v7146_v42  ;;  %v816_v52 = vpop.f32.mrb[10].mxu0 }
 0x1b4   :  { %6100 = vmatprep.subr.bf16.mxu1 %v6791_v0  ;;  %v5501_v53 = vpop.f32.mrb[11].mxu0  ;;  %v817_v10 = vadd.f32 %v7195_v4, %v816_v52 }
 0x1b6   :  { %5511 = vmatmul.mubr.f32.vlgmr.msra.gmra.mrb[8].mxu1 %v6793_v1 }
 0x1b7   :  { %6102 = vmatpush3.bf16.msra.mxu1 %v7077_v20  ;;  %5532 = vmatprep.mubr.msk.f32.mxu1 %vm6792_vm0, %v6793_v1 }
 0x1b8   :  { %6103 = vmatprep.subr.bf16.mxu1 %v6791_v0 }
 0x1bb   :  { %6105 = vmatpush3.bf16.msra.mxu1 %v7087_v24 }
 0x1bc   :  { %6112 = vmatprep.subr.bf16.mxu1 %v6791_v0 }
 0x275   :  { %v7171_v54 = vpop.f32.mrb[0].mxu1 }
 0x276   :  { %v5455_v55 = vpop.f32.mrb[1].mxu1 }
 0x279   :  { %v5468_v57 = vpop.f32.mrb[2].mxu1 }
 0x27a   :  { %v7176_v58 = vadd.f32 %v5468_v57, %v5034_v56  ;;  %v532_v59 = vpop.f32.mrb[3].mxu1 }
 0x27b   :  { %v533_v9 = vadd.f32 %v5034_v56, %v532_v59 }
 0x27d   :  { %v5471_v60 = vpop.f32.mrb[4].mxu1  ;;  %v903_v13 = vadd.f32 %v817_v10, %v533_v9 }
 0x27e   :  { %v7178_v61 = vadd.f32 %v5471_v60, %v5034_v56  ;;  %v542_v62 = vpop.f32.mrb[5].mxu1 }
 0x27f   :  { %v7185_v2 = vadd.f32 %v5034_v56, %v542_v62  ;;  %v5059_v16 = vmul.f32 -1.442695, %v903_v13 }
 0x281   :  { %v740_v5 = vpop.f32.mrb[6].mxu1 }
 0x282   :  { %v741_v7 = vadd.f32 %v7190_v3, %v740_v5  ;;  %v5490_v8 = vpop.f32.mrb[7].mxu1 }
 0x284   :  { %v896_v11 = vadd.f32 %v741_v7, %v438_v6 }
 0x286   :  { %v5058_v12 = vmul.f32 -1.442695, %v896_v11 }
 0x288   :  { %6420 = vpow2.f32 %v5058_v12 }
 0x289   :  { %v892_v14 = vpop.f32.mrb[8].mxu1  ;;  %6422 = vpow2.f32 %v5059_v16 }
 0x28a   :  { %v5512_v15 = vpop.f32.mrb[9].mxu1  ;;  %v893_v23 = vadd.f32 %v7203_v21, %v892_v14 }
 0x292   :  { %v6421_v17 = vpop.eup %6420 }
 0x293   :  { %v900_v18 = vadd.f32 1.0, %v6421_v17  ;;  %v6423_v19 = vpop.eup %6422 }
 0x294   :  { %v907_v22 = vadd.f32 1.0, %v6423_v19 }
 0x295   :  { %6424 = vrcp.f32 %v900_v18 }
 0x296   :  { %6426 = vrcp.f32 %v907_v22 }
 0x29f   :  { %v6425_v25 = vpop.eup %6424 }
 0x2a0   :  { %v910_v28 = vmul.f32 %v6425_v25, %v893_v23  ;;  %v6427_v31 = vpop.eup %6426 }
 0x2a1   :  { %v913_v32 = vsub.f32 1.0, %v6427_v31  ;;  %v915_v37 = vmul.f32 0.0, %v6427_v31 }
 0x2a2   :  { %v911_v29 = vadd.f32 %v910_v28, %v628_v26 }
 0x2a4   :  { %6428 = vtanh.f32 %v911_v29 }
 0x2ae   :  { %v6429_v33 = vpop.eup %6428 }
 0x2af   :  { %v914_v35 = vmul.f32 %v6429_v33, %v913_v32 }
 0x2b1   :  { %v916_v38 = vadd.f32 %v915_v37, %v914_v35 }
 0x2b3   :  { %5522 = vmatmul.mubr.msk.f32.vlgmr.msra.gmra.mrb[12].mxu0 %vm272_vm3, %v916_v38  ;;  %5533 = vmatmul.mubr.msk.f32.vlgmr.msra.gmra.mrb[10].mxu1 %vm272_vm3, %v916_v38  ;;  %v1158_v13 = vrot.slane %v916_v38, 4 }
 0x2b4   :  { %6108 = vmatpush3.bf16.msra.mxu0 %v7135_v39  ;;  %5543 = vmatprep.mubr.msk.f32.mxu0 %vm6792_vm0, %v6793_v1 }
 0x2b5   :  { %6109 = vmatprep.subr.bf16.mxu0 %v6791_v0  ;;  %6114 = vmatpush3.bf16.msra.mxu1 %v7097_v27 }
 0x2b6   :  { %6115 = vmatprep.subr.bf16.mxu1 %v6791_v0  ;;  %5554 = vmatprep.mubr.msk.f32.mxu1 %vm6792_vm0, %v6793_v1 }
 0x2b8   :  { %6111 = vmatpush3.bf16.msra.mxu0 %v7146_v42 }
 0x2b9   :  { %6118 = vmatprep.subr.bf16.mxu0 %v6791_v0  ;;  %6117 = vmatpush3.bf16.msra.mxu1 %v7110_v30 }
 0x2ba   :  { %6124 = vmatprep.subr.bf16.mxu1 %v6791_v0 }
 0x2bb   :  { %5544 = vmatmul.mubr.msk.f32.vlgmr.msra.gmra.mrb[14].mxu0 %vm272_vm3, %v916_v38 }
 0x2bc   :  { %6120 = vmatpush3.bf16.msra.mxu0 %v7077_v20  ;;  %5565 = vmatprep.mubr.msk.f32.mxu0 %vm6792_vm0, %v6793_v1 }
 0x2bd   :  { %6121 = vmatprep.subr.bf16.mxu0 %v6791_v0 }
 0x2c0   :  { %6123 = vmatpush3.bf16.msra.mxu0 %v7087_v24 }
 0x2c1   :  { %6130 = vmatprep.subr.bf16.mxu0 %v6791_v0 }
 0x386   :  { %v986_v40 = vpop.f32.mrb[12].mxu0  ;;  %v1056_v41 = vpop.f32.mrb[10].mxu1 }
 0x387   :  { %v987_v44 = vadd.f32 %v7190_v3, %v986_v40  ;;  %v1057_v45 = vadd.f32 %v7195_v4, %v1056_v41  ;;  %v5523_v47 = vpop.f32.mrb[13].mxu0  ;;  %v5534_v48 = vpop.f32.mrb[11].mxu1 }
 0x389   :  { %v1131_v50 = vrot.slane %v987_v44, 4  ;;  %v1141_v52 = vrot.slane %v1057_v45, 4 }
 0x38b   :  { %v1133_v53 = vadd.f32 %v1131_v50, %v438_v6  ;;  %v1143_v55 = vadd.f32 %v1141_v52, %v533_v9 }
 0x38d   :  { %v5063_v56 = vmul.f32 -1.442695, %v1133_v53  ;;  %v5064_v57 = vmul.f32 -1.442695, %v1143_v55 }
 0x38e   :  { %v1126_v59 = vpop.f32.mrb[14].mxu0 }
 0x38f   :  { %6430 = vpow2.f32 %v5063_v56  ;;  %v5545_v60 = vpop.f32.mrb[15].mxu0  ;;  %v1127_v10 = vadd.f32 %v7203_v21, %v1126_v59 }
 0x390   :  { %6432 = vpow2.f32 %v5064_v57 }
 0x391   :  { %v1151_v11 = vrot.slane %v1127_v10, 4 }
 0x399   :  { %v6431_v62 = vpop.eup %6430 }
 0x39a   :  { %v6433_v5 = vpop.eup %6432  ;;  %v1137_v7 = vadd.f32 1.0, %v6431_v62 }
 0x39b   :  { %v1147_v8 = vadd.f32 1.0, %v6433_v5 }
 0x39c   :  { %6434 = vrcp.f32 %v1137_v7 }
 0x39d   :  { %6436 = vrcp.f32 %v1147_v8 }
 0x3a6   :  { %v6435_v12 = vpop.eup %6434 }
 0x3a7   :  { %v6437_v14 = vpop.eup %6436  ;;  %v1153_v6 = vmul.f32 %v6435_v12, %v1151_v11 }
 0x3a8   :  { %v1160_v9 = vmul.f32 %v6437_v14, %v1158_v13  ;;  %v1156_v16 = vsub.f32 1.0, %v6437_v14 }
 0x3a9   :  { %v1154_v15 = vadd.f32 %v1153_v6, %v628_v26  ;;  %v443_v26 = vadd.f32 %v7116_v34, %v7183_v63 }
 0x3ab   :  { %6438 = vtanh.f32 %v1154_v15 }
 0x3b5   :  { %v6439_v17 = vpop.eup %6438 }
 0x3b6   :  { %v1157_v18 = vmul.f32 %v6439_v17, %v1156_v16 }
 0x3b8   :  { %v1161_v19 = vadd.f32 %v1160_v9, %v1157_v18 }
 0x3ba   :  { %v1163_v22 = vrot.slane %v1161_v19, 4 }
 0x3bc   :  { %5555 = vmatmul.mubr.msk.f32.vlgmr.msra.gmra.mrb[12].mxu1 %vm272_vm3, %v1163_v22  ;;  %5566 = vmatmul.mubr.msk.f32.vlgmr.msra.gmra.mrb[16].mxu0 %vm272_vm3, %v1163_v22 }
 0x3bd   :  { %6126 = vmatpush3.bf16.msra.mxu1 %v7135_v39  ;;  %5576 = vmatprep.mubr.msk.f32.mxu1 %vm6792_vm0, %v6793_v1 }
 0x3be   :  { %6127 = vmatprep.subr.bf16.mxu1 %v6791_v0  ;;  %6132 = vmatpush3.bf16.msra.mxu0 %v7097_v27 }
 0x3bf   :  { %6133 = vmatprep.subr.bf16.mxu0 %v6791_v0  ;;  %5587 = vmatprep.mubr.msk.f32.mxu0 %vm6792_vm0, %v6793_v1 }
 0x3c1   :  { %6129 = vmatpush3.bf16.msra.mxu1 %v7146_v42 }
 0x3c2   :  { %6136 = vmatprep.subr.bf16.mxu1 %v6791_v0  ;;  %6135 = vmatpush3.bf16.msra.mxu0 %v7110_v30 }
 0x3c3   :  { %6142 = vmatprep.subr.bf16.mxu0 %v6791_v0 }
 0x3c4   :  { %5577 = vmatmul.mubr.msk.f32.vlgmr.msra.gmra.mrb[14].mxu1 %vm272_vm3, %v1163_v22 }
 0x3c5   :  { %6138 = vmatpush3.bf16.msra.mxu1 %v7077_v20  ;;  %5598 = vmatprep.mubr.msk.f32.mxu1 %vm6792_vm0, %v6793_v1 }
 0x3c6   :  { %6139 = vmatprep.subr.bf16.mxu1 %v6791_v0 }
 0x3c9   :  { %6141 = vmatpush3.bf16.msra.mxu1 %v7087_v24 }
 0x3ca   :  { %6148 = vmatprep.subr.bf16.mxu1 %v6791_v0 }
 0x48f   :  { %v1232_v23 = vpop.f32.mrb[12].mxu1  ;;  %v1302_v25 = vpop.f32.mrb[16].mxu0 }
 0x490   :  { %v1233_v28 = vadd.f32 %v7190_v3, %v1232_v23  ;;  %v5556_v29 = vpop.f32.mrb[13].mxu1  ;;  %v5567_v31 = vpop.f32.mrb[17].mxu0  ;;  %v1303_v32 = vadd.f32 %v7195_v4, %v1302_v25 }
 0x492   :  { %v1376_v33 = vadd.f32 %v1233_v28, %v443_v26  ;;  %v1383_v37 = vadd.f32 %v1303_v32, %v7176_v58 }
 0x494   :  { %v5068_v35 = vmul.f32 -1.442695, %v1376_v33  ;;  %v5069_v41 = vmul.f32 -1.442695, %v1383_v37 }
 0x496   :  { %6440 = vpow2.f32 %v5068_v35 }
 0x497   :  { %v1372_v38 = vpop.f32.mrb[14].mxu1  ;;  %6442 = vpow2.f32 %v5069_v41 }
 0x498   :  { %v5578_v40 = vpop.f32.mrb[15].mxu1  ;;  %v1373_v48 = vadd.f32 %v7203_v21, %v1372_v38 }
 0x4a0   :  { %v6441_v44 = vpop.eup %6440 }
 0x4a1   :  { %v1380_v45 = vadd.f32 1.0, %v6441_v44  ;;  %v6443_v47 = vpop.eup %6442 }
 0x4a2   :  { %v1387_v34 = vadd.f32 1.0, %v6443_v47  ;;  %v448_v47 = vadd.f32 %v7183_v63, %v7160_v43 }
 0x4a3   :  { %6444 = vrcp.f32 %v1380_v45 }
 0x4a4   :  { %6446 = vrcp.f32 %v1387_v34 }
 0x4ad   :  { %v6445_v50 = vpop.eup %6444 }
 0x4ae   :  { %v1390_v52 = vmul.f32 %v6445_v50, %v1373_v48  ;;  %v6447_v55 = vpop.eup %6446 }
 0x4af   :  { %v1393_v56 = vsub.f32 1.0, %v6447_v55  ;;  %v1396_v60 = vmul.f32 %v6447_v55, %v1163_v22 }
 0x4b0   :  { %v1391_v53 = vadd.f32 %v1390_v52, %v7165_v46 }
 0x4b2   :  { %6448 = vtanh.f32 %v1391_v53 }
 0x4bc   :  { %v6449_v57 = vpop.eup %6448 }
 0x4bd   :  { %v1394_v59 = vmul.f32 %v6449_v57, %v1393_v56 }
 0x4bf   :  { %v1397_v62 = vadd.f32 %v1396_v60, %v1394_v59 }
 0x4c1   :  { %5588 = vmatmul.mubr.msk.f32.vlgmr.msra.gmra.mrb[18].mxu0 %vm272_vm3, %v1397_v62  ;;  %5599 = vmatmul.mubr.msk.f32.vlgmr.msra.gmra.mrb[16].mxu1 %vm272_vm3, %v1397_v62  ;;  %v1639_v32 = vrot.slane %v1397_v62, 4 }
 0x4c2   :  { %6144 = vmatpush3.bf16.msra.mxu0 %v7135_v39  ;;  %5609 = vmatprep.mubr.msk.f32.mxu0 %vm6792_vm0, %v6793_v1 }
 0x4c3   :  { %6145 = vmatprep.subr.bf16.mxu0 %v6791_v0  ;;  %6150 = vmatpush3.bf16.msra.mxu1 %v7097_v27 }
 0x4c4   :  { %6151 = vmatprep.subr.bf16.mxu1 %v6791_v0  ;;  %5620 = vmatprep.mubr.msk.f32.mxu1 %vm6792_vm0, %v6793_v1 }
 0x4c6   :  { %6147 = vmatpush3.bf16.msra.mxu0 %v7146_v42 }
 0x4c7   :  { %6154 = vmatprep.subr.bf16.mxu0 %v6791_v0  ;;  %6153 = vmatpush3.bf16.msra.mxu1 %v7110_v30 }
 0x4c8   :  { %6160 = vmatprep.subr.bf16.mxu1 %v6791_v0 }
 0x4c9   :  { %5610 = vmatmul.mubr.msk.f32.vlgmr.msra.gmra.mrb[20].mxu0 %vm272_vm3, %v1397_v62 }
 0x4ca   :  { %6156 = vmatpush3.bf16.msra.mxu0 %v7077_v20  ;;  %5631 = vmatprep.mubr.msk.f32.mxu0 %vm6792_vm0, %v6793_v1 }
 0x4cb   :  { %6157 = vmatprep.subr.bf16.mxu0 %v6791_v0 }
 0x4ce   :  { %6159 = vmatpush3.bf16.msra.mxu0 %v7087_v24 }
 0x4cf   :  { %6166 = vmatprep.subr.bf16.mxu0 %v6791_v0 }
 0x594   :  { %v1467_v5 = vpop.f32.mrb[18].mxu0  ;;  %v1537_v7 = vpop.f32.mrb[16].mxu1 }
 0x595   :  { %v1468_v8 = vadd.f32 %v7190_v3, %v1467_v5  ;;  %v1538_v10 = vadd.f32 %v7195_v4, %v1537_v7  ;;  %v5589_v11 = vpop.f32.mrb[19].mxu0  ;;  %v5600_v12 = vpop.f32.mrb[17].mxu1 }
 0x597   :  { %v1612_v13 = vrot.slane %v1468_v8, 4  ;;  %v1622_v14 = vrot.slane %v1538_v10, 4 }
 0x599   :  { %v1614_v6 = vadd.f32 %v1612_v13, %v443_v26  ;;  %v1624_v9 = vadd.f32 %v1622_v14, %v7176_v58 }
 0x59b   :  { %v5073_v15 = vmul.f32 -1.442695, %v1614_v6  ;;  %v5074_v16 = vmul.f32 -1.442695, %v1624_v9 }
 0x59c   :  { %v1607_v17 = vpop.f32.mrb[20].mxu0 }
 0x59d   :  { %6450 = vpow2.f32 %v5073_v15  ;;  %v5611_v18 = vpop.f32.mrb[21].mxu0  ;;  %v1608_v28 = vadd.f32 %v7203_v21, %v1607_v17 }
 0x59e   :  { %6452 = vpow2.f32 %v5074_v16 }
 0x59f   :  { %v1632_v29 = vrot.slane %v1608_v28, 4 }
 0x5a7   :  { %v6451_v19 = vpop.eup %6450 }
 0x5a8   :  { %v6453_v22 = vpop.eup %6452  ;;  %v1618_v23 = vadd.f32 1.0, %v6451_v19 }
 0x5a9   :  { %v1628_v25 = vadd.f32 1.0, %v6453_v22 }
 0x5aa   :  { %6454 = vrcp.f32 %v1618_v23 }
 0x5ab   :  { %6456 = vrcp.f32 %v1628_v25 }
 0x5b4   :  { %v6455_v31 = vpop.eup %6454 }
 0x5b5   :  { %v6457_v26 = vpop.eup %6456  ;;  %v1634_v33 = vmul.f32 %v6455_v31, %v1632_v29 }
 0x5b6   :  { %v1641_v58 = vmul.f32 %v6457_v26, %v1639_v32  ;;  %v1637_v37 = vsub.f32 1.0, %v6457_v26 }
 0x5b7   :  { %v1635_v35 = vadd.f32 %v1634_v33, %v7165_v46 }
 0x5b9   :  { %6458 = vtanh.f32 %v1635_v35 }
 0x5c3   :  { %v6459_v38 = vpop.eup %6458 }
 0x5c4   :  { %v1638_v40 = vmul.f32 %v6459_v38, %v1637_v37 }
 0x5c6   :  { %v1642_v41 = vadd.f32 %v1641_v58, %v1638_v40 }
 0x5c8   :  { %v1644_v44 = vrot.slane %v1642_v41, 4 }
 0x5ca   :  { %5621 = vmatmul.mubr.msk.f32.vlgmr.msra.gmra.mrb[18].mxu1 %vm272_vm3, %v1644_v44  ;;  %5632 = vmatmul.mubr.msk.f32.vlgmr.msra.gmra.mrb[22].mxu0 %vm272_vm3, %v1644_v44 }
 0x5cb   :  { %6162 = vmatpush3.bf16.msra.mxu1 %v7135_v39  ;;  %5642 = vmatprep.mubr.msk.f32.mxu1 %vm6792_vm0, %v6793_v1 }
 0x5cc   :  { %6163 = vmatprep.subr.bf16.mxu1 %v6791_v0  ;;  %6168 = vmatpush3.bf16.msra.mxu0 %v7097_v27 }
 0x5cd   :  { %6169 = vmatprep.subr.bf16.mxu0 %v6791_v0  ;;  %5653 = vmatprep.mubr.msk.f32.mxu0 %vm6792_vm0, %v6793_v1 }
 0x5cf   :  { %6165 = vmatpush3.bf16.msra.mxu1 %v7146_v42 }
 0x5d0   :  { %6172 = vmatprep.subr.bf16.mxu1 %v6791_v0  ;;  %6171 = vmatpush3.bf16.msra.mxu0 %v7110_v30 }
 0x5d1   :  { %6178 = vmatprep.subr.bf16.mxu0 %v6791_v0 }
 0x5d2   :  { %5643 = vmatmul.mubr.msk.f32.vlgmr.msra.gmra.mrb[20].mxu1 %vm272_vm3, %v1644_v44 }
 0x5d3   :  { %6174 = vmatpush3.bf16.msra.mxu1 %v7077_v20  ;;  %5664 = vmatprep.mubr.msk.f32.mxu1 %vm6792_vm0, %v6793_v1 }
 0x5d4   :  { %6175 = vmatprep.subr.bf16.mxu1 %v6791_v0 }
 0x5d7   :  { %6177 = vmatpush3.bf16.msra.mxu1 %v7087_v24 }
 0x5d8   :  { %6184 = vmatprep.subr.bf16.mxu1 %v6791_v0 }
 0x69d   :  { %v1713_v46 = vpop.f32.mrb[18].mxu1  ;;  %v1783_v45 = vpop.f32.mrb[22].mxu0 }
 0x69e   :  { %v1714_v34 = vadd.f32 %v7190_v3, %v1713_v46  ;;  %v5622_v48 = vpop.f32.mrb[19].mxu1  ;;  %v5633_v50 = vpop.f32.mrb[23].mxu0  ;;  %v1784_v52 = vadd.f32 %v7195_v4, %v1783_v45 }
 0x6a0   :  { %v1857_v53 = vadd.f32 %v1714_v34, %v448_v47  ;;  %v1864_v56 = vadd.f32 %v1784_v52, %v7185_v2 }
 0x6a2   :  { %v5078_v55 = vmul.f32 -1.442695, %v1857_v53  ;;  %v5079_v60 = vmul.f32 -1.442695, %v1864_v56 }
 0x6a4   :  { %6460 = vpow2.f32 %v5078_v55 }
 0x6a5   :  { %v1853_v57 = vpop.f32.mrb[20].mxu1  ;;  %6462 = vpow2.f32 %v5079_v60 }
 0x6a6   :  { %v5644_v59 = vpop.f32.mrb[21].mxu1  ;;  %v1854_v8 = vadd.f32 %v7203_v21, %v1853_v57 }
 0x6ae   :  { %v6461_v62 = vpop.eup %6460 }
 0x6af   :  { %v1861_v5 = vadd.f32 1.0, %v6461_v62  ;;  %v6463_v7 = vpop.eup %6462 }
 0x6b0   :  { %v1868_v43 = vadd.f32 1.0, %v6463_v7 }
 0x6b1   :  { %6464 = vrcp.f32 %v1861_v5 }
 0x6b2   :  { %6466 = vrcp.f32 %v1868_v43 }
 0x6bb   :  { %v6465_v10 = vpop.eup %6464 }
 0x6bc   :  { %v1871_v11 = vmul.f32 %v6465_v10, %v1854_v8  ;;  %v6467_v13 = vpop.eup %6466 }
 0x6bd   :  { %v1874_v14 = vsub.f32 1.0, %v6467_v13  ;;  %v1877_v15 = vmul.f32 %v6467_v13, %v1644_v44 }
 0x6be   :  { %v1872_v12 = vadd.f32 %v1871_v11, %v7169_v51 }
 0x6c0   :  { %6468 = vtanh.f32 %v1872_v12 }
 0x6ca   :  { %v6469_v6 = vpop.eup %6468 }
 0x6cb   :  { %v1875_v9 = vmul.f32 %v6469_v6, %v1874_v14 }
 0x6cd   :  { %v1878_v16 = vadd.f32 %v1877_v15, %v1875_v9 }
 0x6cf   :  { %5654 = vmatmul.mubr.msk.f32.vlgmr.msra.gmra.mrb[24].mxu0 %vm272_vm3, %v1878_v16  ;;  %5665 = vmatmul.mubr.msk.f32.vlgmr.msra.gmra.mrb[22].mxu1 %vm272_vm3, %v1878_v16  ;;  %v2120_v34 = vrot.slane %v1878_v16, 4 }
 0x6d0   :  { %6180 = vmatpush3.bf16.msra.mxu0 %v7135_v39  ;;  %5675 = vmatprep.mubr.msk.f32.mxu0 %vm6792_vm0, %v6793_v1 }
 0x6d1   :  { %6181 = vmatprep.subr.bf16.mxu0 %v6791_v0  ;;  %6186 = vmatpush3.bf16.msra.mxu1 %v7097_v27 }
 0x6d2   :  { %6187 = vmatprep.subr.bf16.mxu1 %v6791_v0  ;;  %5686 = vmatprep.mubr.msk.f32.mxu1 %vm6792_vm0, %v6793_v1 }
 0x6d4   :  { %6183 = vmatpush3.bf16.msra.mxu0 %v7146_v42 }
 0x6d5   :  { %6190 = vmatprep.subr.bf16.mxu0 %v6791_v0  ;;  %6189 = vmatpush3.bf16.msra.mxu1 %v7110_v30 }
 0x6d6   :  { %6196 = vmatprep.subr.bf16.mxu1 %v6791_v0 }
 0x6d7   :  { %5676 = vmatmul.mubr.msk.f32.vlgmr.msra.gmra.mrb[26].mxu0 %vm272_vm3, %v1878_v16 }
 0x6d8   :  { %6192 = vmatpush3.bf16.msra.mxu0 %v7077_v20  ;;  %5697 = vmatprep.mubr.msk.f32.mxu0 %vm6792_vm0, %v6793_v1 }
 0x6d9   :  { %6193 = vmatprep.subr.bf16.mxu0 %v6791_v0 }
 0x6dc   :  { %6195 = vmatpush3.bf16.msra.mxu0 %v7087_v24 }
 0x6dd   :  { %6202 = vmatprep.subr.bf16.mxu0 %v6791_v0 }
 0x7a2   :  { %v1948_v17 = vpop.f32.mrb[24].mxu0  ;;  %v2018_v18 = vpop.f32.mrb[22].mxu1 }
 0x7a3   :  { %v1949_v19 = vadd.f32 %v7190_v3, %v1948_v17  ;;  %v2019_v22 = vadd.f32 %v7195_v4, %v2018_v18  ;;  %v5655_v23 = vpop.f32.mrb[25].mxu0  ;;  %v5666_v25 = vpop.f32.mrb[23].mxu1 }
 0x7a4   :  { %v2605_v23 = vld [vmem:[#allocation13] sm:$0xff]  ;;  %v2606_v25 = vld [vmem:[#allocation13 + $0x8] sm:$0xff] }
 0x7a5   :  { %v2093_v28 = vrot.slane %v1949_v19, 4  ;;  %v2103_v29 = vrot.slane %v2019_v22, 4 }
 0x7a7   :  { %v2095_v31 = vadd.f32 %v2093_v28, %v448_v47  ;;  %v2105_v32 = vadd.f32 %v2103_v29, %v7185_v2  ;;  %v6227_v28 = vpack.c.bf16 %v2606_v25, %v2605_v23  ;;  %v2607_v29 = vld [vmem:[#allocation13 + $0x10] sm:$0xff] }
 0x7a9   :  { %v5083_v26 = vmul.f32 -1.442695, %v2095_v31  ;;  %v5084_v33 = vmul.f32 -1.442695, %v2105_v32  ;;  %v2608_v31 = vld [vmem:[#allocation13 + $0x18] sm:$0xff]  ;;  %v2769_v32 = vld [vmem:[#allocation13 + $0x20] sm:$0xff] }
 0x7aa   :  { %v2088_v58 = vpop.f32.mrb[26].mxu0 }
 0x7ab   :  { %6470 = vpow2.f32 %v5083_v26  ;;  %v5677_v35 = vpop.f32.mrb[27].mxu0  ;;  %v2089_v44 = vadd.f32 %v7203_v21, %v2088_v58  ;;  %v2770_v26 = vld [vmem:[#allocation13 + $0x28] sm:$0xff]  ;;  %v2772_v58 = vld [vmem:[#allocation13 + $0x38] sm:$0xff] }
 0x7ac   :  { %6472 = vpow2.f32 %v5084_v33  ;;  %v6239_v33 = vpack.c.bf16 %v2770_v26, %v2769_v32 }
 0x7ad   :  { %v2113_v46 = vrot.slane %v2089_v44, 4  ;;  %v2931_v44 = vld [vmem:[#allocation13 + $0x58] sm:$0xff] }
 0x7b5   :  { %v6471_v37 = vpop.eup %6470 }
 0x7b6   :  { %v6473_v38 = vpop.eup %6472  ;;  %v2099_v40 = vadd.f32 1.0, %v6471_v37  ;;  %v2928_v37 = vld [vmem:[#allocation13 + $0x40] sm:$0xff] }
 0x7b7   :  { %v2109_v41 = vadd.f32 1.0, %v6473_v38  ;;  %v2929_v38 = vld [vmem:[#allocation13 + $0x48] sm:$0xff] }
 0x7b8   :  { %6474 = vrcp.f32 %v2099_v40  ;;  %v6251_v40 = vpack.c.bf16 %v2929_v38, %v2928_v37  ;;  %v2774_v37 = vld [vmem:[#allocation14 + $0x20] sm:$0xff]  ;;  %v2775_v38 = vld [vmem:[#allocation14 + $0x28] sm:$0xff] }
 0x7b9   :  { %6476 = vrcp.f32 %v2109_v41  ;;  %v2930_v41 = vld [vmem:[#allocation13 + $0x50] sm:$0xff] }
 0x7c2   :  { %v6475_v45 = vpop.eup %6474 }
 0x7c3   :  { %v6477_v47 = vpop.eup %6476  ;;  %v2115_v48 = vmul.f32 %v6475_v45, %v2113_v46  ;;  %v6254_v46 = vpack.c.bf16 %v2931_v44, %v2930_v41  ;;  %v2609_v45 = vld [vmem:[#allocation14] sm:$0xff]  ;;  %v2776_v44 = vld [vmem:[#allocation14 + $0x30] sm:$0xff] }
 0x7c4   :  { %v2122_v2 = vmul.f32 %v6477_v47, %v2120_v34  ;;  %v2118_v52 = vsub.f32 1.0, %v6477_v47  ;;  %v2610_v34 = vld [vmem:[#allocation14 + $0x8] sm:$0xff]  ;;  %v2611_v47 = vld [vmem:[#allocation14 + $0x10] sm:$0xff] }
 0x7c5   :  { %v2116_v50 = vadd.f32 %v2115_v48, %v7169_v51  ;;  %v6221_v48 = vpack.c.bf16 %v2610_v34, %v2609_v45  ;;  %v2934_v45 = vld [vmem:[#allocation14 + $0x48] sm:$0xff] }
 0x7c7   :  { %6478 = vtanh.f32 %v2116_v50 }
 0x7d1   :  { %v6479_v53 = vpop.eup %6478 }
 0x7d2   :  { %v2119_v55 = vmul.f32 %v6479_v53, %v2118_v52  ;;  %v3091_v52 = vld [vmem:[#allocation16 + $0x20] sm:$0xff]  ;;  %v3092_v53 = vld [vmem:[#allocation16 + $0x28] sm:$0xff] }
 0x7d4   :  { %v2123_v56 = vadd.f32 %v2122_v2, %v2119_v55  ;;  %v2612_v2 = vld [vmem:[#allocation14 + $0x18] sm:$0xff]  ;;  %v7407_v55 = vpack.c.bf16 %v3092_v53, %v3091_v52  ;;  %v3097_v52 = vld [vmem:[#allocation16 + $0x48] sm:$0xff] }
 0x7d5   :  { %v6224_v50 = vpack.c.bf16 %v2612_v2, %v2611_v47  ;;  %v2935_v47 = vld [vmem:[#allocation14 + $0x50] sm:$0xff] }
 0x7d6   :  { %v2125_v57 = vrot.slane %v2123_v56, 4  ;;  %v3094_v56 = vld [vmem:[#allocation16 + $0x38] sm:$0xff] }
 0x7d8   :  { %5687 = vmatmul.mubr.msk.f32.vlgmr.msra.gmra.mrb[24].mxu1 %vm272_vm3, %v2125_v57  ;;  %5698 = vmatmul.mubr.msk.f32.vlgmr.msra.gmra.mrb[28].mxu0 %vm272_vm3, %v2125_v57 }
 0x7d9   :  { %6198 = vmatpush3.bf16.msra.mxu1 %v7135_v39  ;;  %5708 = vmatprep.mubr.msk.f32.mxu1 %vm6792_vm0, %v6793_v1 }
 0x7da   :  { %6199 = vmatprep.subr.bf16.mxu1 %v6791_v0  ;;  %6204 = vmatpush3.bf16.msra.mxu0 %v7097_v27 }
 0x7db   :  { %6205 = vmatprep.subr.bf16.mxu0 %v6791_v0  ;;  %5719 = vmatprep.mubr.msk.f32.mxu0 %vm6792_vm0, %v6793_v1 }
 0x7dd   :  { %6201 = vmatpush3.bf16.msra.mxu1 %v7146_v42 }
 0x7de   :  { %6208 = vmatprep.subr.bf16.mxu1 %v6791_v0  ;;  %6207 = vmatpush3.bf16.msra.mxu0 %v7110_v30  ;;  %v7361_v30 = vadd.f32 %v7122_v36, %v7183_v63 }
 0x7df   :  { %6214 = vmatprep.subr.bf16.mxu0 %v6791_v0 }
 0x7e0   :  { %5709 = vmatmul.mubr.msk.f32.vlgmr.msra.gmra.mrb[26].mxu1 %vm272_vm3, %v2125_v57 }
 0x7e1   :  { %6210 = vmatpush3.bf16.msra.mxu1 %v7077_v20  ;;  %5730 = vmatprep.mubr.msk.f32.mxu1 %vm6792_vm0, %v6793_v1 }
 0x7e2   :  { %6211 = vmatprep.subr.bf16.mxu1 %v6791_v0 }
 0x7e5   :  { %6213 = vmatpush3.bf16.msra.mxu1 %v7087_v24 }
 0x7e6   :  { %6220 = vmatprep.subr.bf16.mxu1 %v6791_v0 }
 0x8ab   :  { %v2194_v27 = vpop.f32.mrb[24].mxu1  ;;  %v2264_v51 = vpop.f32.mrb[28].mxu0 }
 0x8ac   :  { %v2195_v59 = vadd.f32 %v7190_v3, %v2194_v27  ;;  %v5688_v60 = vpop.f32.mrb[25].mxu1  ;;  %v5699_v62 = vpop.f32.mrb[29].mxu0  ;;  %v2265_v20 = vadd.f32 %v7195_v4, %v2264_v51  ;;  %v3086_v27 = vld [vmem:[#allocation16] sm:$0xff]  ;;  %v3087_v51 = vld [vmem:[#allocation16 + $0x8] sm:$0xff] }
 0x8ad   :  { %v3088_v60 = vld [vmem:[#allocation16 + $0x10] sm:$0xff]  ;;  %v3089_v62 = vld [vmem:[#allocation16 + $0x18] sm:$0xff] }
 0x8ae   :  { %v2338_v5 = vadd.f32 %v2195_v59, %v7361_v30  ;;  %v2345_v43 = vadd.f32 %v2265_v20, %v7178_v61  ;;  %v7418_v59 = vpack.c.bf16 %v3087_v51, %v3086_v27  ;;  %v7422_v20 = vpack.c.bf16 %v3089_v62, %v3088_v60 }
 0x8b0   :  { %v5088_v7 = vmul.f32 -1.442695, %v2338_v5  ;;  %v5089_v10 = vmul.f32 -1.442695, %v2345_v43 }
 0x8b2   :  { %6480 = vpow2.f32 %v5088_v7 }
 0x8b3   :  { %v2334_v24 = vpop.f32.mrb[26].mxu1  ;;  %6482 = vpow2.f32 %v5089_v10 }
 0x8b4   :  { %v5710_v8 = vpop.f32.mrb[27].mxu1  ;;  %v2335_v13 = vadd.f32 %v7203_v21, %v2334_v24 }
 0x8bc   :  { %v6481_v11 = vpop.eup %6480 }
 0x8bd   :  { %v2342_v12 = vadd.f32 1.0, %v6481_v11  ;;  %v6483_v36 = vpop.eup %6482 }
 0x8be   :  { %v2349_v63 = vadd.f32 1.0, %v6483_v36 }
 0x8bf   :  { %6484 = vrcp.f32 %v2342_v12 }
 0x8c0   :  { %6486 = vrcp.f32 %v2349_v63 }
 0x8c9   :  { %v6485_v14 = vpop.eup %6484 }
 0x8ca   :  { %v2352_v6 = vmul.f32 %v6485_v14, %v2335_v13  ;;  %v6487_v15 = vpop.eup %6486 }
 0x8cb   :  { %v2355_v16 = vsub.f32 1.0, %v6487_v15  ;;  %v2358_v19 = vmul.f32 %v6487_v15, %v2125_v57 }
 0x8cc   :  { %v2353_v9 = vadd.f32 %v2352_v6, %v7167_v49 }
 0x8ce   :  { %6488 = vtanh.f32 %v2353_v9 }
 0x8d8   :  { %v6489_v17 = vpop.eup %6488 }
 0x8d9   :  { %v2356_v18 = vmul.f32 %v6489_v17, %v2355_v16 }
 0x8db   :  { %v7369_v22 = vadd.f32 %v2358_v19, %v2356_v18 }
 0x8dd   :  { %5720 = vmatmul.mubr.msk.f32.vlgmr.msra.gmra.mrb[30].mxu0 %vm272_vm3, %v7369_v22  ;;  %5731 = vmatmul.mubr.msk.f32.vlgmr.msra.gmra.mrb[28].mxu1 %vm272_vm3, %v7369_v22 }
 0x8de   :  { %6216 = vmatpush3.bf16.msra.mxu0 %v7135_v39  ;;  %5741 = vmatprep.mubr.msk.f32.mxu0 %vm6792_vm0, %v6793_v1  ;;  %v6230_v39 = vpack.c.bf16 %v2608_v31, %v2607_v29  ;;  %v2601_v29 = vrot.slane %v7369_v22, 4 }
 0x8df   :  { %6217 = vmatprep.subr.bf16.mxu0 %v6791_v0  ;;  %5752 = vmatprep.mubr.msk.f32.mxu1 %vm6792_vm0, %v6793_v1 }
 0x8e0   :  { %6222 = vmatpush3.bf16.msra.mxu1 %v6221_v48  ;;  %v2936_v48 = vld [vmem:[#allocation14 + $0x58] sm:$0xff] }
 0x8e1   :  { %6223 = vmatprep.subr.bf16.mxu1 %v6791_v0  ;;  %v6248_v2 = vpack.c.bf16 %v2936_v48, %v2935_v47 }
 0x8e2   :  { %6219 = vmatpush3.bf16.msra.mxu0 %v7146_v42  ;;  %v2771_v42 = vld [vmem:[#allocation13 + $0x30] sm:$0xff] }
 0x8e3   :  { %6226 = vmatprep.subr.bf16.mxu0 %v6791_v0  ;;  %v6242_v35 = vpack.c.bf16 %v2772_v58, %v2771_v42 }
 0x8e4   :  { %6225 = vmatpush3.bf16.msra.mxu1 %v6224_v50  ;;  %v3096_v50 = vld [vmem:[#allocation16 + $0x40] sm:$0xff] }
 0x8e5   :  { %5742 = vmatmul.mubr.msk.f32.vlgmr.msra.gmra.mrb[32].mxu0 %vm272_vm3, %v7369_v22  ;;  %6232 = vmatprep.subr.bf16.mxu1 %v6791_v0  ;;  %v7455_v53 = vpack.c.bf16 %v3097_v52, %v3096_v50 }
 0x8e6   :  { %6228 = vmatpush3.bf16.msra.mxu0 %v6227_v28  ;;  %5763 = vmatprep.mubr.msk.f32.mxu0 %vm6792_vm0, %v6793_v1 }
 0x8e7   :  { %6229 = vmatprep.subr.bf16.mxu0 %v6791_v0 }
 0x8ea   :  { %6231 = vmatpush3.bf16.msra.mxu0 %v6230_v39 }
 0x8eb   :  { %6238 = vmatprep.subr.bf16.mxu0 %v6791_v0 }
 0x8ed   :  { %5764 = vmatmul.mubr.msk.f32.vlgmr.msra.gmra.mrb[34].mxu0 %vm272_vm3, %v7171_v54 }
 0x8ee   :  { %6240 = vmatpush3.bf16.msra.mxu0 %v6239_v33  ;;  %5785 = vmatprep.mubr.msk.f32.mxu0 %vm6792_vm0, %v6793_v1 }
 0x8ef   :  { %6241 = vmatprep.subr.bf16.mxu0 %v6791_v0 }
 0x8f2   :  { %6243 = vmatpush3.bf16.msra.mxu0 %v6242_v35 }
 0x8f3   :  { %6250 = vmatprep.subr.bf16.mxu0 %v6791_v0 }
 0x8f5   :  { %5786 = vmatmul.mubr.msk.f32.vlgmr.msra.gmra.mrb[36].mxu0 %vm272_vm3, %v7171_v54 }
 0x8f6   :  { %6252 = vmatpush3.bf16.msra.mxu0 %v6251_v40  ;;  %5807 = vmatprep.mubr.msk.f32.mxu0 %vm6792_vm0, %v6793_v1 }
 0x8f7   :  { %6253 = vmatprep.subr.bf16.mxu0 %v6791_v0 }
 0x8fa   :  { %6255 = vmatpush3.bf16.msra.mxu0 %v6254_v46  ;;  %v2777_v46 = vld [vmem:[#allocation14 + $0x38] sm:$0xff] }
 0x8fb   :  { %6262 = vmatprep.subr.bf16.mxu0 %v6791_v0  ;;  %v6236_v22 = vpack.c.bf16 %v2777_v46, %v2776_v44 }
 0x8fd   :  { %5808 = vmatmul.mubr.msk.f32.vlgmr.msra.gmra.mrb[38].mxu0 %vm272_vm3, %v7171_v54  ;;  %v3093_v54 = vld [vmem:[#allocation16 + $0x30] sm:$0xff] }
 0x8fe   :  { %5829 = vmatprep.mubr.msk.f32.mxu0 %vm6792_vm0, %v6793_v1  ;;  %6264 = vmatpush3.bf16.msra.mxu0 %v7407_v55  ;;  %v7411_v57 = vpack.c.bf16 %v3094_v56, %v3093_v54  ;;  %v3098_v54 = vld [vmem:[#allocation16 + $0x50] sm:$0xff]  ;;  %v3099_v56 = vld [vmem:[#allocation16 + $0x58] sm:$0xff] }
 0x8ff   :  { %6265 = vmatprep.subr.bf16.mxu0 %v6791_v0  ;;  %v7460_v27 = vpack.c.bf16 %v3099_v56, %v3098_v54 }
 0x902   :  { %6267 = vmatpush3.bf16.msra.mxu0 %v7411_v57 }
 0x903   :  { %6274 = vmatprep.subr.bf16.mxu0 %v6791_v0 }
 0x905   :  { %5830 = vmatmul.mubr.f32.vlgmr.msra.gmra.mrb[40].mxu0 %v6793_v1 }
 0x906   :  { %5851 = vmatprep.mubr.msk.f32.mxu0 %vm6792_vm0, %v6793_v1  ;;  %6276 = vmatpush3.bf16.msra.mxu0 %v7418_v59 }
 0x907   :  { %6277 = vmatprep.subr.bf16.mxu0 %v6791_v0 }
 0x90a   :  { %6279 = vmatpush3.bf16.msra.mxu0 %v7422_v20 }
 0x90b   :  { %6286 = vmatprep.subr.bf16.mxu0 %v6791_v0 }
 0x9b0   :  { %v2429_v5 = vpop.f32.mrb[30].mxu0  ;;  %v2499_v7 = vpop.f32.mrb[28].mxu1 }
 0x9b1   :  { %v2430_v43 = vadd.f32 %v7190_v3, %v2429_v5  ;;  %v2500_v24 = vadd.f32 %v7195_v4, %v2499_v7  ;;  %v5721_v8 = vpop.f32.mrb[31].mxu0  ;;  %v5732_v10 = vpop.f32.mrb[29].mxu1 }
 0x9b3   :  { %v2574_v11 = vrot.slane %v2430_v43, 4  ;;  %v2584_v12 = vrot.slane %v2500_v24, 4 }
 0x9b5   :  { %v2576_v36 = vadd.f32 %v2574_v11, %v7361_v30  ;;  %v2586_v63 = vadd.f32 %v2584_v12, %v7178_v61 }
 0x9b7   :  { %v5093_v13 = vmul.f32 -1.442695, %v2576_v36  ;;  %v5094_v14 = vmul.f32 -1.442695, %v2586_v63  ;;  %v5097_v36 = vld [vmem:[%s7816_s14] ss:$0 sm:$0xff] }
 0x9b8   :  { %v2569_v6 = vpop.f32.mrb[32].mxu0  ;;  %v7483_v63 = vld [vmem:[%s7817_s15] sm:$0x1] }
 0x9b9   :  { %6490 = vpow2.f32 %v5093_v13  ;;  %v5743_v9 = vpop.f32.mrb[33].mxu0  ;;  %v2570_v61 = vadd.f32 %v7203_v21, %v2569_v6  ;;  %v6233_v21 = vpack.c.bf16 %v2775_v38, %v2774_v37  ;;  %v5101_v13 = vld [vmem:[%s7816_s14 + $0x1] ss:$0 sm:$0xff] }
 0x9ba   :  { %6492 = vpow2.f32 %v5094_v14  ;;  %v7491_v14 = vld [vmem:[%s7817_s15 + $0x1] sm:$0x1] }
 0x9bb   :  { %v2594_v23 = vrot.slane %v2570_v61, 4 }
 0x9c0   :  { %v7430_v15 = vpop.f32.mrb[34].mxu0 }
 0x9c1   :  { %v5765_v16 = vpop.f32.mrb[35].mxu0 }
 0x9c3   :  { %v6491_v3 = vpop.eup %6490 }
 0x9c4   :  { %v6493_v17 = vpop.eup %6492  ;;  %v2580_v4 = vadd.f32 1.0, %v6491_v3 }
 0x9c5   :  { %v2590_v18 = vadd.f32 1.0, %v6493_v17 }
 0x9c6   :  { %6494 = vrcp.f32 %v2580_v4 }
 0x9c7   :  { %6496 = vrcp.f32 %v2590_v18 }
 0x9c8   :  { %v7432_v19 = vpop.f32.mrb[36].mxu0 }
 0x9c9   :  { %v5787_v30 = vpop.f32.mrb[37].mxu0 }
 0x9d0   :  { %v6495_v25 = vpop.eup %6494  ;;  %v7435_v28 = vpop.f32.mrb[38].mxu0 }
 0x9d1   :  { %v6497_v31 = vpop.eup %6496  ;;  %v2596_v39 = vmul.f32 %v6495_v25, %v2594_v23  ;;  %v5809_v32 = vpop.f32.mrb[39].mxu0 }
 0x9d2   :  { %v2603_v26 = vmul.f32 %v6497_v31, %v2601_v29  ;;  %v2599_v42 = vsub.f32 1.0, %v6497_v31  ;;  %v7504_v31 = vld [vmem:[%s7817_s15 + $0x2] sm:$0x1] }
 0x9d3   :  { %v2597_v33 = vadd.f32 %v2596_v39, %v7167_v49  ;;  %v2933_v49 = vld [vmem:[#allocation14 + $0x40] sm:$0xff] }
 0x9d4   :  { %v6245_v34 = vpack.c.bf16 %v2934_v45, %v2933_v49 }
 0x9d5   :  { %6498 = vtanh.f32 %v2597_v33 }
 0x9d8   :  { %v3241_v51 = vpop.f32.mrb[40].mxu0 }
 0x9d9   :  { %v5831_v60 = vpop.f32.mrb[41].mxu0  ;;  %v3242_v17 = vadd.f32 %v7491_v14, %v3241_v51 }
 0x9df   :  { %v6499_v58 = vpop.eup %6498 }
 0x9e0   :  { %v2600_v35 = vmul.f32 %v6499_v58, %v2599_v42 }
 0x9e2   :  { %v2604_v40 = vadd.f32 %v2603_v26, %v2600_v35  ;;  %v5105_v26 = vld [vmem:[%s7816_s14 + $0x2] ss:$0 sm:$0xff] }
 0x9e4   :  { %v2614_v41 = vrot.slane %v2604_v40, 4 }
 0x9e6   :  { %5753 = vmatmul.mubr.msk.f32.vlgmr.msra.gmra.mrb[30].mxu1 %vm272_vm3, %v2614_v41 }
 0x9e7   :  { %6234 = vmatpush3.bf16.msra.mxu1 %v6233_v21  ;;  %5774 = vmatprep.mubr.msk.f32.mxu1 %vm6792_vm0, %v6793_v1 }
 0x9e8   :  { %6235 = vmatprep.subr.bf16.mxu1 %v6791_v0 }
 0x9eb   :  { %6237 = vmatpush3.bf16.msra.mxu1 %v6236_v22 }
 0x9ec   :  { %6244 = vmatprep.subr.bf16.mxu1 %v6791_v0 }
 0x9ee   :  { %5775 = vmatmul.mubr.msk.f32.vlgmr.msra.gmra.mrb[32].mxu1 %vm272_vm3, %v2614_v41 }
 0x9ef   :  { %6246 = vmatpush3.bf16.msra.mxu1 %v6245_v34  ;;  %5796 = vmatprep.mubr.msk.f32.mxu1 %vm6792_vm0, %v6793_v1 }
 0x9f0   :  { %6247 = vmatprep.subr.bf16.mxu1 %v6791_v0 }
 0x9f3   :  { %6249 = vmatpush3.bf16.msra.mxu1 %v6248_v2 }
 0x9f4   :  { %6256 = vmatprep.subr.bf16.mxu1 %v6791_v0 }
 0x9f6   :  { %5797 = vmatmul.mubr.msk.f32.vlgmr.msra.gmra.mrb[34].mxu1 %vm272_vm3, %v2614_v41 }
 0x9f7   :  { %6258 = vmatpush3.bf16.msra.mxu1 %v7418_v59  ;;  %5818 = vmatprep.mubr.msk.f32.mxu1 %vm6792_vm0, %v6793_v1 }
 0x9f8   :  { %6259 = vmatprep.subr.bf16.mxu1 %v6791_v0 }
 0x9fb   :  { %6261 = vmatpush3.bf16.msra.mxu1 %v7422_v20 }
 0x9fc   :  { %6268 = vmatprep.subr.bf16.mxu1 %v6791_v0 }
 0x9fe   :  { %5819 = vmatmul.mubr.f32.vlgmr.msra.gmra.mrb[36].mxu1 %v6793_v1 }
 0x9ff   :  { %6270 = vmatpush3.bf16.msra.mxu1 %v7455_v53  ;;  %5840 = vmatprep.mubr.msk.f32.mxu1 %vm6792_vm0, %v6793_v1 }
 0xa00   :  { %6271 = vmatprep.subr.bf16.mxu1 %v6791_v0 }
 0xa03   :  { %6273 = vmatpush3.bf16.msra.mxu1 %v7460_v27 }
 0xa04   :  { %6280 = vmatprep.subr.bf16.mxu1 %v6791_v0 }
 0xa06   :  { %5841 = vmatmul.mubr.f32.vlgmr.msra.gmra.mrb[38].mxu1 %v6793_v1 }
 0xa07   :  { %6282 = vmatpush3.bf16.msra.mxu1 %v7407_v55  ;;  %5862 = vmatprep.mubr.msk.f32.mxu1 %vm6792_vm0, %v6793_v1 }
 0xa08   :  { %6283 = vmatprep.subr.bf16.mxu1 %v6791_v0 }
 0xa0b   :  { %6285 = vmatpush3.bf16.msra.mxu1 %v7411_v57 }
 0xa0c   :  { %6292 = vmatprep.subr.bf16.mxu1 %v6791_v0 }
 0xab9   :  { %v2683_v62 = vpop.f32.mrb[30].mxu1 }
 0xaba   :  { %v2757_v5 = vadd.f32 %v7430_v15, %v2683_v62  ;;  %v5754_v7 = vpop.f32.mrb[31].mxu1 }
 0xabc   :  { %v7493_v9 = vadd.f32 %v5097_v36, %v2757_v5 }
 0xac1   :  { %v2844_v43 = vpop.f32.mrb[32].mxu1 }
 0xac2   :  { %v2915_v24 = vadd.f32 %v7432_v19, %v2844_v43  ;;  %v5776_v8 = vpop.f32.mrb[33].mxu1 }
 0xac4   :  { %v7496_v3 = vadd.f32 %v5101_v13, %v2915_v24 }
 0xac6   :  { %v3322_v19 = vadd.f32 %v3242_v17, %v7496_v3 }
 0xac8   :  { %v5109_v23 = vmul.f32 -1.442695, %v3322_v19 }
 0xac9   :  { %v3003_v10 = vpop.f32.mrb[34].mxu1 }
 0xaca   :  { %v3074_v11 = vadd.f32 %v7435_v28, %v3003_v10  ;;  %v5798_v12 = vpop.f32.mrb[35].mxu1 }
 0xacc   :  { %v7510_v42 = vadd.f32 %v5105_v26, %v3074_v11 }
 0xad1   :  { %v3171_v6 = vpop.f32.mrb[36].mxu1 }
 0xad2   :  { %v3172_v15 = vadd.f32 %v3171_v6, %v7483_v63  ;;  %v5820_v16 = vpop.f32.mrb[37].mxu1 }
 0xad4   :  { %v3315_v4 = vadd.f32 %v3172_v15, %v7493_v9 }
 0xad6   :  { %v5108_v18 = vmul.f32 -1.442695, %v3315_v4 }
 0xad8   :  { %6500 = vpow2.f32 %v5108_v18 }
 0xad9   :  { %v3311_v30 = vpop.f32.mrb[38].mxu1  ;;  %6502 = vpow2.f32 %v5109_v23 }
 0xada   :  { %v5842_v61 = vpop.f32.mrb[39].mxu1  ;;  %v3312_v32 = vadd.f32 %v7504_v31, %v3311_v30 }
 0xae2   :  { %v6501_v25 = vpop.eup %6500 }
 0xae3   :  { %v3319_v28 = vadd.f32 1.0, %v6501_v25  ;;  %v6503_v29 = vpop.eup %6502 }
 0xae4   :  { %v3326_v39 = vadd.f32 1.0, %v6503_v29 }
 0xae5   :  { %6504 = vrcp.f32 %v3319_v28 }
 0xae6   :  { %6506 = vrcp.f32 %v3326_v39 }
 0xaef   :  { %v6505_v33 = vpop.eup %6504 }
 0xaf0   :  { %v3329_v58 = vmul.f32 %v6505_v33, %v3312_v32  ;;  %v6507_v37 = vpop.eup %6506 }
 0xaf1   :  { %v3332_v38 = vsub.f32 1.0, %v6507_v37  ;;  %v3334_v41 = vmul.f32 0.0, %v6507_v37 }
 0xaf2   :  { %v3330_v35 = vadd.f32 %v3329_v58, %v7510_v42 }
 0xaf4   :  { %6508 = vtanh.f32 %v3330_v35 }
 0xafe   :  { %v6509_v40 = vpop.eup %6508 }
 0xaff   :  { %v3333_v21 = vmul.f32 %v6509_v40, %v3332_v38 }
 0xb01   :  { %v3335_v44 = vadd.f32 %v3334_v41, %v3333_v21 }
 0xb03   :  { %5852 = vmatmul.mubr.msk.f32.vlgmr.msra.gmra.mrb[42].mxu0 %vm272_vm3, %v3335_v44  ;;  %5863 = vmatmul.mubr.msk.f32.vlgmr.msra.gmra.mrb[40].mxu1 %vm272_vm3, %v3335_v44  ;;  %v3577_v11 = vrot.slane %v3335_v44, 7 }
 0xb04   :  { %6288 = vmatpush3.bf16.msra.mxu0 %v7455_v53  ;;  %5873 = vmatprep.mubr.msk.f32.mxu0 %vm6792_vm0, %v6793_v1 }
 0xb05   :  { %6289 = vmatprep.subr.bf16.mxu0 %v6791_v0  ;;  %6294 = vmatpush3.bf16.msra.mxu1 %v7418_v59 }
 0xb06   :  { %6295 = vmatprep.subr.bf16.mxu1 %v6791_v0  ;;  %5884 = vmatprep.mubr.msk.f32.mxu1 %vm6792_vm0, %v6793_v1 }
 0xb08   :  { %6291 = vmatpush3.bf16.msra.mxu0 %v7460_v27 }
 0xb09   :  { %6298 = vmatprep.subr.bf16.mxu0 %v6791_v0  ;;  %6297 = vmatpush3.bf16.msra.mxu1 %v7422_v20 }
 0xb0a   :  { %6304 = vmatprep.subr.bf16.mxu1 %v6791_v0 }
 0xb0b   :  { %5874 = vmatmul.mubr.msk.f32.vlgmr.msra.gmra.mrb[44].mxu0 %vm272_vm3, %v3335_v44 }
 0xb0c   :  { %6300 = vmatpush3.bf16.msra.mxu0 %v7407_v55  ;;  %5895 = vmatprep.mubr.msk.f32.mxu0 %vm6792_vm0, %v6793_v1 }
 0xb0d   :  { %6301 = vmatprep.subr.bf16.mxu0 %v6791_v0 }
 0xb10   :  { %6303 = vmatpush3.bf16.msra.mxu0 %v7411_v57 }
 0xb11   :  { %6310 = vmatprep.subr.bf16.mxu0 %v6791_v0 }
 0xbd6   :  { %v3405_v46 = vpop.f32.mrb[42].mxu0  ;;  %v3475_v22 = vpop.f32.mrb[40].mxu1 }
 0xbd7   :  { %v3406_v49 = vadd.f32 %v3405_v46, %v7483_v63  ;;  %v3476_v45 = vadd.f32 %v7491_v14, %v3475_v22  ;;  %v5853_v34 = vpop.f32.mrb[43].mxu0  ;;  %v5864_v47 = vpop.f32.mrb[41].mxu1 }
 0xbd9   :  { %v3550_v48 = vrot.slane %v3406_v49, 7  ;;  %v3560_v2 = vrot.slane %v3476_v45, 7 }
 0xbdb   :  { %v3552_v50 = vadd.f32 %v3550_v48, %v7493_v9  ;;  %v3562_v52 = vadd.f32 %v3560_v2, %v7496_v3 }
 0xbdd   :  { %v5113_v54 = vmul.f32 -1.442695, %v3552_v50  ;;  %v5114_v56 = vmul.f32 -1.442695, %v3562_v52  ;;  %v4074_v50 = vld [vmem:[#allocation10] sm:$0xff]  ;;  %v4075_v52 = vld [vmem:[#allocation10 + $0x8] sm:$0xff] }
 0xbde   :  { %v3545_v51 = vpop.f32.mrb[44].mxu0 }
 0xbdf   :  { %6510 = vpow2.f32 %v5113_v54  ;;  %v5875_v60 = vpop.f32.mrb[45].mxu0  ;;  %v3546_v24 = vadd.f32 %v7504_v31, %v3545_v51  ;;  %v6329_v54 = vpack.c.bf16 %v4075_v52, %v4074_v50 }
 0xbe0   :  { %6512 = vpow2.f32 %v5114_v56  ;;  %v4151_v56 = vld [vmem:[%s7847_s2 + $0x8] sm:$0xff]  ;;  %v4152_v60 = vld [vmem:[%s7847_s2 + $0x10] sm:$0xff] }
 0xbe1   :  { %v3570_v8 = vrot.slane %v3546_v24, 7 }
 0xbe9   :  { %v6511_v62 = vpop.eup %6510 }
 0xbea   :  { %v6513_v5 = vpop.eup %6512  ;;  %v3556_v7 = vadd.f32 1.0, %v6511_v62  ;;  %v4153_v62 = vld [vmem:[%s7847_s2 + $0x18] sm:$0xff] }
 0xbeb   :  { %v3566_v43 = vadd.f32 1.0, %v6513_v5  ;;  %v6335_v5 = vpack.c.bf16 %v4153_v62, %v4152_v60  ;;  %v5131_v60 = vld [vmem:[%s7822_s20 + $0x20] sm:$0xff]  ;;  %v5132_v62 = vld [vmem:[%s7822_s20 + $0x28] sm:$0xff] }
 0xbec   :  { %6514 = vrcp.f32 %v3556_v7  ;;  %v4231_v7 = vld [vmem:[%s7819_s17] sm:$0xff] }
 0xbed   :  { %6516 = vrcp.f32 %v3566_v43  ;;  %v4232_v43 = vld [vmem:[%s7819_s17 + $0x8] sm:$0xff] }
 0xbee   :  { %v6338_v24 = vpack.c.bf16 %v4232_v43, %v4231_v7  ;;  %v6362_v7 = vpack.c.bf16 %v5132_v62, %v5131_v60  ;;  %v5133_v43 = vld [vmem:[%s7822_s20 + $0x30] sm:$0xff] }
 0xbf6   :  { %v6515_v10 = vpop.eup %6514 }
 0xbf7   :  { %v6517_v12 = vpop.eup %6516  ;;  %v3572_v36 = vmul.f32 %v6515_v10, %v3570_v8  ;;  %v4233_v8 = vld [vmem:[%s7819_s17 + $0x10] sm:$0xff]  ;;  %v4234_v10 = vld [vmem:[%s7819_s17 + $0x18] sm:$0xff] }
 0xbf8   :  { %v3579_v13 = vmul.f32 %v6517_v12, %v3577_v11  ;;  %v3575_v15 = vsub.f32 1.0, %v6517_v12  ;;  %v6341_v11 = vpack.c.bf16 %v4234_v10, %v4233_v8 }
 0xbf9   :  { %v3573_v6 = vadd.f32 %v3572_v36, %v7510_v42 }
 0xbfb   :  { %6518 = vtanh.f32 %v3573_v6 }
 0xc05   :  { %v6519_v16 = vpop.eup %6518 }
 0xc06   :  { %v3576_v17 = vmul.f32 %v6519_v16, %v3575_v15 }
 0xc08   :  { %v3580_v4 = vadd.f32 %v3579_v13, %v3576_v17 }
 0xc0a   :  { %v3582_v18 = vrot.slane %v3580_v4, 1  ;;  %v3823_v41 = vrot.slane %v3580_v4, 7 }
 0xc0c   :  { %5885 = vmatmul.mubr.msk.f32.vlgmr.msra.gmra.mrb[42].mxu1 %vm272_vm3, %v3582_v18  ;;  %5896 = vmatmul.mubr.msk.f32.vlgmr.msra.gmra.mrb[46].mxu0 %vm272_vm3, %v3582_v18 }
 0xc0d   :  { %6306 = vmatpush3.bf16.msra.mxu1 %v7455_v53  ;;  %5906 = vmatprep.mubr.msk.f32.mxu1 %vm6792_vm0, %v6793_v1 }
 0xc0e   :  { %6307 = vmatprep.subr.bf16.mxu1 %v6791_v0  ;;  %6312 = vmatpush3.bf16.msra.mxu0 %v7418_v59 }
 0xc0f   :  { %6313 = vmatprep.subr.bf16.mxu0 %v6791_v0  ;;  %5917 = vmatprep.mubr.msk.f32.mxu0 %vm6792_vm0, %v6793_v1 }
 0xc11   :  { %6309 = vmatpush3.bf16.msra.mxu1 %v7460_v27 }
 0xc12   :  { %6316 = vmatprep.subr.bf16.mxu1 %v6791_v0  ;;  %6315 = vmatpush3.bf16.msra.mxu0 %v7422_v20 }
 0xc13   :  { %6322 = vmatprep.subr.bf16.mxu0 %v6791_v0 }
 0xc14   :  { %5907 = vmatmul.mubr.msk.f32.vlgmr.msra.gmra.mrb[44].mxu1 %vm272_vm3, %v3582_v18 }
 0xc15   :  { %6318 = vmatpush3.bf16.msra.mxu1 %v7407_v55  ;;  %5928 = vmatprep.mubr.msk.f32.mxu1 %vm6792_vm0, %v6793_v1 }
 0xc16   :  { %6319 = vmatprep.subr.bf16.mxu1 %v6791_v0 }
 0xc19   :  { %6321 = vmatpush3.bf16.msra.mxu1 %v7411_v57 }
 0xc1a   :  { %6337 = vmatprep.subr.bf16.mxu1 %v6791_v0 }
 0xcdf   :  { %v3651_v59 = vpop.f32.mrb[42].mxu1  ;;  %v3721_v19 = vpop.f32.mrb[46].mxu0 }
 0xce0   :  { %v3652_v30 = vadd.f32 %v3651_v59, %v7483_v63  ;;  %v3722_v20 = vadd.f32 %v7491_v14, %v3721_v19  ;;  %v5886_v61 = vpop.f32.mrb[43].mxu1  ;;  %v5897_v23 = vpop.f32.mrb[47].mxu0 }
 0xce1   :  { %v4227_v23 = vld [vmem:[%s7818_s16] sm:$0xff] }
 0xce2   :  { %v3796_v25 = vrot.slane %v3652_v30, 6  ;;  %v3806_v28 = vrot.slane %v3722_v20, 6 }
 0xce4   :  { %v3798_v55 = vadd.f32 %v3796_v25, %v7493_v9  ;;  %v3808_v29 = vadd.f32 %v3806_v28, %v7496_v3 }
 0xce6   :  { %v5118_v39 = vmul.f32 -1.442695, %v3798_v55  ;;  %v5119_v32 = vmul.f32 -1.442695, %v3808_v29  ;;  %v4230_v55 = vld [vmem:[%s7818_s16 + $0x18] sm:$0xff] }
 0xce7   :  { %v3791_v26 = vpop.f32.mrb[44].mxu1 }
 0xce8   :  { %6520 = vpow2.f32 %v5118_v39  ;;  %v5908_v57 = vpop.f32.mrb[45].mxu1  ;;  %v3792_v38 = vadd.f32 %v7504_v31, %v3791_v26 }
 0xce9   :  { %6522 = vpow2.f32 %v5119_v32 }
 0xcea   :  { %v3816_v40 = vrot.slane %v3792_v38, 6 }
 0xcf2   :  { %v6521_v33 = vpop.eup %6520 }
 0xcf3   :  { %v6523_v58 = vpop.eup %6522  ;;  %v3802_v35 = vadd.f32 1.0, %v6521_v33 }
 0xcf4   :  { %v3812_v37 = vadd.f32 1.0, %v6523_v58 }
 0xcf5   :  { %6524 = vrcp.f32 %v3802_v35 }
 0xcf6   :  { %6526 = vrcp.f32 %v3812_v37 }
 0xcff   :  { %v6525_v21 = vpop.eup %6524 }
 0xd00   :  { %v6527_v44 = vpop.eup %6526  ;;  %v3818_v46 = vmul.f32 %v6525_v21, %v3816_v40 }
 0xd01   :  { %v3825_v22 = vmul.f32 %v6527_v44, %v3823_v41  ;;  %v3821_v45 = vsub.f32 1.0, %v6527_v44 }
 0xd02   :  { %v3819_v49 = vadd.f32 %v3818_v46, %v7510_v42 }
 0xd04   :  { %6528 = vtanh.f32 %v3819_v49 }
 0xd0e   :  { %v6529_v34 = vpop.eup %6528 }
 0xd0f   :  { %v3822_v47 = vmul.f32 %v6529_v34, %v3821_v45  ;;  %v4426_v45 = vld [vmem:[%s7821_s19] sm:$0xff] }
 0xd10   :  { %v4422_v34 = vld [vmem:[%s7820_s18] sm:$0xff] }
 0xd11   :  { %v7567_v48 = vadd.f32 %v3825_v22, %v3822_v47 }
 0xd13   :  { %v3828_v2 = vrot.slane %v7567_v48, 2  ;;  %v4069_v37 = vrot.slane %v7567_v48, 7  ;;  %v4428_v48 = vld [vmem:[%s7821_s19 + $0x10] sm:$0xff] }
 0xd15   :  { %5918 = vmatmul.mubr.msk.f32.vlgmr.msra.gmra.mrb[48].mxu0 %vm272_vm3, %v3828_v2  ;;  %5929 = vmatmul.mubr.msk.f32.vlgmr.msra.gmra.mrb[46].mxu1 %vm272_vm3, %v3828_v2 }
 0xd16   :  { %6324 = vmatpush3.bf16.msra.mxu0 %v7455_v53  ;;  %5939 = vmatprep.mubr.msk.f32.mxu0 %vm6792_vm0, %v6793_v1  ;;  %v4073_v53 = vld [vmem:[#allocation5] sm:$0x7f] }
 0xd17   :  { %6325 = vmatprep.subr.bf16.mxu0 %v6791_v0  ;;  %5968 = vmatprep.mubr.msk.f32.mxu1 %vm6792_vm0, %v6793_v1 }
 0xd18   :  { %6339 = vmatpush3.bf16.msra.mxu1 %v6338_v24  ;;  %v5134_v24 = vld [vmem:[%s7822_s20 + $0x38] sm:$0xff] }
 0xd19   :  { %6340 = vmatprep.subr.bf16.mxu1 %v6791_v0  ;;  %v6365_v10 = vpack.c.bf16 %v5134_v24, %v5133_v43 }
 0xd1a   :  { %6327 = vmatpush3.bf16.msra.mxu0 %v7460_v27  ;;  %v4150_v27 = vld [vmem:[%s7847_s2] sm:$0xff] }
 0xd1b   :  { %6328 = vmatprep.subr.bf16.mxu0 %v6791_v0  ;;  %v6332_v51 = vpack.c.bf16 %v4151_v56, %v4150_v27  ;;  %v4424_v27 = vld [vmem:[%s7820_s18 + $0x10] sm:$0xff]  ;;  %v4425_v56 = vld [vmem:[%s7820_s18 + $0x18] sm:$0xff] }
 0xd1c   :  { %6342 = vmatpush3.bf16.msra.mxu1 %v6341_v11  ;;  %v4611_v11 = vld [vmem:[%s7822_s20] sm:$0xff] }
 0xd1d   :  { %5940 = vmatmul.mubr.msk.f32.vlgmr.msra.gmra.mrb[50].mxu0 %vm272_vm3, %v3828_v2  ;;  %6349 = vmatprep.subr.bf16.mxu1 %v6791_v0  ;;  %v4429_v2 = vld [vmem:[%s7821_s19 + $0x18] sm:$0xff] }
 0xd1e   :  { %6330 = vmatpush3.bf16.msra.mxu0 %v6329_v54  ;;  %5946 = vmatprep.mubr.msk.f32.mxu0 %vm6792_vm0, %v6793_v1 }
 0xd1f   :  { %6331 = vmatprep.subr.bf16.mxu0 %v6791_v0 }
 0xd21   :  { %5947 = vmatmul.mubr.msk.f32.vlgmr.msra.gmra.mrb[52].mxu0 %vm193_vm1, %v4073_v53 }
 0xd22   :  { %5957 = vmatprep.mubr.msk.f32.mxu0 %vm6792_vm0, %v6793_v1  ;;  %6333 = vmatpush3.bf16.msra.mxu0 %v6332_v51  ;;  %v6353_v51 = vpack.c.bf16 %v4429_v2, %v4428_v48 }
 0xd23   :  { %6334 = vmatprep.subr.bf16.mxu0 %v6791_v0 }
 0xd26   :  { %6336 = vmatpush3.bf16.msra.mxu0 %v6335_v5  ;;  %v6359_v5 = vpack.c.bf16 %v4425_v56, %v4424_v27 }
 0xd27   :  { %6343 = vmatprep.subr.bf16.mxu0 %v6791_v0 }
 0xde8   :  { %v3897_v12 = vpop.f32.mrb[48].mxu0  ;;  %v3967_v36 = vpop.f32.mrb[46].mxu1 }
 0xde9   :  { %v3898_v13 = vadd.f32 %v3897_v12, %v7483_v63  ;;  %v3968_v6 = vadd.f32 %v7491_v14, %v3967_v36  ;;  %v5919_v15 = vpop.f32.mrb[49].mxu0  ;;  %v5930_v16 = vpop.f32.mrb[47].mxu1  ;;  %v4228_v63 = vld [vmem:[%s7818_s16 + $0x8] sm:$0xff] }
 0xdea   :  { %v6344_v25 = vpack.c.bf16 %v4228_v63, %v4227_v23  ;;  %v4612_v12 = vld [vmem:[%s7822_s20 + $0x8] sm:$0xff] }
 0xdeb   :  { %v4042_v17 = vrot.slane %v3898_v13, 5  ;;  %v4052_v4 = vrot.slane %v3968_v6, 5  ;;  %v6368_v36 = vpack.c.bf16 %v4612_v12, %v4611_v11  ;;  %v4613_v13 = vld [vmem:[%s7822_s20 + $0x10] sm:$0xff]  ;;  %v4614_v6 = vld [vmem:[%s7822_s20 + $0x18] sm:$0xff] }
 0xdec   :  { %v6371_v15 = vpack.c.bf16 %v4614_v6, %v4613_v13  ;;  %v5138_v13 = vld [vmem:[%s7822_s20 + $0x48] sm:$0xff] }
 0xded   :  { %v4044_v18 = vadd.f32 %v4042_v17, %v7493_v9  ;;  %v4054_v59 = vadd.f32 %v4052_v4, %v7496_v3  ;;  %v4229_v3 = vld [vmem:[%s7818_s16 + $0x10] sm:$0xff]  ;;  %v6794_v17 = vmov 0   ;;  %v4308_v4 = vlaneseq }
 0xdee   :  { %v6347_v29 = vpack.c.bf16 %v4230_v55, %v4229_v3  ;;  %6419 = vset.pattern.permute.xlu0 %v6794_v17 }
 0xdef   :  { %v5123_v19 = vmul.f32 -1.442695, %v4044_v18  ;;  %v5124_v30 = vmul.f32 -1.442695, %v4054_v59  ;;  %v4309_v18 = vshrl.u32 %v4308_v4, 7  ;;  %v4923_v4 = vld [vmem:[%s7823_s21] sm:$0xff] }
 0xdf0   :  { %v4037_v20 = vpop.f32.mrb[50].mxu0 }
 0xdf1   :  { %6530 = vpow2.f32 %v5123_v19  ;;  %v5941_v61 = vpop.f32.mrb[51].mxu0  ;;  %v4038_v33 = vadd.f32 %v7504_v31, %v4037_v20  ;;  %v4427_v31 = vld [vmem:[%s7821_s19 + $0x8] sm:$0xff]  ;;  %v4310_v59 = vsub.s32 0, %v4309_v18 }
 0xdf2   :  { %6532 = vpow2.f32 %v5124_v30  ;;  %v6350_v47 = vpack.c.bf16 %v4427_v31, %v4426_v45  ;;  %v4924_v18 = vld [vmem:[%s7823_s21 + $0x8] sm:$0xff] }
 0xdf3   :  { %v4062_v58 = vrot.slane %v4038_v33, 5 }
 0xdf4   :  { %v4145_v14 = vpop.f32.mrb[52].mxu0 }
 0xdf5   :  { %v4149_v28 = vmax.f32 %v4145_v14, 0.0  ;;  %v5948_v9 = vpop.f32.mrb[53].mxu0 }
 0xdf7   :  { %5958 = vmatmul.mubr.msk.f32.vlgmr.msra.gmra.mrb[54].mxu0 %vm272_vm3, %v4149_v28 }
 0xdf8   :  { %6345 = vmatpush3.bf16.msra.mxu0 %v6344_v25  ;;  %5979 = vmatprep.mubr.msk.f32.mxu0 %vm6792_vm0, %v6793_v1 }
 0xdf9   :  { %6346 = vmatprep.subr.bf16.mxu0 %v6791_v0 }
 0xdfb   :  { %v6531_v39 = vpop.eup %6530 }
 0xdfc   :  { %v6533_v32 = vpop.eup %6532  ;;  %v4048_v26 = vadd.f32 1.0, %v6531_v39  ;;  %6348 = vmatpush3.bf16.msra.mxu0 %v6347_v29 }
 0xdfd   :  { %v4058_v57 = vadd.f32 1.0, %v6533_v32  ;;  %6355 = vmatprep.subr.bf16.mxu0 %v6791_v0 }
 0xdfe   :  { %6534 = vrcp.f32 %v4048_v26 }
 0xdff   :  { %6536 = vrcp.f32 %v4058_v57 }
 0xe08   :  { %v6535_v35 = vpop.eup %6534 }
 0xe09   :  { %v6537_v38 = vpop.eup %6536  ;;  %v4064_v40 = vmul.f32 %v6535_v35, %v4062_v58 }
 0xe0a   :  { %v4071_v21 = vmul.f32 %v6537_v38, %v4069_v37  ;;  %v4067_v44 = vsub.f32 1.0, %v6537_v38 }
 0xe0b   :  { %v4065_v41 = vadd.f32 %v4064_v40, %v7510_v42  ;;  %v4423_v42 = vld [vmem:[%s7820_s18 + $0x8] sm:$0xff] }
 0xe0c   :  { %v6356_v52 = vpack.c.bf16 %v4423_v42, %v4422_v34 }
 0xe0d   :  { %6538 = vtanh.f32 %v4065_v41 }
 0xe17   :  { %v6539_v46 = vpop.eup %6538 }
 0xe18   :  { %v4068_v22 = vmul.f32 %v6539_v46, %v4067_v44 }
 0xe1a   :  { %v4072_v49 = vadd.f32 %v4071_v21, %v4068_v22 }
 0xe1c   :  { %v4691_v16 = vrot.slane %v4072_v49, 3 }
 0xeca   :  { %v7657_v50 = vpop.f32.mrb[54].mxu0 }
 0xecb   :  { %v4312_v54 = vrot.slane %v7657_v50, 1  ;;  %v5959_v53 = vpop.f32.mrb[55].mxu0  ;;  %5969 = vmatmul.mubr.msk.f32.vlgmr.msra.gmra.mrb[48].mxu1 %vm272_vm3, %v7657_v50  ;;  %v4504_v8 = vrot.slane %v7657_v50, 4 }
 0xecc   :  { %6351 = vmatpush3.bf16.msra.mxu1 %v6350_v47  ;;  %5990 = vmatprep.mubr.msk.f32.mxu1 %vm6792_vm0, %v6793_v1 }
 0xecd   :  { %5980 = vmatmul.mubr.msk.f32.vlgmr.msra.gmra.mrb[56].mxu0 %vm272_vm3, %v4312_v54  ;;  %6352 = vmatprep.subr.bf16.mxu1 %v6791_v0 }
 0xece   :  { %6357 = vmatpush3.bf16.msra.mxu0 %v6356_v52  ;;  %6001 = vmatprep.mubr.msk.f32.mxu0 %vm6792_vm0, %v6793_v1 }
 0xecf   :  { %6358 = vmatprep.subr.bf16.mxu0 %v6791_v0 }
 0xed0   :  { %6354 = vmatpush3.bf16.msra.mxu1 %v6353_v51 }
 0xed1   :  { %6361 = vmatprep.subr.bf16.mxu1 %v6791_v0 }
 0xed2   :  { %6360 = vmatpush3.bf16.msra.mxu0 %v6359_v5 }
 0xed3   :  { %5991 = vmatmul.mubr.msk.f32.vlgmr.msra.gmra.mrb[50].mxu1 %vm272_vm3, %v7657_v50  ;;  %6385 = vmatprep.subr.bf16.mxu0 %v6791_v0 }
 0xed4   :  { %6363 = vmatpush3.bf16.msra.mxu1 %v6362_v7  ;;  %6012 = vmatprep.mubr.msk.f32.mxu1 %vm6792_vm0, %v6793_v1 }
 0xed5   :  { %6002 = vmatmul.mubr.msk.f32.vlgmr.msra.gmra.mrb[58].mxu0 %vm272_vm3, %v4504_v8  ;;  %6364 = vmatprep.subr.bf16.mxu1 %v6791_v0 }
 0xed6   :  { %6064 = vmatprep.mubr.msk.f32.mxu0 %vm6792_vm0, %v6793_v1 }
 0xed8   :  { %6366 = vmatpush3.bf16.msra.mxu1 %v6365_v10 }
 0xed9   :  { %6367 = vmatprep.subr.bf16.mxu1 %v6791_v0 }
 0xedb   :  { %6013 = vmatmul.mubr.msk.f32.vlgmr.msra.gmra.mrb[52].mxu1 %vm272_vm3, %v7657_v50  ;;  %v5144_v50 = vld [vmem:[%s7822_s20 + $0x70] sm:$0xff] }
 0xedc   :  { %6369 = vmatpush3.bf16.msra.mxu1 %v6368_v36  ;;  %6023 = vmatprep.mubr.msk.f32.mxu1 %vm6792_vm0, %v6793_v1  ;;  %v5137_v36 = vld [vmem:[%s7822_s20 + $0x40] sm:$0xff] }
 0xedd   :  { %6370 = vmatprep.subr.bf16.mxu1 %v6791_v0  ;;  %v6374_v6 = vpack.c.bf16 %v5138_v13, %v5137_v36 }
 0xee0   :  { %6372 = vmatpush3.bf16.msra.mxu1 %v6371_v15  ;;  %v5139_v15 = vld [vmem:[%s7822_s20 + $0x50] sm:$0xff] }
 0xee1   :  { %6373 = vmatprep.subr.bf16.mxu1 %v6791_v0 }
 0xee3   :  { %6024 = vmatmul.mubr.msk.f32.vlgmr.msra.gmra.mrb[52].mxu1 %vm272_vm3, %v4691_v16  ;;  %v5140_v16 = vld [vmem:[%s7822_s20 + $0x58] sm:$0xff] }
 0xee4   :  { %6034 = vmatprep.mubr.msk.f32.mxu1 %vm6792_vm0, %v6793_v1  ;;  %6375 = vmatpush3.bf16.msra.mxu1 %v6374_v6  ;;  %v6377_v17 = vpack.c.bf16 %v5140_v16, %v5139_v15 }
 0xee5   :  { %6376 = vmatprep.subr.bf16.mxu1 %v6791_v0 }
 0xee8   :  { %6378 = vmatpush3.bf16.msra.mxu1 %v6377_v17 }
 0xee9   :  { %6379 = vmatprep.subr.bf16.mxu1 %v6791_v0 }
 0xf9e   :  { %v4304_v19 = vpop.f32.mrb[48].mxu1 }
 0xf9f   :  { %v4311_v30 = vrot.slane %v4304_v19, %v4310_v59  ;;  %v5970_v20 = vpop.f32.mrb[49].mxu1  ;;  %v6386_v19 = vpack.c.bf16 %v4924_v18, %v4923_v4 }
 0xfa0   :  { %v4381_v61 = vpop.f32.mrb[56].mxu0 }
 0xfa1   :  { %v4382_v23 = vadd.f32 %v4381_v61, %v4311_v30  ;;  %v5981_v63 = vpop.f32.mrb[57].mxu0  ;;  %v4926_v30 = vld [vmem:[%s7823_s21 + $0x18] sm:$0xff]  ;;  %6387 = vmatpush3.bf16.msra.mxu0 %v6386_v19  ;;  %v4927_v61 = vld [vmem:[%s7823_s21 + $0x20] sm:$0xff] }
 0xfa2   :  { %6388 = vmatprep.subr.bf16.mxu0 %v6791_v0 }
 0xfa3   :  { %v4386_v14 = vsel %vm4385_vm4, %v4382_v23, -inf }
 0xfa4   :  { %v4387_v25 = vrot.slane %v4386_v14, 4 }
 0xfa6   :  { %v4388_v28 = vmax.f32 %v4386_v14, %v4387_v25  ;;  %v4496_v9 = vpop.f32.mrb[50].mxu1 }
 0xfa7   :  { %v4503_v3 = vrot.slane %v4496_v9, %v4310_v59  ;;  %v5992_v55 = vpop.f32.mrb[51].mxu1  ;;  %v4925_v59 = vld [vmem:[%s7823_s21 + $0x10] sm:$0xff] }
 0xfa8   :  { %v4389_v29 = vrot.slane %v4388_v28, 2  ;;  %v4573_v39 = vpop.f32.mrb[58].mxu0  ;;  %v6389_v20 = vpack.c.bf16 %v4926_v30, %v4925_v59 }
 0xfa9   :  { %v4574_v32 = vadd.f32 %v4573_v39, %v4503_v3  ;;  %v6003_v26 = vpop.f32.mrb[59].mxu0 }
 0xfaa   :  { %v4390_v57 = vmax.f32 %v4388_v28, %v4389_v29  ;;  %6390 = vmatpush3.bf16.msra.mxu0 %v6389_v20 }
 0xfab   :  { %v4577_v33 = vsel %vm4385_vm4, %v4574_v32, -inf  ;;  %6391 = vmatprep.subr.bf16.mxu0 %v6791_v0 }
 0xfac   :  { %v4391_v58 = vrot.slane %v4390_v57, 1  ;;  %v4578_v35 = vrot.slane %v4577_v33, 4 }
 0xfae   :  { %v4392_v37 = vmax.f32 %v4390_v57, %v4391_v58  ;;  %v4579_v38 = vmax.f32 %v4577_v33, %v4578_v35  ;;  %v5142_v58 = vld [vmem:[%s7822_s20 + $0x60] sm:$0xff] }
 0xfb0   :  { %v4393_v40 = vsub.f32 %v4382_v23, %v4392_v37  ;;  %v4580_v21 = vrot.slane %v4579_v38, 2  ;;  %v4928_v23 = vld [vmem:[%s7823_s21 + $0x28] sm:$0xff] }
 0xfb1   :  { %v6392_v63 = vpack.c.bf16 %v4928_v23, %v4927_v61 }
 0xfb2   :  { %v4394_v41 = vmul.f32 1.442695, %v4393_v40  ;;  %v4581_v44 = vmax.f32 %v4579_v38, %v4580_v21 }
 0xfb3   :  { %6393 = vmatpush3.bf16.msra.mxu0 %v6392_v63 }
 0xfb4   :  { %6540 = vpow2.f32 %v4394_v41  ;;  %v4582_v46 = vrot.slane %v4581_v44, 1  ;;  %6394 = vmatprep.subr.bf16.mxu0 %v6791_v0 }
 0xfb6   :  { %v4583_v22 = vmax.f32 %v4581_v44, %v4582_v46 }
 0xfb8   :  { %v4584_v49 = vsub.f32 %v4574_v32, %v4583_v22 }
 0xfba   :  { %v4585_v45 = vmul.f32 1.442695, %v4584_v49 }
 0xfbc   :  { %6542 = vpow2.f32 %v4585_v45  ;;  %v4929_v45 = vld [vmem:[%s7823_s21 + $0x30] sm:$0xff] }
 0xfbe   :  { %v6541_v31 = vpop.eup %6540 }
 0xfbf   :  { %v4396_v34 = vsel %vm4385_vm4, %v6541_v31, 0.0 }
 0xfc0   :  { %v4397_v42 = vrot.slane %v4396_v34, 4 }
 0xfc2   :  { %v4398_v47 = vadd.f32 %v4397_v42, %v4396_v34 }
 0xfc4   :  { %v4399_v48 = vrot.slane %v4398_v47, 2 }
 0xfc6   :  { %v6543_v2 = vpop.eup %6542  ;;  %v4400_v52 = vadd.f32 %v4399_v48, %v4398_v47 }
 0xfc7   :  { %v4587_v53 = vsel %vm4385_vm4, %v6543_v2, 0.0 }
 0xfc8   :  { %v4588_v27 = vrot.slane %v4587_v53, 4  ;;  %v4401_v56 = vrot.slane %v4400_v52, 1 }
 0xfca   :  { %v4589_v51 = vadd.f32 %v4588_v27, %v4587_v53  ;;  %v4402_v60 = vadd.f32 %v4401_v56, %v4400_v52 }
 0xfcc   :  { %v4590_v62 = vrot.slane %v4589_v51, 2  ;;  %6544 = vrcp.f32 %v4402_v60 }
 0xfce   :  { %v4591_v5 = vadd.f32 %v4590_v62, %v4589_v51 }
 0xfd0   :  { %v4592_v7 = vrot.slane %v4591_v5, 1 }
 0xfd2   :  { %v4593_v43 = vadd.f32 %v4592_v7, %v4591_v5 }
 0xfd4   :  { %6546 = vrcp.f32 %v4593_v43 }
 0xfd6   :  { %v6545_v24 = vpop.eup %6544 }
 0xfd7   :  { %v4404_v10 = vmul.f32 %v6545_v24, %v6541_v31  ;;  %v4930_v31 = vld [vmem:[%s7823_s21 + $0x38] sm:$0xff] }
 0xfd8   :  { %v6395_v34 = vpack.c.bf16 %v4930_v31, %v4929_v45 }
 0xfd9   :  { %4407 = vperm.xlu0 %6419, %v4404_v10  }
 0xfda   :  { %6396 = vmatpush3.bf16.msra.mxu0 %v6395_v34 }
 0xfde   :  { %v6547_v11 = vpop.eup %6546 }
 0xfdf   :  { %v4595_v12 = vmul.f32 %v6547_v11, %v6543_v2 }
 0xfe1   :  { %4598 = vperm.xlu0 %6419, %v4595_v12  }
0x1058   :  { %v4408_v14 = vpop.permute.xlu0 %4407 }
0x1059   :  { %v4411_v25 = vmul.f32 %v4408_v14, %v4312_v54  ;;  %v5143_v54 = vld [vmem:[%s7822_s20 + $0x68] sm:$0xff] }
0x105a   :  { %v6380_v38 = vpack.c.bf16 %v5143_v54, %v5142_v58 }
0x105b   :  { %v4413_v28 = vsel %vm4412_vm5, %v4411_v25, 0.0 }
0x105c   :  { %v4414_v9 = vrot.slane %v4413_v28, 4 }
0x105e   :  { %v4415_v3 = vadd.f32 %v4414_v9, %v4413_v28 }
0x1060   :  { %v4416_v55 = vrot.slane %v4415_v3, 2  ;;  %v4599_v29 = vpop.permute.xlu0 %4598 }
0x1061   :  { %v4602_v39 = vmul.f32 %v4599_v29, %v4504_v8  ;;  %v5145_v8 = vld [vmem:[%s7822_s20 + $0x78] sm:$0xff] }
0x1062   :  { %v4417_v32 = vadd.f32 %v4416_v55, %v4415_v3  ;;  %v6383_v44 = vpack.c.bf16 %v5145_v8, %v5144_v50 }
0x1063   :  { %v4603_v26 = vsel %vm4412_vm5, %v4602_v39, 0.0 }
0x1064   :  { %v4418_v57 = vrot.slane %v4417_v32, 1  ;;  %v4604_v33 = vrot.slane %v4603_v26, 4 }
0x1066   :  { %v4419_v35 = vadd.f32 %v4418_v57, %v4417_v32  ;;  %v4605_v37 = vadd.f32 %v4604_v33, %v4603_v26 }
0x1068   :  { %v4421_v40 = vmul.f32 0.33333334, %v4419_v35  ;;  %v4606_v21 = vrot.slane %v4605_v37, 2 }
0x106a   :  { %v4607_v41 = vadd.f32 %v4606_v21, %v4605_v37  ;;  %6035 = vmatmul.mubr.msk.f32.vlgmr.msra.gmra.mrb[52].mxu1 %vm272_vm3, %v4421_v40 }
0x106b   :  { %6381 = vmatpush3.bf16.msra.mxu1 %v6380_v38  ;;  %6045 = vmatprep.mubr.msk.f32.mxu1 %vm6792_vm0, %v6793_v1 }
0x106c   :  { %v4608_v46 = vrot.slane %v4607_v41, 1  ;;  %6382 = vmatprep.subr.bf16.mxu1 %v6791_v0 }
0x106e   :  { %v4609_v22 = vadd.f32 %v4608_v46, %v4607_v41 }
0x106f   :  { %6384 = vmatpush3.bf16.msra.mxu1 %v6383_v44 }
0x1070   :  { %v4610_v49 = vmul.f32 0.33333334, %v4609_v22 }
0x1072   :  { %6046 = vmatmul.mubr.msk.f32.vlgmr.msra.gmra.mrb[52].mxu1 %vm272_vm3, %v4610_v49 }
0x1145   :  { %v4917_v42 = vpop.f32.mrb[52].mxu1 }
0x1146   :  { %v4922_v1 = vmax.f32 %v4917_v42, 0.0  ;;  %v6047_v47 = vpop.f32.mrb[53].mxu1 }
0x1148   :  { %6065 = vmatmul.mubr.msk.f32.vlgmr.msra.gmra.mrb[60].mxu0 %vm4931_vm6, %v4922_v1 }
0x121b   :  { %v5001_v0 = vpop.f32.mrb[60].mxu0 }
0x121c   :  { %v6066_v48 = vpop.f32.mrb[61].mxu0  ;;  %5006 = vst.msk [vmem:[#allocation17] sm:$0x1] %vm5005_vm7, %v5001_v0 }
0x121d   :  { %6757 = shalt.err (!%p6754_p6)
}
0x121e   :  { %s7848_s22 = sld [smem:[#allocation31_spill]] }
0x1224   :  { %s6758_s13 = scalar_lea.hbm %s7848_s22, 16 }
0x1225   :  { %p6759_p7 = scmp.ne.s32.totalorder %s7848_s22, %s6758_s13  ;;  %p6762_p8 = scmp.lt.u32.totalorder %s6758_s13, %s7848_s22 }
0x1227   :  { %p6764_p9 = pnand %p6762_p8, %p6759_p7 }
0x1229   :  { %6767 = shalt.err (!%p6764_p9)
}
0x122a   :  { %5016 = dma.vmem_to_hbm [thread:$0]  %s5014_s6, 16, %s7848_s22, [#allocation4]  }
0x122b   :  { %6778 = dma.done.wait [#allocation4], 16  }
0x122c   :  { %6779 = vsyncadd [#allocation4], 4294967280 }
0x122d   :  { %5020 = vsyncpa [#allocation3], 1 }
0x122e   :  { %5021 = vsyncpa [#allocation6], 1 }
0x122f   :  { %5022 = vsyncpa [#allocation9], 1 }
0x1230   :  { %5023 = vsyncpa [#allocation12], 1 }
0x1231   :  { %5024 = vsyncpa [#allocation15], 1 }
0x1232   :  { %5025 = vsyncpa [#allocation4], 1 }

</bundles_post_ra>
